<compile_context>
chip_gen: v5e
topology: v5e:2x2
jax: 0.10.0
libtpu: 0.0.40
codegen_flags: <defaults>
</compile_context>

<pallas_src>
import functools

import jax
import jax.numpy as jnp
from jax import lax
from jax.experimental import pallas as pl
from jax.experimental.pallas import tpu as pltpu


def _round_up(x, m):
    return ((x + m - 1) // m) * m


# ---------------------------------------------------------------------------
# Kernel
# ---------------------------------------------------------------------------
def _seq2seq_kernel(T_e, T_d, B_pad, H_k, H_pad,
                    enc_x_ref, dec_x_hbm,
                    w_ih_e_ref, w_hh_e_ref, b_e_ref,
                    w_ih_d_hbm, w_hh_d_hbm, b_d_hbm,
                    w_lin_ref, b_lin_ref,
                    out_ref,
                    xpe_scr, xpd_scr, hdec_scr,
                    dec_x_vmem, w_ih_d_vmem, w_hh_d_vmem, b_d_vmem,
                    dma_sem):
    f32 = jnp.float32

    # --- Kick off decoder-side HBM->VMEM copies; they overlap the encoder projection
    # and the 8-step serial encoder recurrence below.
    cp_dec_x = pltpu.make_async_copy(dec_x_hbm, dec_x_vmem, dma_sem.at[0])
    cp_w_ih_d = pltpu.make_async_copy(w_ih_d_hbm, w_ih_d_vmem, dma_sem.at[1])
    cp_w_hh_d = pltpu.make_async_copy(w_hh_d_hbm, w_hh_d_vmem, dma_sem.at[2])
    cp_b_d = pltpu.make_async_copy(b_d_hbm, b_d_vmem, dma_sem.at[3])
    cp_dec_x.start()
    cp_w_ih_d.start()
    cp_w_hh_d.start()
    cp_b_d.start()

    # --- Encoder input projections x_t @ W_ih + b for all timesteps: one lane-major
    # matmul (K = 8, off the serial critical path).
    xpe_scr[...] = (jnp.dot(enc_x_ref[...], w_ih_e_ref[...],
                            preferred_element_type=f32) + b_e_ref[...])

    def sigmoid(x):
        # sigmoid(x) == 0.5 * tanh(0.5 * x) + 0.5 : one EUP push + cheap fma
        # instead of exp + divide on the serial dependency chain.
        return 0.5 * jnp.tanh(0.5 * x) + 0.5

    def gate_step(gates, c):
        # H_pad == 128 => every gate slice is exactly one 128-lane vreg block.
        i = sigmoid(gates[:, 0 * H_pad:1 * H_pad])
        f = sigmoid(gates[:, 1 * H_pad:2 * H_pad])
        g = jnp.tanh(gates[:, 2 * H_pad:3 * H_pad])
        o = sigmoid(gates[:, 3 * H_pad:4 * H_pad])
        c_new = f * c + i * g
        h_new = o * jnp.tanh(c_new)
        return h_new, c_new

    h0 = jnp.zeros((B_pad, H_pad), f32)
    c0 = jnp.zeros((B_pad, H_pad), f32)

    # --- Encoder recurrence: only the final (h, c) is needed. W_hh has K = H_k (=64)
    # rows; the padded lanes of h are exactly zero, so h[:, :H_k] is lossless.
    def enc_body(t, carry):
        h, c = carry
        row = pl.multiple_of(t * B_pad, B_pad)
        gates = (xpe_scr[pl.ds(row, B_pad), :]
                 + jnp.dot(h[:, :H_k], w_hh_e_ref[...],
                           preferred_element_type=f32))
        return gate_step(gates, c)

    h_enc, c_enc = lax.fori_loop(0, T_e, enc_body, (h0, c0), unroll=True)

    # --- Decoder operands must be resident now.
    cp_dec_x.wait()
    cp_w_ih_d.wait()
    cp_w_hh_d.wait()
    cp_b_d.wait()

    xpd_scr[...] = (jnp.dot(dec_x_vmem[...], w_ih_d_vmem[...],
                            preferred_element_type=f32) + b_d_vmem[...])

    # --- Decoder recurrence, seeded with encoder final state. Only the LSTM math stays
    # in the loop; h_t is stashed in VMEM scratch for a single post-loop Linear.
    def dec_body(t, carry):
        h, c = carry
        row = pl.multiple_of(t * B_pad, B_pad)
        gates = (xpd_scr[pl.ds(row, B_pad), :]
                 + jnp.dot(h[:, :H_k], w_hh_d_vmem[...],
                           preferred_element_type=f32))
        h_new, c_new = gate_step(gates, c)
        hdec_scr[pl.ds(row, B_pad), :] = h_new
        return h_new, c_new

    lax.fori_loop(0, T_d, dec_body, (h_enc, c_enc), unroll=True)

    # --- One batched Linear over all decoder timesteps; lane-dense (128-wide) store.
    out_ref[...] = (jnp.dot(hdec_scr[...], w_lin_ref[...],
                            preferred_element_type=f32) + b_lin_ref[...])


# ---------------------------------------------------------------------------
# Host-side parameter / input preparation (transpose + zero-pad to TPU-friendly shapes)
# ---------------------------------------------------------------------------
def _pad_gate_cols(w, H, H_pad):
    """(rows, 4H) -> (rows, 4*H_pad), zero-padding inside each of the 4 gate blocks."""
    rows = w.shape[0]
    w4 = w.reshape(rows, 4, H)
    w4 = jnp.pad(w4, ((0, 0), (0, 0), (0, H_pad - H)))
    return w4.reshape(rows, 4 * H_pad)


def _prepare_params(params, H, H_k, H_pad, D_in, D_out,
                    Din_pad, Ddec_pad, Dout_lane):
    # Encoder LSTM: W_ih (4H, D_in) -> (Din_pad, 4*H_pad); W_hh (4H, H) -> (H_k, 4*H_pad)
    w_ih_e = _pad_gate_cols(params["w_ih_e"].T, H, H_pad)
    w_ih_e = jnp.pad(w_ih_e, ((0, Din_pad - D_in), (0, 0)))
    w_hh_e = _pad_gate_cols(params["w_hh_e"].T, H, H_pad)
    w_hh_e = jnp.pad(w_hh_e, ((0, H_k - H), (0, 0)))
    b_e = _pad_gate_cols(params["b_e"], H, H_pad)

    # Decoder LSTM (input dim == output_size)
    w_ih_d = _pad_gate_cols(params["w_ih_d"].T, H, H_pad)
    w_ih_d = jnp.pad(w_ih_d, ((0, Ddec_pad - D_out), (0, 0)))
    w_hh_d = _pad_gate_cols(params["w_hh_d"].T, H, H_pad)
    w_hh_d = jnp.pad(w_hh_d, ((0, H_k - H), (0, 0)))
    b_d = _pad_gate_cols(params["b_d"], H, H_pad)

    # Linear: (D_out, H) -> (H_pad, Dout_lane). Output columns padded to 128 for a
    # lane-dense store; rows padded to H_pad because hdec_scr carries H_pad lanes.
    w_lin = jnp.pad(params["w_lin"].T, ((0, H_pad - H), (0, Dout_lane - D_out)))
    b_lin = jnp.pad(params["b_lin"], ((0, 0), (0, Dout_lane - D_out)))

    return (w_ih_e, w_hh_e, b_e, w_ih_d, w_hh_d, b_d, w_lin, b_lin)


def seq2seq_forward(enc_x, dec_x, params):
    T_e, B, D_in = enc_x.shape
    T_d, _, D_out = dec_x.shape
    H = params["w_hh_e"].shape[1]

    H_pad = max(128, _round_up(H, 128))      # gate slices vreg-aligned (lane axis)
    H_k = _round_up(H, 8)                    # recurrence matmul K (64, not 128)
    B_pad = max(8, _round_up(B, 8))          # full 8-sublane vregs
    Din_pad = _round_up(D_in, 8)             # K-dim pad only to sublane quantum
    Ddec_pad = _round_up(D_out, 8)
    Dout_lane = max(128, _round_up(D_out, 128))  # output stays lane-dense

    # Pad + flatten inputs to (T*B_pad, D_pad) on the host (no in-kernel reshapes).
    enc_x2d = jnp.pad(enc_x, ((0, 0), (0, B_pad - B), (0, Din_pad - D_in))
                      ).reshape(T_e * B_pad, Din_pad).astype(jnp.float32)
    dec_x2d = jnp.pad(dec_x, ((0, 0), (0, B_pad - B), (0, Ddec_pad - D_out))
                      ).reshape(T_d * B_pad, Ddec_pad).astype(jnp.float32)

    (w_ih_e, w_hh_e, b_e, w_ih_d, w_hh_d, b_d, w_lin, b_lin) = _prepare_params(
        params, H, H_k, H_pad, D_in, D_out, Din_pad, Ddec_pad, Dout_lane)

    args = (enc_x2d, dec_x2d, w_ih_e, w_hh_e, b_e, w_ih_d, w_hh_d, b_d, w_lin, b_lin)

    vmem = pl.BlockSpec(memory_space=pltpu.MemorySpace.VMEM)
    hbm = pl.BlockSpec(memory_space=pl.ANY)   # decoder-side operands: manual async DMA
    in_specs = [
        vmem,   # enc_x2d
        hbm,    # dec_x2d
        vmem,   # w_ih_e
        vmem,   # w_hh_e
        vmem,   # b_e
        hbm,    # w_ih_d
        hbm,    # w_hh_d
        hbm,    # b_d
        vmem,   # w_lin
        vmem,   # b_lin
    ]

    kernel = functools.partial(_seq2seq_kernel, T_e, T_d, B_pad, H_k, H_pad)

    # TODO(synk): if B scales past 8, add a leading grid axis over batch tiles with
    # dimension_semantics=("parallel",...) so the recurrence splits across the 2 TCs on
    # v7x; at B=2 everything fits one core. bf16 MXU operands would further cut the
    # per-step latency but break the 1e-5 reference tolerance, so kept f32 here.
    out2d = pl.pallas_call(
        kernel,
        out_shape=jax.ShapeDtypeStruct((T_d * B_pad, Dout_lane), jnp.float32),
        in_specs=in_specs,
        out_specs=vmem,
        scratch_shapes=[
            pltpu.VMEM((T_e * B_pad, 4 * H_pad), jnp.float32),   # encoder x-projections
            pltpu.VMEM((T_d * B_pad, 4 * H_pad), jnp.float32),   # decoder x-projections
            pltpu.VMEM((T_d * B_pad, H_pad), jnp.float32),       # decoder hidden states
            pltpu.VMEM((T_d * B_pad, Ddec_pad), jnp.float32),    # dec_x landing buffer
            pltpu.VMEM((Ddec_pad, 4 * H_pad), jnp.float32),      # w_ih_d landing buffer
            pltpu.VMEM((H_k, 4 * H_pad), jnp.float32),           # w_hh_d landing buffer
            pltpu.VMEM((1, 4 * H_pad), jnp.float32),             # b_d landing buffer
            pltpu.SemaphoreType.DMA((4,)),
        ],
    )(*args)

    return out2d.reshape(T_d, B_pad, Dout_lane)[:, :B, :D_out]


# ---------------------------------------------------------------------------
# Parameter init (PyTorch-style layout) and pure-JAX reference for validation
# ---------------------------------------------------------------------------
def init_params(key, input_size, hidden_size, output_size):
    """Deterministic params mimicking PyTorch default init (uniform(-1/sqrt(H), 1/sqrt(H)))."""
    H = hidden_size
    k = 1.0 / jnp.sqrt(jnp.float32(H))
    keys = jax.random.split(key, 12)
    u = lambda kk, shape, b: jax.random.uniform(kk, shape, jnp.float32, -b, b)

    w_ih_e = u(keys[0], (4 * H, input_size), k)
    w_hh_e = u(keys[1], (4 * H, H), k)
    b_e = (u(keys[2], (4 * H,), k) + u(keys[3], (4 * H,), k)).reshape(1, 4 * H)

    w_ih_d = u(keys[4], (4 * H, output_size), k)
    w_hh_d = u(keys[5], (4 * H, H), k)
    b_d = (u(keys[6], (4 * H,), k) + u(keys[7], (4 * H,), k)).reshape(1, 4 * H)

    w_lin = u(keys[8], (output_size, H), k)
    b_lin = u(keys[9], (output_size,), k).reshape(1, output_size)

    return dict(w_ih_e=w_ih_e, w_hh_e=w_hh_e, b_e=b_e,
                w_ih_d=w_ih_d, w_hh_d=w_hh_d, b_d=b_d,
                w_lin=w_lin, b_lin=b_lin)


def _reference_forward(enc_x, dec_x, p):
    """Pure-JAX reference with exact PyTorch LSTM semantics."""
    H = p["w_hh_e"].shape[1]

    def lstm(xs, w_ih, w_hh, b, h, c):
        def step(carry, x_t):
            h, c = carry
            gates = x_t @ w_ih.T + h @ w_hh.T + b[0]
            i = jax.nn.sigmoid(gates[:, 0 * H:1 * H])
            f = jax.nn.sigmoid(gates[:, 1 * H:2 * H])
            g = jnp.tanh(gates[:, 2 * H:3 * H])
            o = jax.nn.sigmoid(gates[:, 3 * H:4 * H])
            c = f * c + i * g
            h = o * jnp.tanh(c)
            return (h, c), h
        (h, c), hs = lax.scan(step, (h, c), xs)
        return hs, h, c

    B = enc_x.shape[1]
    h0 = jnp.zeros((B, H), jnp.float32)
    _, h_enc, c_enc = lstm(enc_x, p["w_ih_e"], p["w_hh_e"], p["b_e"], h0, h0)
    dec_hs, _, _ = lstm(dec_x, p["w_ih_d"], p["w_hh_d"], p["b_d"], h_enc, c_enc)
    return dec_hs @ p["w_lin"].T + p["b_lin"][0]


if __name__ == "__main__":
    input_size, hidden_size, output_size = 3, 64, 3
    T_enc, T_dec, B = 8, 8, 2

    key = jax.random.PRNGKey(0)
    k_enc, k_dec, k_par = jax.random.split(key, 3)
    encoder_input = jax.random.normal(k_enc, (T_enc, B, input_size), jnp.float32)
    decoder_input = jax.random.normal(k_dec, (T_dec, B, output_size), jnp.float32)
    params = init_params(k_par, input_size, hidden_size, output_size)

    out = seq2seq_forward(encoder_input, decoder_input, params)
    out = jax.block_until_ready(out)

    ref = _reference_forward(encoder_input, decoder_input, params)
    assert out.shape == (T_dec, B, output_size)
    assert jnp.allclose(out, ref, atol=1e-5, rtol=1e-5), "mismatch vs reference"

    print("KERNEL_OK")
</pallas_src>

<mosaic_0001>
module attributes {stable_mosaic.version = 11 : i64} {
  func.func @_seq2seq_kernel(%arg0: memref<64x8xf32, #tpu.memory_space<vmem>>, %arg1: memref<64x8xf32, #tpu.memory_space<any>>, %arg2: memref<8x512xf32, #tpu.memory_space<vmem>>, %arg3: memref<64x512xf32, #tpu.memory_space<vmem>>, %arg4: memref<1x512xf32, #tpu.memory_space<vmem>>, %arg5: memref<8x512xf32, #tpu.memory_space<any>>, %arg6: memref<64x512xf32, #tpu.memory_space<any>>, %arg7: memref<1x512xf32, #tpu.memory_space<any>>, %arg8: memref<128x128xf32, #tpu.memory_space<vmem>>, %arg9: memref<1x128xf32, #tpu.memory_space<vmem>>, %arg10: memref<64x128xf32, #tpu.memory_space<vmem>>, %arg11: memref<64x512xf32, #tpu.memory_space<vmem>>, %arg12: memref<64x512xf32, #tpu.memory_space<vmem>>, %arg13: memref<64x128xf32, #tpu.memory_space<vmem>>, %arg14: memref<64x8xf32, #tpu.memory_space<vmem>>, %arg15: memref<8x512xf32, #tpu.memory_space<vmem>>, %arg16: memref<64x512xf32, #tpu.memory_space<vmem>>, %arg17: memref<1x512xf32, #tpu.memory_space<vmem>>, %arg18: memref<4x!tpu.dma_semaphore, #tpu.memory_space<semaphore_mem>>) attributes {dimension_semantics = [], scalar_prefetch = 0 : i64, scratch_operands = 8 : i64, tpu.core_type = #tpu.core_type<tc>} {
    %c0_i32 = arith.constant 0 : i32
    %0 = tpu.memref_slice %arg18[%c0_i32] : memref<4x!tpu.dma_semaphore, #tpu.memory_space<semaphore_mem>> -> memref<1x!tpu.dma_semaphore, #tpu.memory_space<semaphore_mem>>
    %1 = tpu.memref_squeeze %0 : memref<1x!tpu.dma_semaphore, #tpu.memory_space<semaphore_mem>> -> memref<!tpu.dma_semaphore, #tpu.memory_space<semaphore_mem>>
    tpu.enqueue_dma source(%arg1 : memref<64x8xf32, #tpu.memory_space<any>>) target(%arg14 : memref<64x8xf32, #tpu.memory_space<vmem>>) target_semaphore(%1 : memref<!tpu.dma_semaphore, #tpu.memory_space<semaphore_mem>>)
    %c1_i32 = arith.constant 1 : i32
    %2 = tpu.memref_slice %arg18[%c1_i32] : memref<4x!tpu.dma_semaphore, #tpu.memory_space<semaphore_mem>> -> memref<1x!tpu.dma_semaphore, #tpu.memory_space<semaphore_mem>>
    %3 = tpu.memref_squeeze %2 : memref<1x!tpu.dma_semaphore, #tpu.memory_space<semaphore_mem>> -> memref<!tpu.dma_semaphore, #tpu.memory_space<semaphore_mem>>
    tpu.enqueue_dma source(%arg5 : memref<8x512xf32, #tpu.memory_space<any>>) target(%arg15 : memref<8x512xf32, #tpu.memory_space<vmem>>) target_semaphore(%3 : memref<!tpu.dma_semaphore, #tpu.memory_space<semaphore_mem>>)
    %c2_i32 = arith.constant 2 : i32
    %4 = tpu.memref_slice %arg18[%c2_i32] : memref<4x!tpu.dma_semaphore, #tpu.memory_space<semaphore_mem>> -> memref<1x!tpu.dma_semaphore, #tpu.memory_space<semaphore_mem>>
    %5 = tpu.memref_squeeze %4 : memref<1x!tpu.dma_semaphore, #tpu.memory_space<semaphore_mem>> -> memref<!tpu.dma_semaphore, #tpu.memory_space<semaphore_mem>>
    tpu.enqueue_dma source(%arg6 : memref<64x512xf32, #tpu.memory_space<any>>) target(%arg16 : memref<64x512xf32, #tpu.memory_space<vmem>>) target_semaphore(%5 : memref<!tpu.dma_semaphore, #tpu.memory_space<semaphore_mem>>)
    %c3_i32 = arith.constant 3 : i32
    %6 = tpu.memref_slice %arg18[%c3_i32] : memref<4x!tpu.dma_semaphore, #tpu.memory_space<semaphore_mem>> -> memref<1x!tpu.dma_semaphore, #tpu.memory_space<semaphore_mem>>
    %7 = tpu.memref_squeeze %6 : memref<1x!tpu.dma_semaphore, #tpu.memory_space<semaphore_mem>> -> memref<!tpu.dma_semaphore, #tpu.memory_space<semaphore_mem>>
    tpu.enqueue_dma source(%arg7 : memref<1x512xf32, #tpu.memory_space<any>>) target(%arg17 : memref<1x512xf32, #tpu.memory_space<vmem>>) target_semaphore(%7 : memref<!tpu.dma_semaphore, #tpu.memory_space<semaphore_mem>>)
    %c0 = arith.constant 0 : index
    %c0_0 = arith.constant 0 : index
    %8 = vector.load %arg0[%c0, %c0_0] : memref<64x8xf32, #tpu.memory_space<vmem>>, vector<64x8xf32>
    %c0_1 = arith.constant 0 : index
    %c0_2 = arith.constant 0 : index
    %9 = vector.load %arg2[%c0_1, %c0_2] : memref<8x512xf32, #tpu.memory_space<vmem>>, vector<8x512xf32>
    %cst = arith.constant dense<0.000000e+00> : vector<64x512xf32>
    %10 = tpu.matmul %8, %9, %cst {dimension_numbers = #tpu.dot_dimension_numbers<[1], [0], [0], [1], [0, 0, 1, 1], [], []>} : vector<64x8xf32>, vector<8x512xf32>, vector<64x512xf32> -> vector<64x512xf32>
    %c0_3 = arith.constant 0 : index
    %c0_4 = arith.constant 0 : index
    %11 = vector.load %arg4[%c0_3, %c0_4] : memref<1x512xf32, #tpu.memory_space<vmem>>, vector<1x512xf32>
    %12 = vector.broadcast %11 : vector<1x512xf32> to vector<64x512xf32>
    %13 = arith.addf %10, %12 : vector<64x512xf32>
    %c0_5 = arith.constant 0 : index
    %c0_6 = arith.constant 0 : index
    %14 = vector.load %arg11[%c0_5, %c0_6] : memref<64x512xf32, #tpu.memory_space<vmem>>, vector<64x512xf32>
    tpu.vector_store %arg11[%c0_5, %c0_6], %13 {strides = array<i32>} : memref<64x512xf32, #tpu.memory_space<vmem>>, vector<64x512xf32>,
    %cst_7 = arith.constant 0.000000e+00 : f32
    %15 = vector.broadcast %cst_7 : f32 to vector<8x128xf32>
    %cst_8 = arith.constant 0.000000e+00 : f32
    %16 = vector.broadcast %cst_8 : f32 to vector<8x128xf32>
    %c0_i32_9 = arith.constant 0 : i32
    %c8_i32 = arith.constant 8 : i32
    %17 = arith.muli %c0_i32_9, %c8_i32 : i32
    %18 = tpu.assume_multiple %17, 8 : i32
    %19 = arith.index_cast %18 : i32 to index
    %c0_10 = arith.constant 0 : index
    %20 = vector.load %arg11[%19, %c0_10] : memref<64x512xf32, #tpu.memory_space<vmem>>, vector<8x512xf32>
    %21 = vector.extract_strided_slice %15 {offsets = [0, 0], sizes = [8, 64], strides = [1, 1]} : vector<8x128xf32> to vector<8x64xf32>
    %c0_11 = arith.constant 0 : index
    %c0_12 = arith.constant 0 : index
    %22 = vector.load %arg3[%c0_11, %c0_12] : memref<64x512xf32, #tpu.memory_space<vmem>>, vector<64x512xf32>
    %cst_13 = arith.constant dense<0.000000e+00> : vector<8x512xf32>
    %23 = tpu.matmul %21, %22, %cst_13 {dimension_numbers = #tpu.dot_dimension_numbers<[1], [0], [0], [1], [0, 0, 1, 1], [], []>} : vector<8x64xf32>, vector<64x512xf32>, vector<8x512xf32> -> vector<8x512xf32>
    %24 = arith.addf %20, %23 : vector<8x512xf32>
    %25 = vector.extract_strided_slice %24 {offsets = [0, 0], sizes = [8, 128], strides = [1, 1]} : vector<8x512xf32> to vector<8x128xf32>
    %cst_14 = arith.constant 5.000000e-01 : f32
    %26 = vector.broadcast %cst_14 : f32 to vector<8x128xf32>
    %27 = arith.mulf %26, %25 : vector<8x128xf32>
    %28 = math.tanh %27 : vector<8x128xf32>
    %cst_15 = arith.constant 5.000000e-01 : f32
    %29 = vector.broadcast %cst_15 : f32 to vector<8x128xf32>
    %30 = arith.mulf %29, %28 : vector<8x128xf32>
    %cst_16 = arith.constant 5.000000e-01 : f32
    %31 = vector.broadcast %cst_16 : f32 to vector<8x128xf32>
    %32 = arith.addf %30, %31 : vector<8x128xf32>
    %33 = vector.extract_strided_slice %24 {offsets = [0, 128], sizes = [8, 128], strides = [1, 1]} : vector<8x512xf32> to vector<8x128xf32>
    %cst_17 = arith.constant 5.000000e-01 : f32
    %34 = vector.broadcast %cst_17 : f32 to vector<8x128xf32>
    %35 = arith.mulf %34, %33 : vector<8x128xf32>
    %36 = math.tanh %35 : vector<8x128xf32>
    %cst_18 = arith.constant 5.000000e-01 : f32
    %37 = vector.broadcast %cst_18 : f32 to vector<8x128xf32>
    %38 = arith.mulf %37, %36 : vector<8x128xf32>
    %cst_19 = arith.constant 5.000000e-01 : f32
    %39 = vector.broadcast %cst_19 : f32 to vector<8x128xf32>
    %40 = arith.addf %38, %39 : vector<8x128xf32>
    %41 = vector.extract_strided_slice %24 {offsets = [0, 256], sizes = [8, 128], strides = [1, 1]} : vector<8x512xf32> to vector<8x128xf32>
    %42 = math.tanh %41 : vector<8x128xf32>
    %43 = vector.extract_strided_slice %24 {offsets = [0, 384], sizes = [8, 128], strides = [1, 1]} : vector<8x512xf32> to vector<8x128xf32>
    %cst_20 = arith.constant 5.000000e-01 : f32
    %44 = vector.broadcast %cst_20 : f32 to vector<8x128xf32>
    %45 = arith.mulf %44, %43 : vector<8x128xf32>
    %46 = math.tanh %45 : vector<8x128xf32>
    %cst_21 = arith.constant 5.000000e-01 : f32
    %47 = vector.broadcast %cst_21 : f32 to vector<8x128xf32>
    %48 = arith.mulf %47, %46 : vector<8x128xf32>
    %cst_22 = arith.constant 5.000000e-01 : f32
    %49 = vector.broadcast %cst_22 : f32 to vector<8x128xf32>
    %50 = arith.addf %48, %49 : vector<8x128xf32>
    %51 = arith.mulf %40, %16 : vector<8x128xf32>
    %52 = arith.mulf %32, %42 : vector<8x128xf32>
    %53 = arith.addf %51, %52 : vector<8x128xf32>
    %54 = math.tanh %53 : vector<8x128xf32>
    %55 = arith.mulf %50, %54 : vector<8x128xf32>
    %c1_i32_23 = arith.constant 1 : i32
    %c8_i32_24 = arith.constant 8 : i32
    %56 = arith.muli %c1_i32_23, %c8_i32_24 : i32
    %57 = tpu.assume_multiple %56, 8 : i32
    %58 = arith.index_cast %57 : i32 to index
    %c0_25 = arith.constant 0 : index
    %59 = vector.load %arg11[%58, %c0_25] : memref<64x512xf32, #tpu.memory_space<vmem>>, vector<8x512xf32>
    %60 = vector.extract_strided_slice %55 {offsets = [0, 0], sizes = [8, 64], strides = [1, 1]} : vector<8x128xf32> to vector<8x64xf32>
    %c0_26 = arith.constant 0 : index
    %c0_27 = arith.constant 0 : index
    %61 = vector.load %arg3[%c0_26, %c0_27] : memref<64x512xf32, #tpu.memory_space<vmem>>, vector<64x512xf32>
    %cst_28 = arith.constant dense<0.000000e+00> : vector<8x512xf32>
    %62 = tpu.matmul %60, %61, %cst_28 {dimension_numbers = #tpu.dot_dimension_numbers<[1], [0], [0], [1], [0, 0, 1, 1], [], []>} : vector<8x64xf32>, vector<64x512xf32>, vector<8x512xf32> -> vector<8x512xf32>
    %63 = arith.addf %59, %62 : vector<8x512xf32>
    %64 = vector.extract_strided_slice %63 {offsets = [0, 0], sizes = [8, 128], strides = [1, 1]} : vector<8x512xf32> to vector<8x128xf32>
    %cst_29 = arith.constant 5.000000e-01 : f32
    %65 = vector.broadcast %cst_29 : f32 to vector<8x128xf32>
    %66 = arith.mulf %65, %64 : vector<8x128xf32>
    %67 = math.tanh %66 : vector<8x128xf32>
    %cst_30 = arith.constant 5.000000e-01 : f32
    %68 = vector.broadcast %cst_30 : f32 to vector<8x128xf32>
    %69 = arith.mulf %68, %67 : vector<8x128xf32>
    %cst_31 = arith.constant 5.000000e-01 : f32
    %70 = vector.broadcast %cst_31 : f32 to vector<8x128xf32>
    %71 = arith.addf %69, %70 : vector<8x128xf32>
    %72 = vector.extract_strided_slice %63 {offsets = [0, 128], sizes = [8, 128], strides = [1, 1]} : vector<8x512xf32> to vector<8x128xf32>
    %cst_32 = arith.constant 5.000000e-01 : f32
    %73 = vector.broadcast %cst_32 : f32 to vector<8x128xf32>
    %74 = arith.mulf %73, %72 : vector<8x128xf32>
    %75 = math.tanh %74 : vector<8x128xf32>
    %cst_33 = arith.constant 5.000000e-01 : f32
    %76 = vector.broadcast %cst_33 : f32 to vector<8x128xf32>
    %77 = arith.mulf %76, %75 : vector<8x128xf32>
    %cst_34 = arith.constant 5.000000e-01 : f32
    %78 = vector.broadcast %cst_34 : f32 to vector<8x128xf32>
    %79 = arith.addf %77, %78 : vector<8x128xf32>
    %80 = vector.extract_strided_slice %63 {offsets = [0, 256], sizes = [8, 128], strides = [1, 1]} : vector<8x512xf32> to vector<8x128xf32>
    %81 = math.tanh %80 : vector<8x128xf32>
    %82 = vector.extract_strided_slice %63 {offsets = [0, 384], sizes = [8, 128], strides = [1, 1]} : vector<8x512xf32> to vector<8x128xf32>
    %cst_35 = arith.constant 5.000000e-01 : f32
    %83 = vector.broadcast %cst_35 : f32 to vector<8x128xf32>
    %84 = arith.mulf %83, %82 : vector<8x128xf32>
    %85 = math.tanh %84 : vector<8x128xf32>
    %cst_36 = arith.constant 5.000000e-01 : f32
    %86 = vector.broadcast %cst_36 : f32 to vector<8x128xf32>
    %87 = arith.mulf %86, %85 : vector<8x128xf32>
    %cst_37 = arith.constant 5.000000e-01 : f32
    %88 = vector.broadcast %cst_37 : f32 to vector<8x128xf32>
    %89 = arith.addf %87, %88 : vector<8x128xf32>
    %90 = arith.mulf %79, %53 : vector<8x128xf32>
    %91 = arith.mulf %71, %81 : vector<8x128xf32>
    %92 = arith.addf %90, %91 : vector<8x128xf32>
    %93 = math.tanh %92 : vector<8x128xf32>
    %94 = arith.mulf %89, %93 : vector<8x128xf32>
    %c2_i32_38 = arith.constant 2 : i32
    %c8_i32_39 = arith.constant 8 : i32
    %95 = arith.muli %c2_i32_38, %c8_i32_39 : i32
    %96 = tpu.assume_multiple %95, 8 : i32
    %97 = arith.index_cast %96 : i32 to index
    %c0_40 = arith.constant 0 : index
    %98 = vector.load %arg11[%97, %c0_40] : memref<64x512xf32, #tpu.memory_space<vmem>>, vector<8x512xf32>
    %99 = vector.extract_strided_slice %94 {offsets = [0, 0], sizes = [8, 64], strides = [1, 1]} : vector<8x128xf32> to vector<8x64xf32>
    %c0_41 = arith.constant 0 : index
    %c0_42 = arith.constant 0 : index
    %100 = vector.load %arg3[%c0_41, %c0_42] : memref<64x512xf32, #tpu.memory_space<vmem>>, vector<64x512xf32>
    %cst_43 = arith.constant dense<0.000000e+00> : vector<8x512xf32>
    %101 = tpu.matmul %99, %100, %cst_43 {dimension_numbers = #tpu.dot_dimension_numbers<[1], [0], [0], [1], [0, 0, 1, 1], [], []>} : vector<8x64xf32>, vector<64x512xf32>, vector<8x512xf32> -> vector<8x512xf32>
    %102 = arith.addf %98, %101 : vector<8x512xf32>
    %103 = vector.extract_strided_slice %102 {offsets = [0, 0], sizes = [8, 128], strides = [1, 1]} : vector<8x512xf32> to vector<8x128xf32>
    %cst_44 = arith.constant 5.000000e-01 : f32
    %104 = vector.broadcast %cst_44 : f32 to vector<8x128xf32>
    %105 = arith.mulf %104, %103 : vector<8x128xf32>
    %106 = math.tanh %105 : vector<8x128xf32>
    %cst_45 = arith.constant 5.000000e-01 : f32
    %107 = vector.broadcast %cst_45 : f32 to vector<8x128xf32>
    %108 = arith.mulf %107, %106 : vector<8x128xf32>
    %cst_46 = arith.constant 5.000000e-01 : f32
    %109 = vector.broadcast %cst_46 : f32 to vector<8x128xf32>
    %110 = arith.addf %108, %109 : vector<8x128xf32>
    %111 = vector.extract_strided_slice %102 {offsets = [0, 128], sizes = [8, 128], strides = [1, 1]} : vector<8x512xf32> to vector<8x128xf32>
    %cst_47 = arith.constant 5.000000e-01 : f32
    %112 = vector.broadcast %cst_47 : f32 to vector<8x128xf32>
    %113 = arith.mulf %112, %111 : vector<8x128xf32>
    %114 = math.tanh %113 : vector<8x128xf32>
    %cst_48 = arith.constant 5.000000e-01 : f32
    %115 = vector.broadcast %cst_48 : f32 to vector<8x128xf32>
    %116 = arith.mulf %115, %114 : vector<8x128xf32>
    %cst_49 = arith.constant 5.000000e-01 : f32
    %117 = vector.broadcast %cst_49 : f32 to vector<8x128xf32>
    %118 = arith.addf %116, %117 : vector<8x128xf32>
    %119 = vector.extract_strided_slice %102 {offsets = [0, 256], sizes = [8, 128], strides = [1, 1]} : vector<8x512xf32> to vector<8x128xf32>
    %120 = math.tanh %119 : vector<8x128xf32>
    %121 = vector.extract_strided_slice %102 {offsets = [0, 384], sizes = [8, 128], strides = [1, 1]} : vector<8x512xf32> to vector<8x128xf32>
    %cst_50 = arith.constant 5.000000e-01 : f32
    %122 = vector.broadcast %cst_50 : f32 to vector<8x128xf32>
    %123 = arith.mulf %122, %121 : vector<8x128xf32>
    %124 = math.tanh %123 : vector<8x128xf32>
    %cst_51 = arith.constant 5.000000e-01 : f32
    %125 = vector.broadcast %cst_51 : f32 to vector<8x128xf32>
    %126 = arith.mulf %125, %124 : vector<8x128xf32>
    %cst_52 = arith.constant 5.000000e-01 : f32
    %127 = vector.broadcast %cst_52 : f32 to vector<8x128xf32>
    %128 = arith.addf %126, %127 : vector<8x128xf32>
    %129 = arith.mulf %118, %92 : vector<8x128xf32>
    %130 = arith.mulf %110, %120 : vector<8x128xf32>
    %131 = arith.addf %129, %130 : vector<8x128xf32>
    %132 = math.tanh %131 : vector<8x128xf32>
    %133 = arith.mulf %128, %132 : vector<8x128xf32>
    %c3_i32_53 = arith.constant 3 : i32
    %c8_i32_54 = arith.constant 8 : i32
    %134 = arith.muli %c3_i32_53, %c8_i32_54 : i32
    %135 = tpu.assume_multiple %134, 8 : i32
    %136 = arith.index_cast %135 : i32 to index
    %c0_55 = arith.constant 0 : index
    %137 = vector.load %arg11[%136, %c0_55] : memref<64x512xf32, #tpu.memory_space<vmem>>, vector<8x512xf32>
    %138 = vector.extract_strided_slice %133 {offsets = [0, 0], sizes = [8, 64], strides = [1, 1]} : vector<8x128xf32> to vector<8x64xf32>
    %c0_56 = arith.constant 0 : index
    %c0_57 = arith.constant 0 : index
    %139 = vector.load %arg3[%c0_56, %c0_57] : memref<64x512xf32, #tpu.memory_space<vmem>>, vector<64x512xf32>
    %cst_58 = arith.constant dense<0.000000e+00> : vector<8x512xf32>
    %140 = tpu.matmul %138, %139, %cst_58 {dimension_numbers = #tpu.dot_dimension_numbers<[1], [0], [0], [1], [0, 0, 1, 1], [], []>} : vector<8x64xf32>, vector<64x512xf32>, vector<8x512xf32> -> vector<8x512xf32>
    %141 = arith.addf %137, %140 : vector<8x512xf32>
    %142 = vector.extract_strided_slice %141 {offsets = [0, 0], sizes = [8, 128], strides = [1, 1]} : vector<8x512xf32> to vector<8x128xf32>
    %cst_59 = arith.constant 5.000000e-01 : f32
    %143 = vector.broadcast %cst_59 : f32 to vector<8x128xf32>
    %144 = arith.mulf %143, %142 : vector<8x128xf32>
    %145 = math.tanh %144 : vector<8x128xf32>
    %cst_60 = arith.constant 5.000000e-01 : f32
    %146 = vector.broadcast %cst_60 : f32 to vector<8x128xf32>
    %147 = arith.mulf %146, %145 : vector<8x128xf32>
    %cst_61 = arith.constant 5.000000e-01 : f32
    %148 = vector.broadcast %cst_61 : f32 to vector<8x128xf32>
    %149 = arith.addf %147, %148 : vector<8x128xf32>
    %150 = vector.extract_strided_slice %141 {offsets = [0, 128], sizes = [8, 128], strides = [1, 1]} : vector<8x512xf32> to vector<8x128xf32>
    %cst_62 = arith.constant 5.000000e-01 : f32
    %151 = vector.broadcast %cst_62 : f32 to vector<8x128xf32>
    %152 = arith.mulf %151, %150 : vector<8x128xf32>
    %153 = math.tanh %152 : vector<8x128xf32>
    %cst_63 = arith.constant 5.000000e-01 : f32
    %154 = vector.broadcast %cst_63 : f32 to vector<8x128xf32>
    %155 = arith.mulf %154, %153 : vector<8x128xf32>
    %cst_64 = arith.constant 5.000000e-01 : f32
    %156 = vector.broadcast %cst_64 : f32 to vector<8x128xf32>
    %157 = arith.addf %155, %156 : vector<8x128xf32>
    %158 = vector.extract_strided_slice %141 {offsets = [0, 256], sizes = [8, 128], strides = [1, 1]} : vector<8x512xf32> to vector<8x128xf32>
    %159 = math.tanh %158 : vector<8x128xf32>
    %160 = vector.extract_strided_slice %141 {offsets = [0, 384], sizes = [8, 128], strides = [1, 1]} : vector<8x512xf32> to vector<8x128xf32>
    %cst_65 = arith.constant 5.000000e-01 : f32
    %161 = vector.broadcast %cst_65 : f32 to vector<8x128xf32>
    %162 = arith.mulf %161, %160 : vector<8x128xf32>
    %163 = math.tanh %162 : vector<8x128xf32>
    %cst_66 = arith.constant 5.000000e-01 : f32
    %164 = vector.broadcast %cst_66 : f32 to vector<8x128xf32>
    %165 = arith.mulf %164, %163 : vector<8x128xf32>
    %cst_67 = arith.constant 5.000000e-01 : f32
    %166 = vector.broadcast %cst_67 : f32 to vector<8x128xf32>
    %167 = arith.addf %165, %166 : vector<8x128xf32>
    %168 = arith.mulf %157, %131 : vector<8x128xf32>
    %169 = arith.mulf %149, %159 : vector<8x128xf32>
    %170 = arith.addf %168, %169 : vector<8x128xf32>
    %171 = math.tanh %170 : vector<8x128xf32>
    %172 = arith.mulf %167, %171 : vector<8x128xf32>
    %c4_i32 = arith.constant 4 : i32
    %c8_i32_68 = arith.constant 8 : i32
    %173 = arith.muli %c4_i32, %c8_i32_68 : i32
    %174 = tpu.assume_multiple %173, 8 : i32
    %175 = arith.index_cast %174 : i32 to index
    %c0_69 = arith.constant 0 : index
    %176 = vector.load %arg11[%175, %c0_69] : memref<64x512xf32, #tpu.memory_space<vmem>>, vector<8x512xf32>
    %177 = vector.extract_strided_slice %172 {offsets = [0, 0], sizes = [8, 64], strides = [1, 1]} : vector<8x128xf32> to vector<8x64xf32>
    %c0_70 = arith.constant 0 : index
    %c0_71 = arith.constant 0 : index
    %178 = vector.load %arg3[%c0_70, %c0_71] : memref<64x512xf32, #tpu.memory_space<vmem>>, vector<64x512xf32>
    %cst_72 = arith.constant dense<0.000000e+00> : vector<8x512xf32>
    %179 = tpu.matmul %177, %178, %cst_72 {dimension_numbers = #tpu.dot_dimension_numbers<[1], [0], [0], [1], [0, 0, 1, 1], [], []>} : vector<8x64xf32>, vector<64x512xf32>, vector<8x512xf32> -> vector<8x512xf32>
    %180 = arith.addf %176, %179 : vector<8x512xf32>
    %181 = vector.extract_strided_slice %180 {offsets = [0, 0], sizes = [8, 128], strides = [1, 1]} : vector<8x512xf32> to vector<8x128xf32>
    %cst_73 = arith.constant 5.000000e-01 : f32
    %182 = vector.broadcast %cst_73 : f32 to vector<8x128xf32>
    %183 = arith.mulf %182, %181 : vector<8x128xf32>
    %184 = math.tanh %183 : vector<8x128xf32>
    %cst_74 = arith.constant 5.000000e-01 : f32
    %185 = vector.broadcast %cst_74 : f32 to vector<8x128xf32>
    %186 = arith.mulf %185, %184 : vector<8x128xf32>
    %cst_75 = arith.constant 5.000000e-01 : f32
    %187 = vector.broadcast %cst_75 : f32 to vector<8x128xf32>
    %188 = arith.addf %186, %187 : vector<8x128xf32>
    %189 = vector.extract_strided_slice %180 {offsets = [0, 128], sizes = [8, 128], strides = [1, 1]} : vector<8x512xf32> to vector<8x128xf32>
    %cst_76 = arith.constant 5.000000e-01 : f32
    %190 = vector.broadcast %cst_76 : f32 to vector<8x128xf32>
    %191 = arith.mulf %190, %189 : vector<8x128xf32>
    %192 = math.tanh %191 : vector<8x128xf32>
    %cst_77 = arith.constant 5.000000e-01 : f32
    %193 = vector.broadcast %cst_77 : f32 to vector<8x128xf32>
    %194 = arith.mulf %193, %192 : vector<8x128xf32>
    %cst_78 = arith.constant 5.000000e-01 : f32
    %195 = vector.broadcast %cst_78 : f32 to vector<8x128xf32>
    %196 = arith.addf %194, %195 : vector<8x128xf32>
    %197 = vector.extract_strided_slice %180 {offsets = [0, 256], sizes = [8, 128], strides = [1, 1]} : vector<8x512xf32> to vector<8x128xf32>
    %198 = math.tanh %197 : vector<8x128xf32>
    %199 = vector.extract_strided_slice %180 {offsets = [0, 384], sizes = [8, 128], strides = [1, 1]} : vector<8x512xf32> to vector<8x128xf32>
    %cst_79 = arith.constant 5.000000e-01 : f32
    %200 = vector.broadcast %cst_79 : f32 to vector<8x128xf32>
    %201 = arith.mulf %200, %199 : vector<8x128xf32>
    %202 = math.tanh %201 : vector<8x128xf32>
    %cst_80 = arith.constant 5.000000e-01 : f32
    %203 = vector.broadcast %cst_80 : f32 to vector<8x128xf32>
    %204 = arith.mulf %203, %202 : vector<8x128xf32>
    %cst_81 = arith.constant 5.000000e-01 : f32
    %205 = vector.broadcast %cst_81 : f32 to vector<8x128xf32>
    %206 = arith.addf %204, %205 : vector<8x128xf32>
    %207 = arith.mulf %196, %170 : vector<8x128xf32>
    %208 = arith.mulf %188, %198 : vector<8x128xf32>
    %209 = arith.addf %207, %208 : vector<8x128xf32>
    %210 = math.tanh %209 : vector<8x128xf32>
    %211 = arith.mulf %206, %210 : vector<8x128xf32>
    %c5_i32 = arith.constant 5 : i32
    %c8_i32_82 = arith.constant 8 : i32
    %212 = arith.muli %c5_i32, %c8_i32_82 : i32
    %213 = tpu.assume_multiple %212, 8 : i32
    %214 = arith.index_cast %213 : i32 to index
    %c0_83 = arith.constant 0 : index
    %215 = vector.load %arg11[%214, %c0_83] : memref<64x512xf32, #tpu.memory_space<vmem>>, vector<8x512xf32>
    %216 = vector.extract_strided_slice %211 {offsets = [0, 0], sizes = [8, 64], strides = [1, 1]} : vector<8x128xf32> to vector<8x64xf32>
    %c0_84 = arith.constant 0 : index
    %c0_85 = arith.constant 0 : index
    %217 = vector.load %arg3[%c0_84, %c0_85] : memref<64x512xf32, #tpu.memory_space<vmem>>, vector<64x512xf32>
    %cst_86 = arith.constant dense<0.000000e+00> : vector<8x512xf32>
    %218 = tpu.matmul %216, %217, %cst_86 {dimension_numbers = #tpu.dot_dimension_numbers<[1], [0], [0], [1], [0, 0, 1, 1], [], []>} : vector<8x64xf32>, vector<64x512xf32>, vector<8x512xf32> -> vector<8x512xf32>
    %219 = arith.addf %215, %218 : vector<8x512xf32>
    %220 = vector.extract_strided_slice %219 {offsets = [0, 0], sizes = [8, 128], strides = [1, 1]} : vector<8x512xf32> to vector<8x128xf32>
    %cst_87 = arith.constant 5.000000e-01 : f32
    %221 = vector.broadcast %cst_87 : f32 to vector<8x128xf32>
    %222 = arith.mulf %221, %220 : vector<8x128xf32>
    %223 = math.tanh %222 : vector<8x128xf32>
    %cst_88 = arith.constant 5.000000e-01 : f32
    %224 = vector.broadcast %cst_88 : f32 to vector<8x128xf32>
    %225 = arith.mulf %224, %223 : vector<8x128xf32>
    %cst_89 = arith.constant 5.000000e-01 : f32
    %226 = vector.broadcast %cst_89 : f32 to vector<8x128xf32>
    %227 = arith.addf %225, %226 : vector<8x128xf32>
    %228 = vector.extract_strided_slice %219 {offsets = [0, 128], sizes = [8, 128], strides = [1, 1]} : vector<8x512xf32> to vector<8x128xf32>
    %cst_90 = arith.constant 5.000000e-01 : f32
    %229 = vector.broadcast %cst_90 : f32 to vector<8x128xf32>
    %230 = arith.mulf %229, %228 : vector<8x128xf32>
    %231 = math.tanh %230 : vector<8x128xf32>
    %cst_91 = arith.constant 5.000000e-01 : f32
    %232 = vector.broadcast %cst_91 : f32 to vector<8x128xf32>
    %233 = arith.mulf %232, %231 : vector<8x128xf32>
    %cst_92 = arith.constant 5.000000e-01 : f32
    %234 = vector.broadcast %cst_92 : f32 to vector<8x128xf32>
    %235 = arith.addf %233, %234 : vector<8x128xf32>
    %236 = vector.extract_strided_slice %219 {offsets = [0, 256], sizes = [8, 128], strides = [1, 1]} : vector<8x512xf32> to vector<8x128xf32>
    %237 = math.tanh %236 : vector<8x128xf32>
    %238 = vector.extract_strided_slice %219 {offsets = [0, 384], sizes = [8, 128], strides = [1, 1]} : vector<8x512xf32> to vector<8x128xf32>
    %cst_93 = arith.constant 5.000000e-01 : f32
    %239 = vector.broadcast %cst_93 : f32 to vector<8x128xf32>
    %240 = arith.mulf %239, %238 : vector<8x128xf32>
    %241 = math.tanh %240 : vector<8x128xf32>
    %cst_94 = arith.constant 5.000000e-01 : f32
    %242 = vector.broadcast %cst_94 : f32 to vector<8x128xf32>
    %243 = arith.mulf %242, %241 : vector<8x128xf32>
    %cst_95 = arith.constant 5.000000e-01 : f32
    %244 = vector.broadcast %cst_95 : f32 to vector<8x128xf32>
    %245 = arith.addf %243, %244 : vector<8x128xf32>
    %246 = arith.mulf %235, %209 : vector<8x128xf32>
    %247 = arith.mulf %227, %237 : vector<8x128xf32>
    %248 = arith.addf %246, %247 : vector<8x128xf32>
    %249 = math.tanh %248 : vector<8x128xf32>
    %250 = arith.mulf %245, %249 : vector<8x128xf32>
    %c6_i32 = arith.constant 6 : i32
    %c8_i32_96 = arith.constant 8 : i32
    %251 = arith.muli %c6_i32, %c8_i32_96 : i32
    %252 = tpu.assume_multiple %251, 8 : i32
    %253 = arith.index_cast %252 : i32 to index
    %c0_97 = arith.constant 0 : index
    %254 = vector.load %arg11[%253, %c0_97] : memref<64x512xf32, #tpu.memory_space<vmem>>, vector<8x512xf32>
    %255 = vector.extract_strided_slice %250 {offsets = [0, 0], sizes = [8, 64], strides = [1, 1]} : vector<8x128xf32> to vector<8x64xf32>
    %c0_98 = arith.constant 0 : index
    %c0_99 = arith.constant 0 : index
    %256 = vector.load %arg3[%c0_98, %c0_99] : memref<64x512xf32, #tpu.memory_space<vmem>>, vector<64x512xf32>
    %cst_100 = arith.constant dense<0.000000e+00> : vector<8x512xf32>
    %257 = tpu.matmul %255, %256, %cst_100 {dimension_numbers = #tpu.dot_dimension_numbers<[1], [0], [0], [1], [0, 0, 1, 1], [], []>} : vector<8x64xf32>, vector<64x512xf32>, vector<8x512xf32> -> vector<8x512xf32>
    %258 = arith.addf %254, %257 : vector<8x512xf32>
    %259 = vector.extract_strided_slice %258 {offsets = [0, 0], sizes = [8, 128], strides = [1, 1]} : vector<8x512xf32> to vector<8x128xf32>
    %cst_101 = arith.constant 5.000000e-01 : f32
    %260 = vector.broadcast %cst_101 : f32 to vector<8x128xf32>
    %261 = arith.mulf %260, %259 : vector<8x128xf32>
    %262 = math.tanh %261 : vector<8x128xf32>
    %cst_102 = arith.constant 5.000000e-01 : f32
    %263 = vector.broadcast %cst_102 : f32 to vector<8x128xf32>
    %264 = arith.mulf %263, %262 : vector<8x128xf32>
    %cst_103 = arith.constant 5.000000e-01 : f32
    %265 = vector.broadcast %cst_103 : f32 to vector<8x128xf32>
    %266 = arith.addf %264, %265 : vector<8x128xf32>
    %267 = vector.extract_strided_slice %258 {offsets = [0, 128], sizes = [8, 128], strides = [1, 1]} : vector<8x512xf32> to vector<8x128xf32>
    %cst_104 = arith.constant 5.000000e-01 : f32
    %268 = vector.broadcast %cst_104 : f32 to vector<8x128xf32>
    %269 = arith.mulf %268, %267 : vector<8x128xf32>
    %270 = math.tanh %269 : vector<8x128xf32>
    %cst_105 = arith.constant 5.000000e-01 : f32
    %271 = vector.broadcast %cst_105 : f32 to vector<8x128xf32>
    %272 = arith.mulf %271, %270 : vector<8x128xf32>
    %cst_106 = arith.constant 5.000000e-01 : f32
    %273 = vector.broadcast %cst_106 : f32 to vector<8x128xf32>
    %274 = arith.addf %272, %273 : vector<8x128xf32>
    %275 = vector.extract_strided_slice %258 {offsets = [0, 256], sizes = [8, 128], strides = [1, 1]} : vector<8x512xf32> to vector<8x128xf32>
    %276 = math.tanh %275 : vector<8x128xf32>
    %277 = vector.extract_strided_slice %258 {offsets = [0, 384], sizes = [8, 128], strides = [1, 1]} : vector<8x512xf32> to vector<8x128xf32>
    %cst_107 = arith.constant 5.000000e-01 : f32
    %278 = vector.broadcast %cst_107 : f32 to vector<8x128xf32>
    %279 = arith.mulf %278, %277 : vector<8x128xf32>
    %280 = math.tanh %279 : vector<8x128xf32>
    %cst_108 = arith.constant 5.000000e-01 : f32
    %281 = vector.broadcast %cst_108 : f32 to vector<8x128xf32>
    %282 = arith.mulf %281, %280 : vector<8x128xf32>
    %cst_109 = arith.constant 5.000000e-01 : f32
    %283 = vector.broadcast %cst_109 : f32 to vector<8x128xf32>
    %284 = arith.addf %282, %283 : vector<8x128xf32>
    %285 = arith.mulf %274, %248 : vector<8x128xf32>
    %286 = arith.mulf %266, %276 : vector<8x128xf32>
    %287 = arith.addf %285, %286 : vector<8x128xf32>
    %288 = math.tanh %287 : vector<8x128xf32>
    %289 = arith.mulf %284, %288 : vector<8x128xf32>
    %c7_i32 = arith.constant 7 : i32
    %c8_i32_110 = arith.constant 8 : i32
    %290 = arith.muli %c7_i32, %c8_i32_110 : i32
    %291 = tpu.assume_multiple %290, 8 : i32
    %292 = arith.index_cast %291 : i32 to index
    %c0_111 = arith.constant 0 : index
    %293 = vector.load %arg11[%292, %c0_111] : memref<64x512xf32, #tpu.memory_space<vmem>>, vector<8x512xf32>
    %294 = vector.extract_strided_slice %289 {offsets = [0, 0], sizes = [8, 64], strides = [1, 1]} : vector<8x128xf32> to vector<8x64xf32>
    %c0_112 = arith.constant 0 : index
    %c0_113 = arith.constant 0 : index
    %295 = vector.load %arg3[%c0_112, %c0_113] : memref<64x512xf32, #tpu.memory_space<vmem>>, vector<64x512xf32>
    %cst_114 = arith.constant dense<0.000000e+00> : vector<8x512xf32>
    %296 = tpu.matmul %294, %295, %cst_114 {dimension_numbers = #tpu.dot_dimension_numbers<[1], [0], [0], [1], [0, 0, 1, 1], [], []>} : vector<8x64xf32>, vector<64x512xf32>, vector<8x512xf32> -> vector<8x512xf32>
    %297 = arith.addf %293, %296 : vector<8x512xf32>
    %298 = vector.extract_strided_slice %297 {offsets = [0, 0], sizes = [8, 128], strides = [1, 1]} : vector<8x512xf32> to vector<8x128xf32>
    %cst_115 = arith.constant 5.000000e-01 : f32
    %299 = vector.broadcast %cst_115 : f32 to vector<8x128xf32>
    %300 = arith.mulf %299, %298 : vector<8x128xf32>
    %301 = math.tanh %300 : vector<8x128xf32>
    %cst_116 = arith.constant 5.000000e-01 : f32
    %302 = vector.broadcast %cst_116 : f32 to vector<8x128xf32>
    %303 = arith.mulf %302, %301 : vector<8x128xf32>
    %cst_117 = arith.constant 5.000000e-01 : f32
    %304 = vector.broadcast %cst_117 : f32 to vector<8x128xf32>
    %305 = arith.addf %303, %304 : vector<8x128xf32>
    %306 = vector.extract_strided_slice %297 {offsets = [0, 128], sizes = [8, 128], strides = [1, 1]} : vector<8x512xf32> to vector<8x128xf32>
    %cst_118 = arith.constant 5.000000e-01 : f32
    %307 = vector.broadcast %cst_118 : f32 to vector<8x128xf32>
    %308 = arith.mulf %307, %306 : vector<8x128xf32>
    %309 = math.tanh %308 : vector<8x128xf32>
    %cst_119 = arith.constant 5.000000e-01 : f32
    %310 = vector.broadcast %cst_119 : f32 to vector<8x128xf32>
    %311 = arith.mulf %310, %309 : vector<8x128xf32>
    %cst_120 = arith.constant 5.000000e-01 : f32
    %312 = vector.broadcast %cst_120 : f32 to vector<8x128xf32>
    %313 = arith.addf %311, %312 : vector<8x128xf32>
    %314 = vector.extract_strided_slice %297 {offsets = [0, 256], sizes = [8, 128], strides = [1, 1]} : vector<8x512xf32> to vector<8x128xf32>
    %315 = math.tanh %314 : vector<8x128xf32>
    %316 = vector.extract_strided_slice %297 {offsets = [0, 384], sizes = [8, 128], strides = [1, 1]} : vector<8x512xf32> to vector<8x128xf32>
    %cst_121 = arith.constant 5.000000e-01 : f32
    %317 = vector.broadcast %cst_121 : f32 to vector<8x128xf32>
    %318 = arith.mulf %317, %316 : vector<8x128xf32>
    %319 = math.tanh %318 : vector<8x128xf32>
    %cst_122 = arith.constant 5.000000e-01 : f32
    %320 = vector.broadcast %cst_122 : f32 to vector<8x128xf32>
    %321 = arith.mulf %320, %319 : vector<8x128xf32>
    %cst_123 = arith.constant 5.000000e-01 : f32
    %322 = vector.broadcast %cst_123 : f32 to vector<8x128xf32>
    %323 = arith.addf %321, %322 : vector<8x128xf32>
    %324 = arith.mulf %313, %287 : vector<8x128xf32>
    %325 = arith.mulf %305, %315 : vector<8x128xf32>
    %326 = arith.addf %324, %325 : vector<8x128xf32>
    %327 = math.tanh %326 : vector<8x128xf32>
    %328 = arith.mulf %323, %327 : vector<8x128xf32>
    %c8_i32_124 = arith.constant 8 : i32
    %c0_i32_125 = arith.constant 0 : i32
    %329 = tpu.memref_slice %arg18[%c0_i32_125] : memref<4x!tpu.dma_semaphore, #tpu.memory_space<semaphore_mem>> -> memref<1x!tpu.dma_semaphore, #tpu.memory_space<semaphore_mem>>
    %330 = tpu.memref_squeeze %329 : memref<1x!tpu.dma_semaphore, #tpu.memory_space<semaphore_mem>> -> memref<!tpu.dma_semaphore, #tpu.memory_space<semaphore_mem>>
    tpu.wait_dma2 semaphore(%330 : memref<!tpu.dma_semaphore, #tpu.memory_space<semaphore_mem>>) src(%arg1 : memref<64x8xf32, #tpu.memory_space<any>>) dst(%arg14 : memref<64x8xf32, #tpu.memory_space<vmem>>)
    %c1_i32_126 = arith.constant 1 : i32
    %331 = tpu.memref_slice %arg18[%c1_i32_126] : memref<4x!tpu.dma_semaphore, #tpu.memory_space<semaphore_mem>> -> memref<1x!tpu.dma_semaphore, #tpu.memory_space<semaphore_mem>>
    %332 = tpu.memref_squeeze %331 : memref<1x!tpu.dma_semaphore, #tpu.memory_space<semaphore_mem>> -> memref<!tpu.dma_semaphore, #tpu.memory_space<semaphore_mem>>
    tpu.wait_dma2 semaphore(%332 : memref<!tpu.dma_semaphore, #tpu.memory_space<semaphore_mem>>) src(%arg5 : memref<8x512xf32, #tpu.memory_space<any>>) dst(%arg15 : memref<8x512xf32, #tpu.memory_space<vmem>>)
    %c2_i32_127 = arith.constant 2 : i32
    %333 = tpu.memref_slice %arg18[%c2_i32_127] : memref<4x!tpu.dma_semaphore, #tpu.memory_space<semaphore_mem>> -> memref<1x!tpu.dma_semaphore, #tpu.memory_space<semaphore_mem>>
    %334 = tpu.memref_squeeze %333 : memref<1x!tpu.dma_semaphore, #tpu.memory_space<semaphore_mem>> -> memref<!tpu.dma_semaphore, #tpu.memory_space<semaphore_mem>>
    tpu.wait_dma2 semaphore(%334 : memref<!tpu.dma_semaphore, #tpu.memory_space<semaphore_mem>>) src(%arg6 : memref<64x512xf32, #tpu.memory_space<any>>) dst(%arg16 : memref<64x512xf32, #tpu.memory_space<vmem>>)
    %c3_i32_128 = arith.constant 3 : i32
    %335 = tpu.memref_slice %arg18[%c3_i32_128] : memref<4x!tpu.dma_semaphore, #tpu.memory_space<semaphore_mem>> -> memref<1x!tpu.dma_semaphore, #tpu.memory_space<semaphore_mem>>
    %336 = tpu.memref_squeeze %335 : memref<1x!tpu.dma_semaphore, #tpu.memory_space<semaphore_mem>> -> memref<!tpu.dma_semaphore, #tpu.memory_space<semaphore_mem>>
    tpu.wait_dma2 semaphore(%336 : memref<!tpu.dma_semaphore, #tpu.memory_space<semaphore_mem>>) src(%arg7 : memref<1x512xf32, #tpu.memory_space<any>>) dst(%arg17 : memref<1x512xf32, #tpu.memory_space<vmem>>)
    %c0_129 = arith.constant 0 : index
    %c0_130 = arith.constant 0 : index
    %337 = vector.load %arg14[%c0_129, %c0_130] : memref<64x8xf32, #tpu.memory_space<vmem>>, vector<64x8xf32>
    %c0_131 = arith.constant 0 : index
    %c0_132 = arith.constant 0 : index
    %338 = vector.load %arg15[%c0_131, %c0_132] : memref<8x512xf32, #tpu.memory_space<vmem>>, vector<8x512xf32>
    %cst_133 = arith.constant dense<0.000000e+00> : vector<64x512xf32>
    %339 = tpu.matmul %337, %338, %cst_133 {dimension_numbers = #tpu.dot_dimension_numbers<[1], [0], [0], [1], [0, 0, 1, 1], [], []>} : vector<64x8xf32>, vector<8x512xf32>, vector<64x512xf32> -> vector<64x512xf32>
    %c0_134 = arith.constant 0 : index
    %c0_135 = arith.constant 0 : index
    %340 = vector.load %arg17[%c0_134, %c0_135] : memref<1x512xf32, #tpu.memory_space<vmem>>, vector<1x512xf32>
    %341 = vector.broadcast %340 : vector<1x512xf32> to vector<64x512xf32>
    %342 = arith.addf %339, %341 : vector<64x512xf32>
    %c0_136 = arith.constant 0 : index
    %c0_137 = arith.constant 0 : index
    %343 = vector.load %arg12[%c0_136, %c0_137] : memref<64x512xf32, #tpu.memory_space<vmem>>, vector<64x512xf32>
    tpu.vector_store %arg12[%c0_136, %c0_137], %342 {strides = array<i32>} : memref<64x512xf32, #tpu.memory_space<vmem>>, vector<64x512xf32>,
    %c0_i32_138 = arith.constant 0 : i32
    %c8_i32_139 = arith.constant 8 : i32
    %344 = arith.muli %c0_i32_138, %c8_i32_139 : i32
    %345 = tpu.assume_multiple %344, 8 : i32
    %346 = arith.index_cast %345 : i32 to index
    %c0_140 = arith.constant 0 : index
    %347 = vector.load %arg12[%346, %c0_140] : memref<64x512xf32, #tpu.memory_space<vmem>>, vector<8x512xf32>
    %348 = vector.extract_strided_slice %328 {offsets = [0, 0], sizes = [8, 64], strides = [1, 1]} : vector<8x128xf32> to vector<8x64xf32>
    %c0_141 = arith.constant 0 : index
    %c0_142 = arith.constant 0 : index
    %349 = vector.load %arg16[%c0_141, %c0_142] : memref<64x512xf32, #tpu.memory_space<vmem>>, vector<64x512xf32>
    %cst_143 = arith.constant dense<0.000000e+00> : vector<8x512xf32>
    %350 = tpu.matmul %348, %349, %cst_143 {dimension_numbers = #tpu.dot_dimension_numbers<[1], [0], [0], [1], [0, 0, 1, 1], [], []>} : vector<8x64xf32>, vector<64x512xf32>, vector<8x512xf32> -> vector<8x512xf32>
    %351 = arith.addf %347, %350 : vector<8x512xf32>
    %352 = vector.extract_strided_slice %351 {offsets = [0, 0], sizes = [8, 128], strides = [1, 1]} : vector<8x512xf32> to vector<8x128xf32>
    %cst_144 = arith.constant 5.000000e-01 : f32
    %353 = vector.broadcast %cst_144 : f32 to vector<8x128xf32>
    %354 = arith.mulf %353, %352 : vector<8x128xf32>
    %355 = math.tanh %354 : vector<8x128xf32>
    %cst_145 = arith.constant 5.000000e-01 : f32
    %356 = vector.broadcast %cst_145 : f32 to vector<8x128xf32>
    %357 = arith.mulf %356, %355 : vector<8x128xf32>
    %cst_146 = arith.constant 5.000000e-01 : f32
    %358 = vector.broadcast %cst_146 : f32 to vector<8x128xf32>
    %359 = arith.addf %357, %358 : vector<8x128xf32>
    %360 = vector.extract_strided_slice %351 {offsets = [0, 128], sizes = [8, 128], strides = [1, 1]} : vector<8x512xf32> to vector<8x128xf32>
    %cst_147 = arith.constant 5.000000e-01 : f32
    %361 = vector.broadcast %cst_147 : f32 to vector<8x128xf32>
    %362 = arith.mulf %361, %360 : vector<8x128xf32>
    %363 = math.tanh %362 : vector<8x128xf32>
    %cst_148 = arith.constant 5.000000e-01 : f32
    %364 = vector.broadcast %cst_148 : f32 to vector<8x128xf32>
    %365 = arith.mulf %364, %363 : vector<8x128xf32>
    %cst_149 = arith.constant 5.000000e-01 : f32
    %366 = vector.broadcast %cst_149 : f32 to vector<8x128xf32>
    %367 = arith.addf %365, %366 : vector<8x128xf32>
    %368 = vector.extract_strided_slice %351 {offsets = [0, 256], sizes = [8, 128], strides = [1, 1]} : vector<8x512xf32> to vector<8x128xf32>
    %369 = math.tanh %368 : vector<8x128xf32>
    %370 = vector.extract_strided_slice %351 {offsets = [0, 384], sizes = [8, 128], strides = [1, 1]} : vector<8x512xf32> to vector<8x128xf32>
    %cst_150 = arith.constant 5.000000e-01 : f32
    %371 = vector.broadcast %cst_150 : f32 to vector<8x128xf32>
    %372 = arith.mulf %371, %370 : vector<8x128xf32>
    %373 = math.tanh %372 : vector<8x128xf32>
    %cst_151 = arith.constant 5.000000e-01 : f32
    %374 = vector.broadcast %cst_151 : f32 to vector<8x128xf32>
    %375 = arith.mulf %374, %373 : vector<8x128xf32>
    %cst_152 = arith.constant 5.000000e-01 : f32
    %376 = vector.broadcast %cst_152 : f32 to vector<8x128xf32>
    %377 = arith.addf %375, %376 : vector<8x128xf32>
    %378 = arith.mulf %367, %326 : vector<8x128xf32>
    %379 = arith.mulf %359, %369 : vector<8x128xf32>
    %380 = arith.addf %378, %379 : vector<8x128xf32>
    %381 = math.tanh %380 : vector<8x128xf32>
    %382 = arith.mulf %377, %381 : vector<8x128xf32>
    %383 = arith.index_cast %345 : i32 to index
    %c0_153 = arith.constant 0 : index
    %384 = vector.load %arg13[%383, %c0_153] : memref<64x128xf32, #tpu.memory_space<vmem>>, vector<8x128xf32>
    tpu.vector_store %arg13[%383, %c0_153], %382 {strides = array<i32>} : memref<64x128xf32, #tpu.memory_space<vmem>>, vector<8x128xf32>,
    %c1_i32_154 = arith.constant 1 : i32
    %c8_i32_155 = arith.constant 8 : i32
    %385 = arith.muli %c1_i32_154, %c8_i32_155 : i32
    %386 = tpu.assume_multiple %385, 8 : i32
    %387 = arith.index_cast %386 : i32 to index
    %c0_156 = arith.constant 0 : index
    %388 = vector.load %arg12[%387, %c0_156] : memref<64x512xf32, #tpu.memory_space<vmem>>, vector<8x512xf32>
    %389 = vector.extract_strided_slice %382 {offsets = [0, 0], sizes = [8, 64], strides = [1, 1]} : vector<8x128xf32> to vector<8x64xf32>
    %c0_157 = arith.constant 0 : index
    %c0_158 = arith.constant 0 : index
    %390 = vector.load %arg16[%c0_157, %c0_158] : memref<64x512xf32, #tpu.memory_space<vmem>>, vector<64x512xf32>
    %cst_159 = arith.constant dense<0.000000e+00> : vector<8x512xf32>
    %391 = tpu.matmul %389, %390, %cst_159 {dimension_numbers = #tpu.dot_dimension_numbers<[1], [0], [0], [1], [0, 0, 1, 1], [], []>} : vector<8x64xf32>, vector<64x512xf32>, vector<8x512xf32> -> vector<8x512xf32>
    %392 = arith.addf %388, %391 : vector<8x512xf32>
    %393 = vector.extract_strided_slice %392 {offsets = [0, 0], sizes = [8, 128], strides = [1, 1]} : vector<8x512xf32> to vector<8x128xf32>
    %cst_160 = arith.constant 5.000000e-01 : f32
    %394 = vector.broadcast %cst_160 : f32 to vector<8x128xf32>
    %395 = arith.mulf %394, %393 : vector<8x128xf32>
    %396 = math.tanh %395 : vector<8x128xf32>
    %cst_161 = arith.constant 5.000000e-01 : f32
    %397 = vector.broadcast %cst_161 : f32 to vector<8x128xf32>
    %398 = arith.mulf %397, %396 : vector<8x128xf32>
    %cst_162 = arith.constant 5.000000e-01 : f32
    %399 = vector.broadcast %cst_162 : f32 to vector<8x128xf32>
    %400 = arith.addf %398, %399 : vector<8x128xf32>
    %401 = vector.extract_strided_slice %392 {offsets = [0, 128], sizes = [8, 128], strides = [1, 1]} : vector<8x512xf32> to vector<8x128xf32>
    %cst_163 = arith.constant 5.000000e-01 : f32
    %402 = vector.broadcast %cst_163 : f32 to vector<8x128xf32>
    %403 = arith.mulf %402, %401 : vector<8x128xf32>
    %404 = math.tanh %403 : vector<8x128xf32>
    %cst_164 = arith.constant 5.000000e-01 : f32
    %405 = vector.broadcast %cst_164 : f32 to vector<8x128xf32>
    %406 = arith.mulf %405, %404 : vector<8x128xf32>
    %cst_165 = arith.constant 5.000000e-01 : f32
    %407 = vector.broadcast %cst_165 : f32 to vector<8x128xf32>
    %408 = arith.addf %406, %407 : vector<8x128xf32>
    %409 = vector.extract_strided_slice %392 {offsets = [0, 256], sizes = [8, 128], strides = [1, 1]} : vector<8x512xf32> to vector<8x128xf32>
    %410 = math.tanh %409 : vector<8x128xf32>
    %411 = vector.extract_strided_slice %392 {offsets = [0, 384], sizes = [8, 128], strides = [1, 1]} : vector<8x512xf32> to vector<8x128xf32>
    %cst_166 = arith.constant 5.000000e-01 : f32
    %412 = vector.broadcast %cst_166 : f32 to vector<8x128xf32>
    %413 = arith.mulf %412, %411 : vector<8x128xf32>
    %414 = math.tanh %413 : vector<8x128xf32>
    %cst_167 = arith.constant 5.000000e-01 : f32
    %415 = vector.broadcast %cst_167 : f32 to vector<8x128xf32>
    %416 = arith.mulf %415, %414 : vector<8x128xf32>
    %cst_168 = arith.constant 5.000000e-01 : f32
    %417 = vector.broadcast %cst_168 : f32 to vector<8x128xf32>
    %418 = arith.addf %416, %417 : vector<8x128xf32>
    %419 = arith.mulf %408, %380 : vector<8x128xf32>
    %420 = arith.mulf %400, %410 : vector<8x128xf32>
    %421 = arith.addf %419, %420 : vector<8x128xf32>
    %422 = math.tanh %421 : vector<8x128xf32>
    %423 = arith.mulf %418, %422 : vector<8x128xf32>
    %424 = arith.index_cast %386 : i32 to index
    %c0_169 = arith.constant 0 : index
    %425 = vector.load %arg13[%424, %c0_169] : memref<64x128xf32, #tpu.memory_space<vmem>>, vector<8x128xf32>
    tpu.vector_store %arg13[%424, %c0_169], %423 {strides = array<i32>} : memref<64x128xf32, #tpu.memory_space<vmem>>, vector<8x128xf32>,
    %c2_i32_170 = arith.constant 2 : i32
    %c8_i32_171 = arith.constant 8 : i32
    %426 = arith.muli %c2_i32_170, %c8_i32_171 : i32
    %427 = tpu.assume_multiple %426, 8 : i32
    %428 = arith.index_cast %427 : i32 to index
    %c0_172 = arith.constant 0 : index
    %429 = vector.load %arg12[%428, %c0_172] : memref<64x512xf32, #tpu.memory_space<vmem>>, vector<8x512xf32>
    %430 = vector.extract_strided_slice %423 {offsets = [0, 0], sizes = [8, 64], strides = [1, 1]} : vector<8x128xf32> to vector<8x64xf32>
    %c0_173 = arith.constant 0 : index
    %c0_174 = arith.constant 0 : index
    %431 = vector.load %arg16[%c0_173, %c0_174] : memref<64x512xf32, #tpu.memory_space<vmem>>, vector<64x512xf32>
    %cst_175 = arith.constant dense<0.000000e+00> : vector<8x512xf32>
    %432 = tpu.matmul %430, %431, %cst_175 {dimension_numbers = #tpu.dot_dimension_numbers<[1], [0], [0], [1], [0, 0, 1, 1], [], []>} : vector<8x64xf32>, vector<64x512xf32>, vector<8x512xf32> -> vector<8x512xf32>
    %433 = arith.addf %429, %432 : vector<8x512xf32>
    %434 = vector.extract_strided_slice %433 {offsets = [0, 0], sizes = [8, 128], strides = [1, 1]} : vector<8x512xf32> to vector<8x128xf32>
    %cst_176 = arith.constant 5.000000e-01 : f32
    %435 = vector.broadcast %cst_176 : f32 to vector<8x128xf32>
    %436 = arith.mulf %435, %434 : vector<8x128xf32>
    %437 = math.tanh %436 : vector<8x128xf32>
    %cst_177 = arith.constant 5.000000e-01 : f32
    %438 = vector.broadcast %cst_177 : f32 to vector<8x128xf32>
    %439 = arith.mulf %438, %437 : vector<8x128xf32>
    %cst_178 = arith.constant 5.000000e-01 : f32
    %440 = vector.broadcast %cst_178 : f32 to vector<8x128xf32>
    %441 = arith.addf %439, %440 : vector<8x128xf32>
    %442 = vector.extract_strided_slice %433 {offsets = [0, 128], sizes = [8, 128], strides = [1, 1]} : vector<8x512xf32> to vector<8x128xf32>
    %cst_179 = arith.constant 5.000000e-01 : f32
    %443 = vector.broadcast %cst_179 : f32 to vector<8x128xf32>
    %444 = arith.mulf %443, %442 : vector<8x128xf32>
    %445 = math.tanh %444 : vector<8x128xf32>
    %cst_180 = arith.constant 5.000000e-01 : f32
    %446 = vector.broadcast %cst_180 : f32 to vector<8x128xf32>
    %447 = arith.mulf %446, %445 : vector<8x128xf32>
    %cst_181 = arith.constant 5.000000e-01 : f32
    %448 = vector.broadcast %cst_181 : f32 to vector<8x128xf32>
    %449 = arith.addf %447, %448 : vector<8x128xf32>
    %450 = vector.extract_strided_slice %433 {offsets = [0, 256], sizes = [8, 128], strides = [1, 1]} : vector<8x512xf32> to vector<8x128xf32>
    %451 = math.tanh %450 : vector<8x128xf32>
    %452 = vector.extract_strided_slice %433 {offsets = [0, 384], sizes = [8, 128], strides = [1, 1]} : vector<8x512xf32> to vector<8x128xf32>
    %cst_182 = arith.constant 5.000000e-01 : f32
    %453 = vector.broadcast %cst_182 : f32 to vector<8x128xf32>
    %454 = arith.mulf %453, %452 : vector<8x128xf32>
    %455 = math.tanh %454 : vector<8x128xf32>
    %cst_183 = arith.constant 5.000000e-01 : f32
    %456 = vector.broadcast %cst_183 : f32 to vector<8x128xf32>
    %457 = arith.mulf %456, %455 : vector<8x128xf32>
    %cst_184 = arith.constant 5.000000e-01 : f32
    %458 = vector.broadcast %cst_184 : f32 to vector<8x128xf32>
    %459 = arith.addf %457, %458 : vector<8x128xf32>
    %460 = arith.mulf %449, %421 : vector<8x128xf32>
    %461 = arith.mulf %441, %451 : vector<8x128xf32>
    %462 = arith.addf %460, %461 : vector<8x128xf32>
    %463 = math.tanh %462 : vector<8x128xf32>
    %464 = arith.mulf %459, %463 : vector<8x128xf32>
    %465 = arith.index_cast %427 : i32 to index
    %c0_185 = arith.constant 0 : index
    %466 = vector.load %arg13[%465, %c0_185] : memref<64x128xf32, #tpu.memory_space<vmem>>, vector<8x128xf32>
    tpu.vector_store %arg13[%465, %c0_185], %464 {strides = array<i32>} : memref<64x128xf32, #tpu.memory_space<vmem>>, vector<8x128xf32>,
    %c3_i32_186 = arith.constant 3 : i32
    %c8_i32_187 = arith.constant 8 : i32
    %467 = arith.muli %c3_i32_186, %c8_i32_187 : i32
    %468 = tpu.assume_multiple %467, 8 : i32
    %469 = arith.index_cast %468 : i32 to index
    %c0_188 = arith.constant 0 : index
    %470 = vector.load %arg12[%469, %c0_188] : memref<64x512xf32, #tpu.memory_space<vmem>>, vector<8x512xf32>
    %471 = vector.extract_strided_slice %464 {offsets = [0, 0], sizes = [8, 64], strides = [1, 1]} : vector<8x128xf32> to vector<8x64xf32>
    %c0_189 = arith.constant 0 : index
    %c0_190 = arith.constant 0 : index
    %472 = vector.load %arg16[%c0_189, %c0_190] : memref<64x512xf32, #tpu.memory_space<vmem>>, vector<64x512xf32>
    %cst_191 = arith.constant dense<0.000000e+00> : vector<8x512xf32>
    %473 = tpu.matmul %471, %472, %cst_191 {dimension_numbers = #tpu.dot_dimension_numbers<[1], [0], [0], [1], [0, 0, 1, 1], [], []>} : vector<8x64xf32>, vector<64x512xf32>, vector<8x512xf32> -> vector<8x512xf32>
    %474 = arith.addf %470, %473 : vector<8x512xf32>
    %475 = vector.extract_strided_slice %474 {offsets = [0, 0], sizes = [8, 128], strides = [1, 1]} : vector<8x512xf32> to vector<8x128xf32>
    %cst_192 = arith.constant 5.000000e-01 : f32
    %476 = vector.broadcast %cst_192 : f32 to vector<8x128xf32>
    %477 = arith.mulf %476, %475 : vector<8x128xf32>
    %478 = math.tanh %477 : vector<8x128xf32>
    %cst_193 = arith.constant 5.000000e-01 : f32
    %479 = vector.broadcast %cst_193 : f32 to vector<8x128xf32>
    %480 = arith.mulf %479, %478 : vector<8x128xf32>
    %cst_194 = arith.constant 5.000000e-01 : f32
    %481 = vector.broadcast %cst_194 : f32 to vector<8x128xf32>
    %482 = arith.addf %480, %481 : vector<8x128xf32>
    %483 = vector.extract_strided_slice %474 {offsets = [0, 128], sizes = [8, 128], strides = [1, 1]} : vector<8x512xf32> to vector<8x128xf32>
    %cst_195 = arith.constant 5.000000e-01 : f32
    %484 = vector.broadcast %cst_195 : f32 to vector<8x128xf32>
    %485 = arith.mulf %484, %483 : vector<8x128xf32>
    %486 = math.tanh %485 : vector<8x128xf32>
    %cst_196 = arith.constant 5.000000e-01 : f32
    %487 = vector.broadcast %cst_196 : f32 to vector<8x128xf32>
    %488 = arith.mulf %487, %486 : vector<8x128xf32>
    %cst_197 = arith.constant 5.000000e-01 : f32
    %489 = vector.broadcast %cst_197 : f32 to vector<8x128xf32>
    %490 = arith.addf %488, %489 : vector<8x128xf32>
    %491 = vector.extract_strided_slice %474 {offsets = [0, 256], sizes = [8, 128], strides = [1, 1]} : vector<8x512xf32> to vector<8x128xf32>
    %492 = math.tanh %491 : vector<8x128xf32>
    %493 = vector.extract_strided_slice %474 {offsets = [0, 384], sizes = [8, 128], strides = [1, 1]} : vector<8x512xf32> to vector<8x128xf32>
    %cst_198 = arith.constant 5.000000e-01 : f32
    %494 = vector.broadcast %cst_198 : f32 to vector<8x128xf32>
    %495 = arith.mulf %494, %493 : vector<8x128xf32>
    %496 = math.tanh %495 : vector<8x128xf32>
    %cst_199 = arith.constant 5.000000e-01 : f32
    %497 = vector.broadcast %cst_199 : f32 to vector<8x128xf32>
    %498 = arith.mulf %497, %496 : vector<8x128xf32>
    %cst_200 = arith.constant 5.000000e-01 : f32
    %499 = vector.broadcast %cst_200 : f32 to vector<8x128xf32>
    %500 = arith.addf %498, %499 : vector<8x128xf32>
    %501 = arith.mulf %490, %462 : vector<8x128xf32>
    %502 = arith.mulf %482, %492 : vector<8x128xf32>
    %503 = arith.addf %501, %502 : vector<8x128xf32>
    %504 = math.tanh %503 : vector<8x128xf32>
    %505 = arith.mulf %500, %504 : vector<8x128xf32>
    %506 = arith.index_cast %468 : i32 to index
    %c0_201 = arith.constant 0 : index
    %507 = vector.load %arg13[%506, %c0_201] : memref<64x128xf32, #tpu.memory_space<vmem>>, vector<8x128xf32>
    tpu.vector_store %arg13[%506, %c0_201], %505 {strides = array<i32>} : memref<64x128xf32, #tpu.memory_space<vmem>>, vector<8x128xf32>,
    %c4_i32_202 = arith.constant 4 : i32
    %c8_i32_203 = arith.constant 8 : i32
    %508 = arith.muli %c4_i32_202, %c8_i32_203 : i32
    %509 = tpu.assume_multiple %508, 8 : i32
    %510 = arith.index_cast %509 : i32 to index
    %c0_204 = arith.constant 0 : index
    %511 = vector.load %arg12[%510, %c0_204] : memref<64x512xf32, #tpu.memory_space<vmem>>, vector<8x512xf32>
    %512 = vector.extract_strided_slice %505 {offsets = [0, 0], sizes = [8, 64], strides = [1, 1]} : vector<8x128xf32> to vector<8x64xf32>
    %c0_205 = arith.constant 0 : index
    %c0_206 = arith.constant 0 : index
    %513 = vector.load %arg16[%c0_205, %c0_206] : memref<64x512xf32, #tpu.memory_space<vmem>>, vector<64x512xf32>
    %cst_207 = arith.constant dense<0.000000e+00> : vector<8x512xf32>
    %514 = tpu.matmul %512, %513, %cst_207 {dimension_numbers = #tpu.dot_dimension_numbers<[1], [0], [0], [1], [0, 0, 1, 1], [], []>} : vector<8x64xf32>, vector<64x512xf32>, vector<8x512xf32> -> vector<8x512xf32>
    %515 = arith.addf %511, %514 : vector<8x512xf32>
    %516 = vector.extract_strided_slice %515 {offsets = [0, 0], sizes = [8, 128], strides = [1, 1]} : vector<8x512xf32> to vector<8x128xf32>
    %cst_208 = arith.constant 5.000000e-01 : f32
    %517 = vector.broadcast %cst_208 : f32 to vector<8x128xf32>
    %518 = arith.mulf %517, %516 : vector<8x128xf32>
    %519 = math.tanh %518 : vector<8x128xf32>
    %cst_209 = arith.constant 5.000000e-01 : f32
    %520 = vector.broadcast %cst_209 : f32 to vector<8x128xf32>
    %521 = arith.mulf %520, %519 : vector<8x128xf32>
    %cst_210 = arith.constant 5.000000e-01 : f32
    %522 = vector.broadcast %cst_210 : f32 to vector<8x128xf32>
    %523 = arith.addf %521, %522 : vector<8x128xf32>
    %524 = vector.extract_strided_slice %515 {offsets = [0, 128], sizes = [8, 128], strides = [1, 1]} : vector<8x512xf32> to vector<8x128xf32>
    %cst_211 = arith.constant 5.000000e-01 : f32
    %525 = vector.broadcast %cst_211 : f32 to vector<8x128xf32>
    %526 = arith.mulf %525, %524 : vector<8x128xf32>
    %527 = math.tanh %526 : vector<8x128xf32>
    %cst_212 = arith.constant 5.000000e-01 : f32
    %528 = vector.broadcast %cst_212 : f32 to vector<8x128xf32>
    %529 = arith.mulf %528, %527 : vector<8x128xf32>
    %cst_213 = arith.constant 5.000000e-01 : f32
    %530 = vector.broadcast %cst_213 : f32 to vector<8x128xf32>
    %531 = arith.addf %529, %530 : vector<8x128xf32>
    %532 = vector.extract_strided_slice %515 {offsets = [0, 256], sizes = [8, 128], strides = [1, 1]} : vector<8x512xf32> to vector<8x128xf32>
    %533 = math.tanh %532 : vector<8x128xf32>
    %534 = vector.extract_strided_slice %515 {offsets = [0, 384], sizes = [8, 128], strides = [1, 1]} : vector<8x512xf32> to vector<8x128xf32>
    %cst_214 = arith.constant 5.000000e-01 : f32
    %535 = vector.broadcast %cst_214 : f32 to vector<8x128xf32>
    %536 = arith.mulf %535, %534 : vector<8x128xf32>
    %537 = math.tanh %536 : vector<8x128xf32>
    %cst_215 = arith.constant 5.000000e-01 : f32
    %538 = vector.broadcast %cst_215 : f32 to vector<8x128xf32>
    %539 = arith.mulf %538, %537 : vector<8x128xf32>
    %cst_216 = arith.constant 5.000000e-01 : f32
    %540 = vector.broadcast %cst_216 : f32 to vector<8x128xf32>
    %541 = arith.addf %539, %540 : vector<8x128xf32>
    %542 = arith.mulf %531, %503 : vector<8x128xf32>
    %543 = arith.mulf %523, %533 : vector<8x128xf32>
    %544 = arith.addf %542, %543 : vector<8x128xf32>
    %545 = math.tanh %544 : vector<8x128xf32>
    %546 = arith.mulf %541, %545 : vector<8x128xf32>
    %547 = arith.index_cast %509 : i32 to index
    %c0_217 = arith.constant 0 : index
    %548 = vector.load %arg13[%547, %c0_217] : memref<64x128xf32, #tpu.memory_space<vmem>>, vector<8x128xf32>
    tpu.vector_store %arg13[%547, %c0_217], %546 {strides = array<i32>} : memref<64x128xf32, #tpu.memory_space<vmem>>, vector<8x128xf32>,
    %c5_i32_218 = arith.constant 5 : i32
    %c8_i32_219 = arith.constant 8 : i32
    %549 = arith.muli %c5_i32_218, %c8_i32_219 : i32
    %550 = tpu.assume_multiple %549, 8 : i32
    %551 = arith.index_cast %550 : i32 to index
    %c0_220 = arith.constant 0 : index
    %552 = vector.load %arg12[%551, %c0_220] : memref<64x512xf32, #tpu.memory_space<vmem>>, vector<8x512xf32>
    %553 = vector.extract_strided_slice %546 {offsets = [0, 0], sizes = [8, 64], strides = [1, 1]} : vector<8x128xf32> to vector<8x64xf32>
    %c0_221 = arith.constant 0 : index
    %c0_222 = arith.constant 0 : index
    %554 = vector.load %arg16[%c0_221, %c0_222] : memref<64x512xf32, #tpu.memory_space<vmem>>, vector<64x512xf32>
    %cst_223 = arith.constant dense<0.000000e+00> : vector<8x512xf32>
    %555 = tpu.matmul %553, %554, %cst_223 {dimension_numbers = #tpu.dot_dimension_numbers<[1], [0], [0], [1], [0, 0, 1, 1], [], []>} : vector<8x64xf32>, vector<64x512xf32>, vector<8x512xf32> -> vector<8x512xf32>
    %556 = arith.addf %552, %555 : vector<8x512xf32>
    %557 = vector.extract_strided_slice %556 {offsets = [0, 0], sizes = [8, 128], strides = [1, 1]} : vector<8x512xf32> to vector<8x128xf32>
    %cst_224 = arith.constant 5.000000e-01 : f32
    %558 = vector.broadcast %cst_224 : f32 to vector<8x128xf32>
    %559 = arith.mulf %558, %557 : vector<8x128xf32>
    %560 = math.tanh %559 : vector<8x128xf32>
    %cst_225 = arith.constant 5.000000e-01 : f32
    %561 = vector.broadcast %cst_225 : f32 to vector<8x128xf32>
    %562 = arith.mulf %561, %560 : vector<8x128xf32>
    %cst_226 = arith.constant 5.000000e-01 : f32
    %563 = vector.broadcast %cst_226 : f32 to vector<8x128xf32>
    %564 = arith.addf %562, %563 : vector<8x128xf32>
    %565 = vector.extract_strided_slice %556 {offsets = [0, 128], sizes = [8, 128], strides = [1, 1]} : vector<8x512xf32> to vector<8x128xf32>
    %cst_227 = arith.constant 5.000000e-01 : f32
    %566 = vector.broadcast %cst_227 : f32 to vector<8x128xf32>
    %567 = arith.mulf %566, %565 : vector<8x128xf32>
    %568 = math.tanh %567 : vector<8x128xf32>
    %cst_228 = arith.constant 5.000000e-01 : f32
    %569 = vector.broadcast %cst_228 : f32 to vector<8x128xf32>
    %570 = arith.mulf %569, %568 : vector<8x128xf32>
    %cst_229 = arith.constant 5.000000e-01 : f32
    %571 = vector.broadcast %cst_229 : f32 to vector<8x128xf32>
    %572 = arith.addf %570, %571 : vector<8x128xf32>
    %573 = vector.extract_strided_slice %556 {offsets = [0, 256], sizes = [8, 128], strides = [1, 1]} : vector<8x512xf32> to vector<8x128xf32>
    %574 = math.tanh %573 : vector<8x128xf32>
    %575 = vector.extract_strided_slice %556 {offsets = [0, 384], sizes = [8, 128], strides = [1, 1]} : vector<8x512xf32> to vector<8x128xf32>
    %cst_230 = arith.constant 5.000000e-01 : f32
    %576 = vector.broadcast %cst_230 : f32 to vector<8x128xf32>
    %577 = arith.mulf %576, %575 : vector<8x128xf32>
    %578 = math.tanh %577 : vector<8x128xf32>
    %cst_231 = arith.constant 5.000000e-01 : f32
    %579 = vector.broadcast %cst_231 : f32 to vector<8x128xf32>
    %580 = arith.mulf %579, %578 : vector<8x128xf32>
    %cst_232 = arith.constant 5.000000e-01 : f32
    %581 = vector.broadcast %cst_232 : f32 to vector<8x128xf32>
    %582 = arith.addf %580, %581 : vector<8x128xf32>
    %583 = arith.mulf %572, %544 : vector<8x128xf32>
    %584 = arith.mulf %564, %574 : vector<8x128xf32>
    %585 = arith.addf %583, %584 : vector<8x128xf32>
    %586 = math.tanh %585 : vector<8x128xf32>
    %587 = arith.mulf %582, %586 : vector<8x128xf32>
    %588 = arith.index_cast %550 : i32 to index
    %c0_233 = arith.constant 0 : index
    %589 = vector.load %arg13[%588, %c0_233] : memref<64x128xf32, #tpu.memory_space<vmem>>, vector<8x128xf32>
    tpu.vector_store %arg13[%588, %c0_233], %587 {strides = array<i32>} : memref<64x128xf32, #tpu.memory_space<vmem>>, vector<8x128xf32>,
    %c6_i32_234 = arith.constant 6 : i32
    %c8_i32_235 = arith.constant 8 : i32
    %590 = arith.muli %c6_i32_234, %c8_i32_235 : i32
    %591 = tpu.assume_multiple %590, 8 : i32
    %592 = arith.index_cast %591 : i32 to index
    %c0_236 = arith.constant 0 : index
    %593 = vector.load %arg12[%592, %c0_236] : memref<64x512xf32, #tpu.memory_space<vmem>>, vector<8x512xf32>
    %594 = vector.extract_strided_slice %587 {offsets = [0, 0], sizes = [8, 64], strides = [1, 1]} : vector<8x128xf32> to vector<8x64xf32>
    %c0_237 = arith.constant 0 : index
    %c0_238 = arith.constant 0 : index
    %595 = vector.load %arg16[%c0_237, %c0_238] : memref<64x512xf32, #tpu.memory_space<vmem>>, vector<64x512xf32>
    %cst_239 = arith.constant dense<0.000000e+00> : vector<8x512xf32>
    %596 = tpu.matmul %594, %595, %cst_239 {dimension_numbers = #tpu.dot_dimension_numbers<[1], [0], [0], [1], [0, 0, 1, 1], [], []>} : vector<8x64xf32>, vector<64x512xf32>, vector<8x512xf32> -> vector<8x512xf32>
    %597 = arith.addf %593, %596 : vector<8x512xf32>
    %598 = vector.extract_strided_slice %597 {offsets = [0, 0], sizes = [8, 128], strides = [1, 1]} : vector<8x512xf32> to vector<8x128xf32>
    %cst_240 = arith.constant 5.000000e-01 : f32
    %599 = vector.broadcast %cst_240 : f32 to vector<8x128xf32>
    %600 = arith.mulf %599, %598 : vector<8x128xf32>
    %601 = math.tanh %600 : vector<8x128xf32>
    %cst_241 = arith.constant 5.000000e-01 : f32
    %602 = vector.broadcast %cst_241 : f32 to vector<8x128xf32>
    %603 = arith.mulf %602, %601 : vector<8x128xf32>
    %cst_242 = arith.constant 5.000000e-01 : f32
    %604 = vector.broadcast %cst_242 : f32 to vector<8x128xf32>
    %605 = arith.addf %603, %604 : vector<8x128xf32>
    %606 = vector.extract_strided_slice %597 {offsets = [0, 128], sizes = [8, 128], strides = [1, 1]} : vector<8x512xf32> to vector<8x128xf32>
    %cst_243 = arith.constant 5.000000e-01 : f32
    %607 = vector.broadcast %cst_243 : f32 to vector<8x128xf32>
    %608 = arith.mulf %607, %606 : vector<8x128xf32>
    %609 = math.tanh %608 : vector<8x128xf32>
    %cst_244 = arith.constant 5.000000e-01 : f32
    %610 = vector.broadcast %cst_244 : f32 to vector<8x128xf32>
    %611 = arith.mulf %610, %609 : vector<8x128xf32>
    %cst_245 = arith.constant 5.000000e-01 : f32
    %612 = vector.broadcast %cst_245 : f32 to vector<8x128xf32>
    %613 = arith.addf %611, %612 : vector<8x128xf32>
    %614 = vector.extract_strided_slice %597 {offsets = [0, 256], sizes = [8, 128], strides = [1, 1]} : vector<8x512xf32> to vector<8x128xf32>
    %615 = math.tanh %614 : vector<8x128xf32>
    %616 = vector.extract_strided_slice %597 {offsets = [0, 384], sizes = [8, 128], strides = [1, 1]} : vector<8x512xf32> to vector<8x128xf32>
    %cst_246 = arith.constant 5.000000e-01 : f32
    %617 = vector.broadcast %cst_246 : f32 to vector<8x128xf32>
    %618 = arith.mulf %617, %616 : vector<8x128xf32>
    %619 = math.tanh %618 : vector<8x128xf32>
    %cst_247 = arith.constant 5.000000e-01 : f32
    %620 = vector.broadcast %cst_247 : f32 to vector<8x128xf32>
    %621 = arith.mulf %620, %619 : vector<8x128xf32>
    %cst_248 = arith.constant 5.000000e-01 : f32
    %622 = vector.broadcast %cst_248 : f32 to vector<8x128xf32>
    %623 = arith.addf %621, %622 : vector<8x128xf32>
    %624 = arith.mulf %613, %585 : vector<8x128xf32>
    %625 = arith.mulf %605, %615 : vector<8x128xf32>
    %626 = arith.addf %624, %625 : vector<8x128xf32>
    %627 = math.tanh %626 : vector<8x128xf32>
    %628 = arith.mulf %623, %627 : vector<8x128xf32>
    %629 = arith.index_cast %591 : i32 to index
    %c0_249 = arith.constant 0 : index
    %630 = vector.load %arg13[%629, %c0_249] : memref<64x128xf32, #tpu.memory_space<vmem>>, vector<8x128xf32>
    tpu.vector_store %arg13[%629, %c0_249], %628 {strides = array<i32>} : memref<64x128xf32, #tpu.memory_space<vmem>>, vector<8x128xf32>,
    %c7_i32_250 = arith.constant 7 : i32
    %c8_i32_251 = arith.constant 8 : i32
    %631 = arith.muli %c7_i32_250, %c8_i32_251 : i32
    %632 = tpu.assume_multiple %631, 8 : i32
    %633 = arith.index_cast %632 : i32 to index
    %c0_252 = arith.constant 0 : index
    %634 = vector.load %arg12[%633, %c0_252] : memref<64x512xf32, #tpu.memory_space<vmem>>, vector<8x512xf32>
    %635 = vector.extract_strided_slice %628 {offsets = [0, 0], sizes = [8, 64], strides = [1, 1]} : vector<8x128xf32> to vector<8x64xf32>
    %c0_253 = arith.constant 0 : index
    %c0_254 = arith.constant 0 : index
    %636 = vector.load %arg16[%c0_253, %c0_254] : memref<64x512xf32, #tpu.memory_space<vmem>>, vector<64x512xf32>
    %cst_255 = arith.constant dense<0.000000e+00> : vector<8x512xf32>
    %637 = tpu.matmul %635, %636, %cst_255 {dimension_numbers = #tpu.dot_dimension_numbers<[1], [0], [0], [1], [0, 0, 1, 1], [], []>} : vector<8x64xf32>, vector<64x512xf32>, vector<8x512xf32> -> vector<8x512xf32>
    %638 = arith.addf %634, %637 : vector<8x512xf32>
    %639 = vector.extract_strided_slice %638 {offsets = [0, 0], sizes = [8, 128], strides = [1, 1]} : vector<8x512xf32> to vector<8x128xf32>
    %cst_256 = arith.constant 5.000000e-01 : f32
    %640 = vector.broadcast %cst_256 : f32 to vector<8x128xf32>
    %641 = arith.mulf %640, %639 : vector<8x128xf32>
    %642 = math.tanh %641 : vector<8x128xf32>
    %cst_257 = arith.constant 5.000000e-01 : f32
    %643 = vector.broadcast %cst_257 : f32 to vector<8x128xf32>
    %644 = arith.mulf %643, %642 : vector<8x128xf32>
    %cst_258 = arith.constant 5.000000e-01 : f32
    %645 = vector.broadcast %cst_258 : f32 to vector<8x128xf32>
    %646 = arith.addf %644, %645 : vector<8x128xf32>
    %647 = vector.extract_strided_slice %638 {offsets = [0, 128], sizes = [8, 128], strides = [1, 1]} : vector<8x512xf32> to vector<8x128xf32>
    %cst_259 = arith.constant 5.000000e-01 : f32
    %648 = vector.broadcast %cst_259 : f32 to vector<8x128xf32>
    %649 = arith.mulf %648, %647 : vector<8x128xf32>
    %650 = math.tanh %649 : vector<8x128xf32>
    %cst_260 = arith.constant 5.000000e-01 : f32
    %651 = vector.broadcast %cst_260 : f32 to vector<8x128xf32>
    %652 = arith.mulf %651, %650 : vector<8x128xf32>
    %cst_261 = arith.constant 5.000000e-01 : f32
    %653 = vector.broadcast %cst_261 : f32 to vector<8x128xf32>
    %654 = arith.addf %652, %653 : vector<8x128xf32>
    %655 = vector.extract_strided_slice %638 {offsets = [0, 256], sizes = [8, 128], strides = [1, 1]} : vector<8x512xf32> to vector<8x128xf32>
    %656 = math.tanh %655 : vector<8x128xf32>
    %657 = vector.extract_strided_slice %638 {offsets = [0, 384], sizes = [8, 128], strides = [1, 1]} : vector<8x512xf32> to vector<8x128xf32>
    %cst_262 = arith.constant 5.000000e-01 : f32
    %658 = vector.broadcast %cst_262 : f32 to vector<8x128xf32>
    %659 = arith.mulf %658, %657 : vector<8x128xf32>
    %660 = math.tanh %659 : vector<8x128xf32>
    %cst_263 = arith.constant 5.000000e-01 : f32
    %661 = vector.broadcast %cst_263 : f32 to vector<8x128xf32>
    %662 = arith.mulf %661, %660 : vector<8x128xf32>
    %cst_264 = arith.constant 5.000000e-01 : f32
    %663 = vector.broadcast %cst_264 : f32 to vector<8x128xf32>
    %664 = arith.addf %662, %663 : vector<8x128xf32>
    %665 = arith.mulf %654, %626 : vector<8x128xf32>
    %666 = arith.mulf %646, %656 : vector<8x128xf32>
    %667 = arith.addf %665, %666 : vector<8x128xf32>
    %668 = math.tanh %667 : vector<8x128xf32>
    %669 = arith.mulf %664, %668 : vector<8x128xf32>
    %670 = arith.index_cast %632 : i32 to index
    %c0_265 = arith.constant 0 : index
    %671 = vector.load %arg13[%670, %c0_265] : memref<64x128xf32, #tpu.memory_space<vmem>>, vector<8x128xf32>
    tpu.vector_store %arg13[%670, %c0_265], %669 {strides = array<i32>} : memref<64x128xf32, #tpu.memory_space<vmem>>, vector<8x128xf32>,
    %c8_i32_266 = arith.constant 8 : i32
    %c0_267 = arith.constant 0 : index
    %c0_268 = arith.constant 0 : index
    %672 = vector.load %arg13[%c0_267, %c0_268] : memref<64x128xf32, #tpu.memory_space<vmem>>, vector<64x128xf32>
    %c0_269 = arith.constant 0 : index
    %c0_270 = arith.constant 0 : index
    %673 = vector.load %arg8[%c0_269, %c0_270] : memref<128x128xf32, #tpu.memory_space<vmem>>, vector<128x128xf32>
    %cst_271 = arith.constant dense<0.000000e+00> : vector<64x128xf32>
    %674 = tpu.matmul %672, %673, %cst_271 {dimension_numbers = #tpu.dot_dimension_numbers<[1], [0], [0], [1], [0, 0, 1, 1], [], []>} : vector<64x128xf32>, vector<128x128xf32>, vector<64x128xf32> -> vector<64x128xf32>
    %c0_272 = arith.constant 0 : index
    %c0_273 = arith.constant 0 : index
    %675 = vector.load %arg9[%c0_272, %c0_273] : memref<1x128xf32, #tpu.memory_space<vmem>>, vector<1x128xf32>
    %676 = vector.broadcast %675 : vector<1x128xf32> to vector<64x128xf32>
    %677 = arith.addf %674, %676 : vector<64x128xf32>
    %c0_274 = arith.constant 0 : index
    %c0_275 = arith.constant 0 : index
    %678 = vector.load %arg10[%c0_274, %c0_275] : memref<64x128xf32, #tpu.memory_space<vmem>>, vector<64x128xf32>
    tpu.vector_store %arg10[%c0_274, %c0_275], %677 {strides = array<i32>} : memref<64x128xf32, #tpu.memory_space<vmem>>, vector<64x128xf32>,
    return
  }
}

</mosaic_0001>

<bundles_post_ra>
// kernel: tpu_custom_call.1
= control target key start
LH: loop header
LB: loop body
LE: loop exit
PB: predicated region body
PF: predicated region fallthrough
CT: control target
= control target key end

     0   :  { %15 = vsyncpa [#allocation11], 0  ;;  %s4714_s0 = inlined_call_operand.vmem [shape: f32[64,8], index: 0, kind: input, shape index: {}]   ;;  %s4715_s1 = inlined_call_operand.vmem [shape: f32[64,8], index: 1, kind: input, shape index: {}]   ;;  %s4716_s2 = inlined_call_operand.hbm [shape: f32[8,512], index: 2, kind: input, shape index: {}]   ;;  %s4717_s3 = inlined_call_operand.hbm [shape: f32[64,512], index: 3, kind: input, shape index: {}]   ;;  %s4718_s4 = inlined_call_operand.vmem [shape: f32[1,512], index: 4, kind: input, shape index: {}]   ;;  %s4719_s5 = inlined_call_operand.hbm [shape: f32[8,512], index: 5, kind: input, shape index: {}]   ;;  %s4720_s6 = inlined_call_operand.hbm [shape: f32[64,512], index: 6, kind: input, shape index: {}]   ;;  %s4721_s7 = inlined_call_operand.vmem [shape: f32[1,512], index: 7, kind: input, shape index: {}]   ;;  %s4722_s8 = inlined_call_operand.vmem [shape: f32[128,128], index: 8, kind: input, shape index: {}]   ;;  %s4723_s9 = inlined_call_operand.vmem [shape: f32[1,128], index: 9, kind: input, shape index: {}]   ;;  %s4724_s10 = inlined_call_operand.hbm [shape: f32[64,128], index: 10, kind: output, shape index: {}]  }
   0x1   :  { %16 = vsyncpa [#allocation14], 0 }
   0x2   :  { %17 = vsyncpa [#allocation12], 0  ;;  %s25_s15 = sshll.u32 %s4716_s2, 4  ;;  %s3337_s16 = smov [#allocation10]   ;;  %s26_s15 = int_to_ptr.hbm [resolvable:$true] %s25_s15 }
   0x3   :  { %s27_s17 = sshll.u32 %s3337_s16, 4  ;;  %s35_s20 = sshll.u32 %s4717_s3, 4  ;;  %s28_s17 = int_to_ptr.vmem [resolvable:$true] %s27_s17  ;;  %s36_s20 = int_to_ptr.hbm [resolvable:$true] %s35_s20 }
   0x4   :  { %30 = dma.hbm_to_vmem [thread:$0]  %s26_s15, 512, %s28_s17, [#allocation11]  }
   0x5   :  { %s3338_s21 = smov [#allocation13]   ;;  %s3339_s23 = smov 512  }
   0x6   :  { %s37_s22 = sshll.u32 %s3338_s21, 4  ;;  %s3340_s24 = smov 32   ;;  %s38_s22 = int_to_ptr.vmem [resolvable:$true] %s37_s22 }
   0x7   :  { %43 = dma.hbm_to_vmem [thread:$0]  %s36_s20, 4096, %s38_s22, [#allocation14], %s3339_s23, %s3339_s23, %s3340_s24  }
   0x8   :  { %3323 = dma.done.wait [#allocation11], 512  }
   0x9   :  { %3324 = vsyncadd [#allocation11], 4294966784 }
   0xa   :  { %3325 = dma.done.wait [#allocation14], 4096  }
   0xb   :  { %3326 = vsyncadd [#allocation14], 4294963200  ;;  %v3411_v0 = vld [vmem:[%s4715_s1] sm:$0xff]  ;;  %v3416_v1 = vld [vmem:[%s4715_s1 + $0x8] sm:$0xff] }
   0xc   :  { %4733 = vst [vmem:[#allocation31_spill] sm:$0xff] %v3411_v0  ;;  %v3421_v2 = vld [vmem:[%s4715_s1 + $0x10] sm:$0xff]  ;;  %v3426_v3 = vld [vmem:[%s4715_s1 + $0x18] sm:$0xff]  ;;  %v3431_v4 = vld [vmem:[%s4715_s1 + $0x20] sm:$0xff] }
   0xd   :  { %4734 = vst [vmem:[#allocation32_spill] sm:$0xff] %v3416_v1  ;;  %v3436_v5 = vld [vmem:[%s4715_s1 + $0x28] sm:$0xff]  ;;  %v3441_v6 = vld [vmem:[%s4715_s1 + $0x30] sm:$0xff]  ;;  %v3446_v7 = vld [vmem:[%s4715_s1 + $0x38] sm:$0xff] }
   0xe   :  { %4735 = vst [vmem:[#allocation33_spill] sm:$0xff] %v3421_v2 }
   0xf   :  { %4736 = vst [vmem:[#allocation34_spill] sm:$0xff] %v3426_v3 }
  0x10   :  { %4737 = vst [vmem:[#allocation35_spill] sm:$0xff] %v3431_v4 }
  0x11   :  { %4738 = vst [vmem:[#allocation36_spill] sm:$0xff] %v3436_v5 }
  0x12   :  { %4739 = vst [vmem:[#allocation37_spill] sm:$0xff] %v3441_v6 }
  0x13   :  { %4740 = vst [vmem:[#allocation38_spill] sm:$0xff] %v3446_v7 }
  0x14   :  { %89 = vsyncadd [#allocation9], 1024  ;;  %s98_s21 = sshll.u32 %s4719_s5, 4  ;;  %v133_v8 = vld [vmem:[%s4721_s7] sm:$0xf]  ;;  %s3341_s24 = smov [#allocation6]   ;;  %s99_s21 = int_to_ptr.hbm [resolvable:$true] %s98_s21 }
  0x15   :  { %s100_s2 = sshll.u32 %s3341_s24, 4  ;;  %134 = vst [vmem:[#allocation8] sm:$0xf] %v133_v8  ;;  %s112_s27 = sshll.u32 %s4720_s6, 4  ;;  %v161_v9 = vld [vmem:[#allocation10] sm:$0xff]  ;;  %v164_v10 = vld [vmem:[#allocation10 + $0x18] sm:$0xff]  ;;  %s101_s2 = int_to_ptr.vmem [resolvable:$true] %s100_s2  ;;  %s113_s27 = int_to_ptr.hbm [resolvable:$true] %s112_s27 }
  0x16   :  { %103 = dma.hbm_to_vmem [thread:$0]  %s99_s21, 512, %s101_s2, [#allocation9 + $0x1]  ;;  %v3460_v11 = vld [vmem:[%s4714_s0 + $0x10] sm:$0xff]  ;;  %vm175_vm0 = vcmask 64512   ;;  %3014 = vmatpush.msra.mxu1 %v161_v9  ;;  %3015 = vmatpush.msra.mxu2 %v161_v9  ;;  %v3465_v12 = vld [vmem:[%s4714_s0 + $0x28] sm:$0xff]  ;;  %v153_v15 = vld [vmem:[%s4714_s0] sm:$0xff] }
  0x17   :  { %s3342_s1 = smov [#allocation7]   ;;  %v162_v13 = vld [vmem:[#allocation10 + $0x8] sm:$0xff]  ;;  %v163_v14 = vld [vmem:[#allocation10 + $0x10] sm:$0xff]  ;;  %338 = vmatpush.msra.mxu3 %v164_v10  ;;  %2888 = vmatmul.msk.f32.vlgmr.msra.gmra.mxu1 %vm175_vm0, %v3460_v11  ;;  %v3475_v16 = vld [vmem:[#allocation13 + $0xe0] sm:$0xff] }
  0x18   :  { %s114_s3 = sshll.u32 %s3342_s1, 4  ;;  %2891 = vmatmul.msk.f32.vlgmr.msra.gmra.mxu2 %vm175_vm0, %v3465_v12  ;;  %256 = vmatpush.msrb.mxu1 %v162_v13  ;;  %v3477_v17 = vld [vmem:[#allocation13 + $0xe8] sm:$0xff]  ;;  %v3479_v18 = vld [vmem:[#allocation13 + $0xf0] sm:$0xff]  ;;  %v3483_v19 = vld [vmem:[#allocation13 + $0xc0] sm:$0xff]  ;;  %s115_s3 = int_to_ptr.vmem [resolvable:$true] %s114_s3 }
  0x19   :  { %117 = dma.hbm_to_vmem [thread:$0]  %s113_s27, 4096, %s115_s3, [#allocation9 + $0x2]  ;;  %297 = vmatpush.msrb.mxu2 %v163_v14  ;;  %2910 = vmatmul.msk.f32.vlgmr.msra.gmra.mxu3 %vm175_vm0, %v153_v15  ;;  %v3485_v20 = vld [vmem:[#allocation13 + $0xc8] sm:$0xff]  ;;  %v3487_v21 = vld [vmem:[#allocation13 + $0xd0] sm:$0xff]  ;;  %v3490_v22 = vld [vmem:[#allocation13 + $0xa0] sm:$0xff] }
  0x1a   :  { %447 = vmatpush.msrb.mxu3 %v3475_v16  ;;  %467 = vmatpush.msra.mxu1 %v3477_v17 }
  0x1b   :  { %487 = vmatpush.msra.mxu2 %v3479_v18 }
  0x1c   :  { %152 = vsyncadd [#allocation9 + $0x3], 64  ;;  %215 = vmatpush.msra.mxu0 %v161_v9  ;;  %v3495_v23 = vld [vmem:[%s4714_s0 + $0x18] sm:$0xff]  ;;  %448 = vmatpush.msrb.mxu3 %v3483_v19  ;;  %v3502_v24 = vld [vmem:[%s4714_s0 + $0x30] sm:$0xff]  ;;  %v3343_v53 = vmov 0.0   ;;  %vm435_vm1 = vcmask 523264  }
  0x1d   :  { %468 = vmatpush.msra.mxu1 %v3485_v20  ;;  %488 = vmatpush.msra.mxu2 %v3487_v21  ;;  %v154_v25 = vld [vmem:[%s4714_s0 + $0x8] sm:$0xff]  ;;  %v3519_v27 = vld [vmem:[#allocation13 + $0xb0] sm:$0xff]  ;;  %v3530_v29 = vld [vmem:[%s4714_s0 + $0x20] sm:$0xff] }
  0x1e   :  { %2886 = vmatmul.msk.f32.vlgmr.msra.gmra.mxu0 %vm175_vm0, %v153_v15  ;;  %449 = vmatpush.msrb.mxu3 %v3490_v22  ;;  %v3517_v26 = vld [vmem:[#allocation13 + $0xa8] sm:$0xff]  ;;  %v3521_v28 = vld [vmem:[#allocation13 + $0x80] sm:$0xff]  ;;  %v3535_v30 = vld [vmem:[%s4714_s0 + $0x38] sm:$0xff] }
  0x1f   :  { %559 = vmatpush.msrb.mxu0 %v3475_v16  ;;  %2889 = vmatmul.msk.f32.gmra.mxu1 %vm175_vm0, %v3495_v23  ;;  %v3545_v31 = vld [vmem:[#allocation13 + $0x88] sm:$0xff]  ;;  %v3547_v32 = vld [vmem:[#allocation13 + $0x90] sm:$0xff]  ;;  %v3549_v33 = vld [vmem:[#allocation13 + $0x60] sm:$0xff] }
  0x20   :  { %2892 = vmatmul.msk.f32.gmra.mxu2 %vm175_vm0, %v3502_v24  ;;  %469 = vmatpush.msra.mxu1 %v3517_v26  ;;  %v3553_v34 = vld [vmem:[#allocation13 + $0x40] sm:$0xff]  ;;  %v3569_v37 = vld [vmem:[#allocation13 + $0x68] sm:$0xff]  ;;  %v3571_v38 = vld [vmem:[#allocation13 + $0x70] sm:$0xff] }
  0x21   :  { %560 = vmatpush.msrb.mxu0 %v3483_v19  ;;  %2911 = vmatmul.msk.f32.gmra.mxu3 %vm175_vm0, %v154_v25  ;;  %v3557_v35 = vld [vmem:[#allocation13 + $0x20] sm:$0xff]  ;;  %v3573_v39 = vld [vmem:[#allocation13 + $0xf8] sm:$0xff]  ;;  %v3594_v43 = vld [vmem:[#allocation13 + $0x48] sm:$0xff] }
  0x22   :  { %489 = vmatpush.msra.mxu2 %v3519_v27  ;;  %450 = vmatpush.msrb.mxu3 %v3521_v28  ;;  %v3564_v36 = vld [vmem:[#allocation13] sm:$0xff]  ;;  %v3577_v40 = vld [vmem:[#allocation13 + $0xd8] sm:$0xff]  ;;  %v3596_v44 = vld [vmem:[#allocation13 + $0x50] sm:$0xff] }
  0x23   :  { %561 = vmatpush.msrb.mxu0 %v3490_v22  ;;  %470 = vmatpush.msra.mxu1 %v3545_v31  ;;  %v3581_v41 = vld [vmem:[#allocation13 + $0xb8] sm:$0xff]  ;;  %v3619_v49 = vld [vmem:[#allocation13 + $0x28] sm:$0xff]  ;;  %v3621_v50 = vld [vmem:[#allocation13 + $0x30] sm:$0xff] }
  0x24   :  { %490 = vmatpush.msra.mxu2 %v3547_v32  ;;  %451 = vmatpush.msrb.mxu3 %v3549_v33  ;;  %v3588_v42 = vld [vmem:[#allocation13 + $0x98] sm:$0xff]  ;;  %v3635_v51 = vld [vmem:[#allocation13 + $0x8] sm:$0xff]  ;;  %v3637_v52 = vld [vmem:[#allocation13 + $0x10] sm:$0xff] }
  0x25   :  { %562 = vmatpush.msrb.mxu0 %v3521_v28  ;;  %471 = vmatpush.msra.mxu1 %v3569_v37  ;;  %v3598_v45 = vld [vmem:[#allocation13 + $0x78] sm:$0xff] }
  0x26   :  { %2887 = vmatmul.msk.f32.gmra.mxu0 %vm175_vm0, %v154_v25  ;;  %452 = vmatpush.msrb.mxu3 %v3553_v34  ;;  %v3603_v46 = vld [vmem:[#allocation13 + $0x58] sm:$0xff] }
  0x27   :  { %2890 = vmatmul.msk.f32.gmra.mxu1 %vm175_vm0, %v3530_v29  ;;  %563 = vmatpush.msrb.mxu0 %v3549_v33  ;;  %v3607_v47 = vld [vmem:[#allocation13 + $0x38] sm:$0xff] }
  0x28   :  { %2893 = vmatmul.msk.f32.gmra.mxu2 %vm175_vm0, %v3535_v30  ;;  %453 = vmatpush.msrb.mxu3 %v3557_v35  ;;  %v3613_v48 = vld [vmem:[#allocation13 + $0x18] sm:$0xff] }
  0x29   :  { %2912 = vmatmul.msk.f32.gmra.mxu3 %vm175_vm0, %v3460_v11  ;;  %564 = vmatpush.msrb.mxu0 %v3553_v34  ;;  %v165_v58 = vld [vmem:[%s4718_s4] sm:$0xf] }
  0x2a   :  { %454 = vmatpush.msrb.mxu3 %v3564_v36  ;;  %491 = vmatpush.msra.mxu2 %v3571_v38  ;;  %v170_v59 = vperm.slane %v165_v58, 3 }
  0x2b   :  { %565 = vmatpush.msrb.mxu0 %v3557_v35  ;;  %472 = vmatpush.msra.mxu1 %v3594_v43 }
  0x2c   :  { %507 = vmatpush.msra.mxu3 %v3573_v39  ;;  %492 = vmatpush.msra.mxu2 %v3596_v44 }
  0x2d   :  { %566 = vmatpush.msrb.mxu0 %v3564_v36  ;;  %473 = vmatpush.msra.mxu1 %v3619_v49 }
  0x2e   :  { %508 = vmatpush.msra.mxu3 %v3577_v40  ;;  %493 = vmatpush.msra.mxu2 %v3621_v50 }
  0x2f   :  { %2894 = vmatmul.msk.f32.vlgmr.msrb.gmra.mxu1 %vm175_vm0, %v153_v15  ;;  %671 = vmatpush.msra.mxu0 %v3475_v16 }
  0x30   :  { %2902 = vmatmul.msk.f32.vlgmr.msrb.gmra.mxu2 %vm175_vm0, %v153_v15  ;;  %509 = vmatpush.msra.mxu3 %v3581_v41 }
  0x31   :  { %2913 = vmatmul.msk.f32.gmra.mxu3 %vm175_vm0, %v3495_v23  ;;  %672 = vmatpush.msra.mxu0 %v3483_v19 }
  0x32   :  { %510 = vmatpush.msra.mxu3 %v3588_v42  ;;  %474 = vmatpush.msra.mxu1 %v3635_v51 }
  0x33   :  { %673 = vmatpush.msra.mxu0 %v3490_v22  ;;  %494 = vmatpush.msra.mxu2 %v3637_v52 }
  0x34   :  { %511 = vmatpush.msra.mxu3 %v3598_v45  ;;  %579 = vmatpush.msrb.mxu1 %v3477_v17 }
  0x35   :  { %674 = vmatpush.msra.mxu0 %v3521_v28  ;;  %599 = vmatpush.msrb.mxu2 %v3479_v18 }
  0x36   :  { %512 = vmatpush.msra.mxu3 %v3603_v46  ;;  %580 = vmatpush.msrb.mxu1 %v3485_v20 }
  0x37   :  { %2895 = vmatmul.msk.f32.gmra.mxu1 %vm175_vm0, %v154_v25  ;;  %675 = vmatpush.msra.mxu0 %v3549_v33 }
  0x38   :  { %2903 = vmatmul.msk.f32.gmra.mxu2 %vm175_vm0, %v154_v25  ;;  %513 = vmatpush.msra.mxu3 %v3607_v47  ;;  %v169_v25 = vperm.slane %v165_v58, 2 }
  0x39   :  { %2914 = vmatmul.msk.f32.gmra.mxu3 %vm175_vm0, %v3530_v29  ;;  %676 = vmatpush.msra.mxu0 %v3553_v34 }
  0x3a   :  { %514 = vmatpush.msra.mxu3 %v3613_v48  ;;  %600 = vmatpush.msrb.mxu2 %v3487_v21 }
  0x3b   :  { %677 = vmatpush.msra.mxu0 %v3557_v35  ;;  %581 = vmatpush.msrb.mxu1 %v3517_v26 }
  0x3c   :  { %601 = vmatpush.msrb.mxu2 %v3519_v27 }
  0x3d   :  { %678 = vmatpush.msra.mxu0 %v3564_v36  ;;  %582 = vmatpush.msrb.mxu1 %v3545_v31 }
  0x3e   :  { %602 = vmatpush.msrb.mxu2 %v3547_v32 }
  0x3f   :  { %2896 = vmatmul.msk.f32.gmra.mxu1 %vm175_vm0, %v3460_v11 }
  0x40   :  { %2904 = vmatmul.msk.f32.gmra.mxu2 %vm175_vm0, %v3460_v11  ;;  %583 = vmatpush.msrb.mxu1 %v3569_v37 }
  0x41   :  { %2915 = vmatmul.msk.f32.gmra.mxu3 %vm175_vm0, %v3465_v12  ;;  %603 = vmatpush.msrb.mxu2 %v3571_v38 }
  0x42   :  { %584 = vmatpush.msrb.mxu1 %v3594_v43 }
  0x43   :  { %604 = vmatpush.msrb.mxu2 %v3596_v44 }
  0x44   :  { %585 = vmatpush.msrb.mxu1 %v3619_v49 }
  0x45   :  { %605 = vmatpush.msrb.mxu2 %v3621_v50 }
  0x46   :  { %586 = vmatpush.msrb.mxu1 %v3635_v51 }
  0x47   :  { %2897 = vmatmul.msk.f32.gmra.mxu1 %vm175_vm0, %v3495_v23  ;;  %606 = vmatpush.msrb.mxu2 %v3637_v52 }
  0x48   :  { %2905 = vmatmul.msk.f32.gmra.mxu2 %vm175_vm0, %v3495_v23 }
  0x49   :  { %2916 = vmatmul.msk.f32.gmra.mxu3 %vm175_vm0, %v3502_v24 }
  0x4f   :  { %2898 = vmatmul.msk.f32.gmra.mxu1 %vm175_vm0, %v3530_v29 }
  0x50   :  { %2906 = vmatmul.msk.f32.gmra.mxu2 %vm175_vm0, %v3530_v29 }
  0x51   :  { %2917 = vmatmul.msk.f32.gmra.mxu3 %vm175_vm0, %v3535_v30 }
  0x57   :  { %2899 = vmatmul.msk.f32.gmra.mxu1 %vm175_vm0, %v3465_v12 }
  0x58   :  { %2907 = vmatmul.msk.f32.gmra.mxu2 %vm175_vm0, %v3465_v12  ;;  %v168_v12 = vperm.slane %v165_v58, 1 }
  0x59   :  { %455 = vmatmul.f32.vlgmr.msrb.gmra.mxu3 %v3343_v53 }
  0x5a   :  { %619 = vmatpush.msrb.mxu3 %v3573_v39 }
  0x5c   :  { %620 = vmatpush.msrb.mxu3 %v3577_v40 }
  0x5e   :  { %621 = vmatpush.msrb.mxu3 %v3581_v41 }
  0x5f   :  { %2900 = vmatmul.msk.f32.gmra.mxu1 %vm175_vm0, %v3502_v24 }
  0x60   :  { %2908 = vmatmul.msk.f32.gmra.mxu2 %vm175_vm0, %v3502_v24  ;;  %622 = vmatpush.msrb.mxu3 %v3588_v42 }
  0x61   :  { %515 = vmatmul.f32.vlgmr.msra.gmra.mxu3 %v3343_v53 }
  0x62   :  { %623 = vmatpush.msrb.mxu3 %v3598_v45 }
  0x64   :  { %624 = vmatpush.msrb.mxu3 %v3603_v46 }
  0x66   :  { %625 = vmatpush.msrb.mxu3 %v3607_v47 }
  0x67   :  { %2901 = vmatmul.msk.f32.gmra.mxu1 %vm175_vm0, %v3535_v30 }
  0x68   :  { %2909 = vmatmul.msk.f32.gmra.mxu2 %vm175_vm0, %v3535_v30  ;;  %626 = vmatpush.msrb.mxu3 %v3613_v48 }
  0x6a   :  { %731 = vmatpush.msra.mxu3 %v3573_v39 }
  0x6c   :  { %732 = vmatpush.msra.mxu3 %v3577_v40 }
  0x6e   :  { %733 = vmatpush.msra.mxu3 %v3581_v41 }
  0x6f   :  { %475 = vmatmul.f32.vlgmr.msra.gmra.mxu1 %v3343_v53 }
  0x70   :  { %734 = vmatpush.msra.mxu3 %v3588_v42  ;;  %495 = vmatmul.f32.vlgmr.msra.gmra.mxu2 %v3343_v53 }
  0x71   :  { %691 = vmatpush.msra.mxu1 %v3477_v17  ;;  %711 = vmatpush.msra.mxu2 %v3479_v18 }
  0x72   :  { %735 = vmatpush.msra.mxu3 %v3598_v45 }
  0x73   :  { %692 = vmatpush.msra.mxu1 %v3485_v20  ;;  %712 = vmatpush.msra.mxu2 %v3487_v21 }
  0x74   :  { %736 = vmatpush.msra.mxu3 %v3603_v46 }
  0x75   :  { %693 = vmatpush.msra.mxu1 %v3517_v26  ;;  %713 = vmatpush.msra.mxu2 %v3519_v27 }
  0x76   :  { %737 = vmatpush.msra.mxu3 %v3607_v47 }
  0x77   :  { %694 = vmatpush.msra.mxu1 %v3545_v31  ;;  %714 = vmatpush.msra.mxu2 %v3547_v32 }
  0x78   :  { %738 = vmatpush.msra.mxu3 %v3613_v48 }
  0x79   :  { %695 = vmatpush.msra.mxu1 %v3569_v37  ;;  %715 = vmatpush.msra.mxu2 %v3571_v38 }
  0x7b   :  { %696 = vmatpush.msra.mxu1 %v3594_v43  ;;  %716 = vmatpush.msra.mxu2 %v3596_v44 }
  0x7d   :  { %697 = vmatpush.msra.mxu1 %v3619_v49  ;;  %717 = vmatpush.msra.mxu2 %v3621_v50 }
  0x7f   :  { %698 = vmatpush.msra.mxu1 %v3635_v51  ;;  %718 = vmatpush.msra.mxu2 %v3637_v52 }
  0x94   :  { %v3709_v54 = vpop.f32.mrf.mxu1 }
  0x9b   :  { %v3711_v55 = vpop.f32.mrf.mxu2 }
  0x9c   :  { %4741 = vst [vmem:[#allocation39_spill] sm:$0xff] %v3711_v55  ;;  %v3713_v56 = vpop.f32.mrf.mxu3  ;;  %v3715_v57 = vpop.f32.mrf.mxu1 }
  0x9d   :  { %4742 = vst [vmem:[#allocation40_spill] sm:$0xff] %v3715_v57 }
  0xa3   :  { %v3720_v60 = vpop.f32.mrf.mxu2 }
  0xa4   :  { %4743 = vst [vmem:[#allocation41_spill] sm:$0xff] %v3720_v60  ;;  %v343_v61 = vpop.f32.mrf.mxu3  ;;  %v3722_v62 = vpop.f32.mrf.mxu1 }
  0xa5   :  { %4744 = vst [vmem:[#allocation42_spill] sm:$0xff] %v3722_v62  ;;  %v3724_v63 = vadd.f32 %v343_v61, %v170_v59 }
  0xab   :  { %v3726_v8 = vpop.f32.mrf.mxu2 }
  0xac   :  { %4745 = vst [vmem:[#allocation43_spill] sm:$0xff] %v3726_v8  ;;  %v346_v9 = vpop.f32.mrf.mxu3  ;;  %v258_v10 = vpop.f32.mrf.mxu1 }
  0xad   :  { %v3728_v11 = vadd.f32 %v346_v9, %v170_v59 }
  0xb3   :  { %v299_v13 = vpop.f32.mrf.mxu2 }
  0xb4   :  { %v349_v14 = vpop.f32.mrf.mxu3  ;;  %v261_v15 = vpop.f32.mrf.mxu1 }
  0xb5   :  { %v3730_v23 = vadd.f32 %v349_v14, %v170_v59  ;;  %v3732_v24 = vadd.f32 %v261_v15, %v168_v12 }
  0xb7   :  { %4746 = vst [vmem:[#allocation44_spill] sm:$0xff] %v3730_v23  ;;  %v217_v23 = vpop.f32.mrf.mxu0 }
  0xbb   :  { %v302_v29 = vpop.f32.mrf.mxu2 }
  0xbc   :  { %v3734_v30 = vadd.f32 %v302_v29, %v169_v25  ;;  %v352_v53 = vpop.f32.mrf.mxu3  ;;  %v264_v61 = vpop.f32.mrf.mxu1 }
  0xbd   :  { %v3736_v7 = vadd.f32 %v352_v53, %v170_v59  ;;  %v3738_v6 = vadd.f32 %v264_v61, %v168_v12 }
  0xbf   :  { %4747 = vst [vmem:[#allocation45_spill] sm:$0xff] %v3736_v7 }
  0xc3   :  { %v305_v9 = vpop.f32.mrf.mxu2 }
  0xc4   :  { %v3740_v5 = vadd.f32 %v305_v9, %v169_v25  ;;  %v355_v4 = vpop.f32.mrf.mxu3  ;;  %v267_v3 = vpop.f32.mrf.mxu1 }
  0xc5   :  { %v3742_v2 = vadd.f32 %v355_v4, %v170_v59  ;;  %v3744_v14 = vadd.f32 %v267_v3, %v168_v12 }
  0xc7   :  { %4748 = vst [vmem:[#allocation46_spill] sm:$0xff] %v3742_v2 }
  0xc8   :  { %4749 = vst [vmem:[#allocation47_spill] sm:$0xff] %v3744_v14 }
  0xcb   :  { %v308_v15 = vpop.f32.mrf.mxu2 }
  0xcc   :  { %v3746_v1 = vadd.f32 %v308_v15, %v169_v25  ;;  %v358_v29 = vpop.f32.mrf.mxu3  ;;  %v270_v0 = vpop.f32.mrf.mxu1 }
  0xcd   :  { %v3748_v8 = vadd.f32 %v358_v29, %v170_v59  ;;  %v3750_v53 = vadd.f32 %v270_v0, %v168_v12  ;;  %v3762_v29 = vperm.slane %v165_v58, 0 }
  0xce   :  { %4750 = vst [vmem:[#allocation48_spill] sm:$0xff] %v3746_v1  ;;  %v341_v1 = vadd.f32 %v3713_v56, %v170_v59 }
  0xcf   :  { %4751 = vst [vmem:[#allocation49_spill] sm:$0xff] %v3748_v8  ;;  %v218_v0 = vadd.f32 %v217_v23, %v3762_v29 }
  0xd0   :  { %4752 = vst [vmem:[#allocation50_spill] sm:$0xff] %v3750_v53 }
  0xd3   :  { %v311_v61 = vpop.f32.mrf.mxu2 }
  0xd4   :  { %v3752_v60 = vadd.f32 %v311_v61, %v169_v25  ;;  %v361_v9 = vpop.f32.mrf.mxu3  ;;  %v273_v55 = vpop.f32.mrf.mxu1 }
  0xd5   :  { %v3754_v7 = vadd.f32 %v361_v9, %v170_v59  ;;  %v3756_v4 = vadd.f32 %v273_v55, %v168_v12 }
  0xd6   :  { %4753 = vst [vmem:[#allocation51_spill] sm:$0xff] %v3752_v60 }
  0xd7   :  { %4754 = vst [vmem:[#allocation52_spill] sm:$0xff] %v3754_v7 }
  0xd8   :  { %4755 = vst [vmem:[#allocation53_spill] sm:$0xff] %v3756_v4  ;;  %v259_v4 = vadd.f32 %v258_v10, %v168_v12 }
  0xdb   :  { %v314_v3 = vpop.f32.mrf.mxu2 }
  0xdc   :  { %v3758_v2 = vadd.f32 %v314_v3, %v169_v25  ;;  %v276_v15 = vpop.f32.mrf.mxu1  ;;  %v456_v8 = vpop.f32.mrf.mxu3 }
  0xdd   :  { %v3760_v62 = vadd.f32 %v276_v15, %v168_v12  ;;  %v519_v9 = vadd.f32 %v456_v8, %v218_v0 }
  0xde   :  { %4756 = vst [vmem:[#allocation54_spill] sm:$0xff] %v3758_v2 }
  0xdf   :  { %4757 = vst [vmem:[#allocation55_spill] sm:$0xff] %v3760_v62  ;;  %v523_v55 = vmul.f32 0.5, %v519_v9 }
  0xe1   :  { %3026 = vtanh.f32 %v523_v55 }
  0xe3   :  { %v317_v61 = vpop.f32.mrf.mxu2 }
  0xe4   :  { %v3765_v60 = vadd.f32 %v317_v61, %v169_v25  ;;  %v279_v53 = vpop.f32.mrf.mxu1  ;;  %v516_v58 = vpop.f32.mrf.mxu3 }
  0xe5   :  { %v3767_v7 = vadd.f32 %v279_v53, %v168_v12  ;;  %v522_v14 = vadd.f32 %v516_v58, %v341_v1 }
  0xe6   :  { %4758 = vst [vmem:[#allocation56_spill] sm:$0xff] %v3765_v60  ;;  %v300_v60 = vadd.f32 %v299_v13, %v169_v25 }
  0xe7   :  { %v3027_v61 = vpop.eup %3026  ;;  %v532_v53 = vmul.f32 0.5, %v522_v14 }
  0xe8   :  { %v525_v0 = vmul.f32 0.5, %v3027_v61 }
  0xea   :  { %v526_v9 = vadd.f32 0.5, %v525_v0 }
  0xeb   :  { %v320_v3 = vpop.f32.mrf.mxu2 }
  0xec   :  { %v3769_v2 = vadd.f32 %v320_v3, %v169_v25  ;;  %v476_v15 = vpop.f32.mrf.mxu1 }
  0xed   :  { %v520_v62 = vadd.f32 %v476_v15, %v259_v4 }
  0xee   :  { %4759 = vst [vmem:[#allocation57_spill] sm:$0xff] %v3769_v2 }
  0xef   :  { %v527_v23 = vmul.f32 0.5, %v520_v62 }
  0xf1   :  { %3028 = vtanh.f32 %v527_v23 }
  0xf3   :  { %v496_v57 = vpop.f32.mrf.mxu2 }
  0xf4   :  { %v521_v8 = vadd.f32 %v496_v57, %v300_v60 }
  0xf6   :  { %3030 = vtanh.f32 %v521_v8 }
  0xf7   :  { %v3029_v10 = vpop.eup %3028  ;;  %3032 = vtanh.f32 %v532_v53 }
  0xf8   :  { %v529_v12 = vmul.f32 0.5, %v3029_v10 }
  0xfa   :  { %v530_v55 = vadd.f32 0.5, %v529_v12 }
  0xfc   :  { %v3031_v3 = vpop.eup %3030  ;;  %v536_v4 = vmul.f32 0.0, %v530_v55 }
  0xfd   :  { %v537_v15 = vmul.f32 %v3031_v3, %v526_v9  ;;  %v3033_v2 = vpop.eup %3032 }
  0xfe   :  { %v534_v1 = vmul.f32 0.5, %v3033_v2  ;;  %v220_v2 = vpop.f32.mrf.mxu0 }
  0xff   :  { %v3772_v56 = vadd.f32 %v537_v15, %v536_v4  ;;  %v221_v60 = vadd.f32 %v220_v2, %v3762_v29 }
 0x100   :  { %v535_v59 = vadd.f32 0.5, %v534_v1 }
 0x101   :  { %3034 = vtanh.f32 %v3772_v56 }
 0x107   :  { %v3035_v62 = vpop.eup %3034 }
 0x108   :  { %v540_v57 = vmul.f32 %v3035_v62, %v535_v59 }
 0x10a   :  { %2918 = vmatmul.msk.f32.vlgmr.msrb.gmra.mxu0 %vm435_vm1, %v540_v57  ;;  %2919 = vmatmul.msk.f32.vlgmr.msrb.gmra.mxu1 %vm435_vm1, %v540_v57 }
 0x10b   :  { %2920 = vmatmul.msk.f32.vlgmr.msrb.gmra.mxu2 %vm435_vm1, %v540_v57  ;;  %2921 = vmatmul.msk.f32.vlgmr.msrb.gmra.mxu3 %vm435_vm1, %v540_v57 }
 0x10c   :  { %783 = vmatpush.msrb.mxu0 %v3475_v16  ;;  %803 = vmatpush.msrb.mxu1 %v3477_v17 }
 0x10d   :  { %823 = vmatpush.msrb.mxu2 %v3479_v18  ;;  %843 = vmatpush.msrb.mxu3 %v3573_v39 }
 0x10e   :  { %784 = vmatpush.msrb.mxu0 %v3483_v19  ;;  %804 = vmatpush.msrb.mxu1 %v3485_v20 }
 0x10f   :  { %824 = vmatpush.msrb.mxu2 %v3487_v21  ;;  %844 = vmatpush.msrb.mxu3 %v3577_v40 }
 0x110   :  { %785 = vmatpush.msrb.mxu0 %v3490_v22  ;;  %805 = vmatpush.msrb.mxu1 %v3517_v26 }
 0x111   :  { %825 = vmatpush.msrb.mxu2 %v3519_v27  ;;  %845 = vmatpush.msrb.mxu3 %v3581_v41 }
 0x112   :  { %786 = vmatpush.msrb.mxu0 %v3521_v28  ;;  %806 = vmatpush.msrb.mxu1 %v3545_v31 }
 0x113   :  { %826 = vmatpush.msrb.mxu2 %v3547_v32  ;;  %846 = vmatpush.msrb.mxu3 %v3588_v42 }
 0x114   :  { %787 = vmatpush.msrb.mxu0 %v3549_v33  ;;  %807 = vmatpush.msrb.mxu1 %v3569_v37 }
 0x115   :  { %827 = vmatpush.msrb.mxu2 %v3571_v38  ;;  %847 = vmatpush.msrb.mxu3 %v3598_v45 }
 0x116   :  { %788 = vmatpush.msrb.mxu0 %v3553_v34  ;;  %808 = vmatpush.msrb.mxu1 %v3594_v43 }
 0x117   :  { %828 = vmatpush.msrb.mxu2 %v3596_v44  ;;  %848 = vmatpush.msrb.mxu3 %v3603_v46 }
 0x118   :  { %789 = vmatpush.msrb.mxu0 %v3557_v35  ;;  %809 = vmatpush.msrb.mxu1 %v3619_v49 }
 0x119   :  { %829 = vmatpush.msrb.mxu2 %v3621_v50  ;;  %849 = vmatpush.msrb.mxu3 %v3607_v47 }
 0x11a   :  { %790 = vmatpush.msrb.mxu0 %v3564_v36  ;;  %810 = vmatpush.msrb.mxu1 %v3635_v51 }
 0x11b   :  { %830 = vmatpush.msrb.mxu2 %v3637_v52  ;;  %850 = vmatpush.msrb.mxu3 %v3613_v48 }
 0x187   :  { %v568_v13 = vpop.f32.mrf.mxu0  ;;  %v588_v25 = vpop.f32.mrf.mxu1 }
 0x188   :  { %v631_v14 = vadd.f32 %v568_v13, %v221_v60  ;;  %v632_v58 = vadd.f32 %v588_v25, %v3732_v24 }
 0x18a   :  { %v635_v23 = vmul.f32 0.5, %v631_v14  ;;  %v639_v61 = vmul.f32 0.5, %v632_v58 }
 0x18c   :  { %3036 = vtanh.f32 %v635_v23 }
 0x18d   :  { %3038 = vtanh.f32 %v639_v61 }
 0x18e   :  { %v608_v8 = vpop.f32.mrf.mxu2  ;;  %v628_v53 = vpop.f32.mrf.mxu3 }
 0x18f   :  { %v633_v0 = vadd.f32 %v608_v8, %v3734_v30  ;;  %v634_v10 = vadd.f32 %v628_v53, %v3724_v63 }
 0x191   :  { %3040 = vtanh.f32 %v633_v0  ;;  %v644_v12 = vmul.f32 0.5, %v634_v10 }
 0x192   :  { %v3037_v9 = vpop.eup %3036 }
 0x193   :  { %v3039_v55 = vpop.eup %3038  ;;  %v637_v3 = vmul.f32 0.5, %v3037_v9  ;;  %3042 = vtanh.f32 %v644_v12 }
 0x194   :  { %v641_v4 = vmul.f32 0.5, %v3039_v55 }
 0x195   :  { %v638_v15 = vadd.f32 0.5, %v637_v3 }
 0x196   :  { %v642_v1 = vadd.f32 0.5, %v641_v4 }
 0x197   :  { %v3041_v24 = vpop.eup %3040 }
 0x198   :  { %v648_v59 = vmul.f32 %v642_v1, %v3772_v56  ;;  %v649_v62 = vmul.f32 %v3041_v24, %v638_v15  ;;  %v224_v56 = vadd.f32 %v3709_v54, %v3762_v29 }
 0x199   :  { %v3043_v57 = vpop.eup %3042 }
 0x19a   :  { %v3816_v2 = vadd.f32 %v649_v62, %v648_v59  ;;  %v646_v30 = vmul.f32 0.5, %v3043_v57 }
 0x19c   :  { %3044 = vtanh.f32 %v3816_v2  ;;  %v647_v63 = vadd.f32 0.5, %v646_v30 }
 0x1a2   :  { %v3045_v60 = vpop.eup %3044 }
 0x1a3   :  { %v652_v13 = vmul.f32 %v3045_v60, %v647_v63 }
 0x1a5   :  { %2922 = vmatmul.msk.f32.vlgmr.msra.gmra.mxu0 %vm435_vm1, %v652_v13  ;;  %2923 = vmatmul.msk.f32.vlgmr.msra.gmra.mxu1 %vm435_vm1, %v652_v13 }
 0x1a6   :  { %2924 = vmatmul.msk.f32.vlgmr.msra.gmra.mxu2 %vm435_vm1, %v652_v13  ;;  %2925 = vmatmul.msk.f32.vlgmr.msra.gmra.mxu3 %vm435_vm1, %v652_v13 }
 0x1a7   :  { %895 = vmatpush.msra.mxu0 %v3475_v16  ;;  %915 = vmatpush.msra.mxu1 %v3477_v17 }
 0x1a8   :  { %935 = vmatpush.msra.mxu2 %v3479_v18  ;;  %955 = vmatpush.msra.mxu3 %v3573_v39 }
 0x1a9   :  { %896 = vmatpush.msra.mxu0 %v3483_v19  ;;  %916 = vmatpush.msra.mxu1 %v3485_v20 }
 0x1aa   :  { %936 = vmatpush.msra.mxu2 %v3487_v21  ;;  %956 = vmatpush.msra.mxu3 %v3577_v40 }
 0x1ab   :  { %897 = vmatpush.msra.mxu0 %v3490_v22  ;;  %917 = vmatpush.msra.mxu1 %v3517_v26 }
 0x1ac   :  { %937 = vmatpush.msra.mxu2 %v3519_v27  ;;  %957 = vmatpush.msra.mxu3 %v3581_v41 }
 0x1ad   :  { %898 = vmatpush.msra.mxu0 %v3521_v28  ;;  %918 = vmatpush.msra.mxu1 %v3545_v31 }
 0x1ae   :  { %938 = vmatpush.msra.mxu2 %v3547_v32  ;;  %958 = vmatpush.msra.mxu3 %v3588_v42 }
 0x1af   :  { %899 = vmatpush.msra.mxu0 %v3549_v33  ;;  %919 = vmatpush.msra.mxu1 %v3569_v37 }
 0x1b0   :  { %939 = vmatpush.msra.mxu2 %v3571_v38  ;;  %959 = vmatpush.msra.mxu3 %v3598_v45 }
 0x1b1   :  { %900 = vmatpush.msra.mxu0 %v3553_v34  ;;  %920 = vmatpush.msra.mxu1 %v3594_v43 }
 0x1b2   :  { %940 = vmatpush.msra.mxu2 %v3596_v44  ;;  %960 = vmatpush.msra.mxu3 %v3603_v46 }
 0x1b3   :  { %901 = vmatpush.msra.mxu0 %v3557_v35  ;;  %921 = vmatpush.msra.mxu1 %v3619_v49 }
 0x1b4   :  { %941 = vmatpush.msra.mxu2 %v3621_v50  ;;  %961 = vmatpush.msra.mxu3 %v3607_v47 }
 0x1b5   :  { %902 = vmatpush.msra.mxu0 %v3564_v36  ;;  %922 = vmatpush.msra.mxu1 %v3635_v51 }
 0x1b6   :  { %942 = vmatpush.msra.mxu2 %v3637_v52  ;;  %962 = vmatpush.msra.mxu3 %v3613_v48 }
 0x222   :  { %v680_v25 = vpop.f32.mrf.mxu0  ;;  %v700_v14 = vpop.f32.mrf.mxu1 }
 0x223   :  { %v743_v58 = vadd.f32 %v680_v25, %v224_v56  ;;  %v744_v23 = vadd.f32 %v700_v14, %v3738_v6  ;;  %v4761_v14 = vld [vmem:[#allocation47_spill] sm:$0xff] }
 0x225   :  { %v747_v61 = vmul.f32 0.5, %v743_v58  ;;  %v751_v8 = vmul.f32 0.5, %v744_v23 }
 0x227   :  { %3046 = vtanh.f32 %v747_v61 }
 0x228   :  { %3048 = vtanh.f32 %v751_v8 }
 0x229   :  { %v720_v53 = vpop.f32.mrf.mxu2  ;;  %v740_v0 = vpop.f32.mrf.mxu3 }
 0x22a   :  { %v745_v10 = vadd.f32 %v720_v53, %v3740_v5  ;;  %v746_v12 = vadd.f32 %v740_v0, %v3728_v11  ;;  %v4762_v0 = vld [vmem:[#allocation48_spill] sm:$0xff] }
 0x22c   :  { %3050 = vtanh.f32 %v745_v10  ;;  %v756_v9 = vmul.f32 0.5, %v746_v12  ;;  %v4763_v12 = vld [vmem:[#allocation44_spill] sm:$0xff] }
 0x22d   :  { %v3047_v55 = vpop.eup %3046 }
 0x22e   :  { %v3049_v3 = vpop.eup %3048  ;;  %v749_v54 = vmul.f32 0.5, %v3047_v55  ;;  %3052 = vtanh.f32 %v756_v9 }
 0x22f   :  { %v753_v4 = vmul.f32 0.5, %v3049_v3 }
 0x230   :  { %v750_v15 = vadd.f32 0.5, %v749_v54 }
 0x231   :  { %v754_v1 = vadd.f32 0.5, %v753_v4 }
 0x232   :  { %v3051_v6 = vpop.eup %3050 }
 0x233   :  { %v760_v24 = vmul.f32 %v754_v1, %v3816_v2  ;;  %v761_v59 = vmul.f32 %v3051_v6, %v750_v15  ;;  %v4760_v2 = vld [vmem:[#allocation40_spill] sm:$0xff] }
 0x234   :  { %v3053_v62 = vpop.eup %3052  ;;  %v227_v60 = vadd.f32 %v4760_v2, %v3762_v29 }
 0x235   :  { %v3861_v57 = vadd.f32 %v761_v59, %v760_v24  ;;  %v758_v5 = vmul.f32 0.5, %v3053_v62 }
 0x237   :  { %3054 = vtanh.f32 %v3861_v57  ;;  %v759_v11 = vadd.f32 0.5, %v758_v5 }
 0x23d   :  { %v3055_v30 = vpop.eup %3054 }
 0x23e   :  { %v764_v63 = vmul.f32 %v3055_v30, %v759_v11 }
 0x240   :  { %2926 = vmatmul.msk.f32.vlgmr.msrb.gmra.mxu0 %vm435_vm1, %v764_v63  ;;  %2927 = vmatmul.msk.f32.vlgmr.msrb.gmra.mxu1 %vm435_vm1, %v764_v63 }
 0x241   :  { %2928 = vmatmul.msk.f32.vlgmr.msrb.gmra.mxu2 %vm435_vm1, %v764_v63  ;;  %2929 = vmatmul.msk.f32.vlgmr.msrb.gmra.mxu3 %vm435_vm1, %v764_v63 }
 0x242   :  { %1007 = vmatpush.msrb.mxu0 %v3475_v16  ;;  %1027 = vmatpush.msrb.mxu1 %v3477_v17 }
 0x243   :  { %1047 = vmatpush.msrb.mxu2 %v3479_v18  ;;  %1067 = vmatpush.msrb.mxu3 %v3573_v39 }
 0x244   :  { %1008 = vmatpush.msrb.mxu0 %v3483_v19  ;;  %1028 = vmatpush.msrb.mxu1 %v3485_v20 }
 0x245   :  { %1048 = vmatpush.msrb.mxu2 %v3487_v21  ;;  %1068 = vmatpush.msrb.mxu3 %v3577_v40 }
 0x246   :  { %1009 = vmatpush.msrb.mxu0 %v3490_v22  ;;  %1029 = vmatpush.msrb.mxu1 %v3517_v26 }
 0x247   :  { %1049 = vmatpush.msrb.mxu2 %v3519_v27  ;;  %1069 = vmatpush.msrb.mxu3 %v3581_v41 }
 0x248   :  { %1010 = vmatpush.msrb.mxu0 %v3521_v28  ;;  %1030 = vmatpush.msrb.mxu1 %v3545_v31 }
 0x249   :  { %1050 = vmatpush.msrb.mxu2 %v3547_v32  ;;  %1070 = vmatpush.msrb.mxu3 %v3588_v42 }
 0x24a   :  { %1011 = vmatpush.msrb.mxu0 %v3549_v33  ;;  %1031 = vmatpush.msrb.mxu1 %v3569_v37 }
 0x24b   :  { %1051 = vmatpush.msrb.mxu2 %v3571_v38  ;;  %1071 = vmatpush.msrb.mxu3 %v3598_v45 }
 0x24c   :  { %1012 = vmatpush.msrb.mxu0 %v3553_v34  ;;  %1032 = vmatpush.msrb.mxu1 %v3594_v43 }
 0x24d   :  { %1052 = vmatpush.msrb.mxu2 %v3596_v44  ;;  %1072 = vmatpush.msrb.mxu3 %v3603_v46 }
 0x24e   :  { %1013 = vmatpush.msrb.mxu0 %v3557_v35  ;;  %1033 = vmatpush.msrb.mxu1 %v3619_v49 }
 0x24f   :  { %1053 = vmatpush.msrb.mxu2 %v3621_v50  ;;  %1073 = vmatpush.msrb.mxu3 %v3607_v47 }
 0x250   :  { %1014 = vmatpush.msrb.mxu0 %v3564_v36  ;;  %1034 = vmatpush.msrb.mxu1 %v3635_v51 }
 0x251   :  { %1054 = vmatpush.msrb.mxu2 %v3637_v52  ;;  %1074 = vmatpush.msrb.mxu3 %v3613_v48 }
 0x2bd   :  { %v792_v13 = vpop.f32.mrf.mxu0  ;;  %v812_v56 = vpop.f32.mrf.mxu1 }
 0x2be   :  { %v855_v25 = vadd.f32 %v792_v13, %v227_v60  ;;  %v856_v58 = vadd.f32 %v812_v56, %v4761_v14 }
 0x2c0   :  { %v859_v23 = vmul.f32 0.5, %v855_v25  ;;  %v863_v61 = vmul.f32 0.5, %v856_v58 }
 0x2c2   :  { %3056 = vtanh.f32 %v859_v23 }
 0x2c3   :  { %3058 = vtanh.f32 %v863_v61 }
 0x2c4   :  { %v832_v8 = vpop.f32.mrf.mxu2  ;;  %v852_v53 = vpop.f32.mrf.mxu3 }
 0x2c5   :  { %v857_v10 = vadd.f32 %v832_v8, %v4762_v0  ;;  %v858_v9 = vadd.f32 %v852_v53, %v4763_v12 }
 0x2c7   :  { %3060 = vtanh.f32 %v857_v10  ;;  %v868_v55 = vmul.f32 0.5, %v858_v9 }
 0x2c8   :  { %v3057_v3 = vpop.eup %3056 }
 0x2c9   :  { %v3059_v54 = vpop.eup %3058  ;;  %v861_v4 = vmul.f32 0.5, %v3057_v3  ;;  %3062 = vtanh.f32 %v868_v55  ;;  %v3106_v3 = vld [vmem:[#allocation13 + $0xe0] sm:$0xff] }
 0x2ca   :  { %v865_v15 = vmul.f32 0.5, %v3059_v54  ;;  %v3107_v54 = vld [vmem:[#allocation13 + $0xe8] sm:$0xff] }
 0x2cb   :  { %v862_v1 = vadd.f32 0.5, %v861_v4  ;;  %v3108_v4 = vld [vmem:[#allocation13 + $0xf0] sm:$0xff] }
 0x2cc   :  { %v866_v6 = vadd.f32 0.5, %v865_v15  ;;  %v3109_v15 = vld [vmem:[#allocation13 + $0xc0] sm:$0xff] }
 0x2cd   :  { %v3061_v24 = vpop.eup %3060 }
 0x2ce   :  { %v872_v59 = vmul.f32 %v866_v6, %v3861_v57  ;;  %v873_v62 = vmul.f32 %v3061_v24, %v862_v1  ;;  %v3110_v1 = vld [vmem:[#allocation13 + $0xc8] sm:$0xff]  ;;  %v3111_v6 = vld [vmem:[#allocation13 + $0xd0] sm:$0xff]  ;;  %v3112_v24 = vld [vmem:[#allocation13 + $0xa0] sm:$0xff] }
 0x2cf   :  { %v3063_v5 = vpop.eup %3062 }
 0x2d0   :  { %v3906_v11 = vadd.f32 %v873_v62, %v872_v59  ;;  %v870_v30 = vmul.f32 0.5, %v3063_v5  ;;  %v3113_v59 = vld [vmem:[#allocation13 + $0xa8] sm:$0xff]  ;;  %v3114_v62 = vld [vmem:[#allocation13 + $0xb0] sm:$0xff]  ;;  %v3115_v5 = vld [vmem:[#allocation13 + $0x80] sm:$0xff] }
 0x2d2   :  { %3064 = vtanh.f32 %v3906_v11  ;;  %v871_v63 = vadd.f32 0.5, %v870_v30  ;;  %v3118_v30 = vld [vmem:[#allocation13 + $0x60] sm:$0xff] }
 0x2d8   :  { %v3065_v2 = vpop.eup %3064 }
 0x2d9   :  { %v876_v60 = vmul.f32 %v3065_v2, %v871_v63 }
 0x2db   :  { %2930 = vmatmul.msk.f32.vlgmr.msra.gmra.mxu0 %vm435_vm1, %v876_v60  ;;  %2931 = vmatmul.msk.f32.vlgmr.msra.gmra.mxu1 %vm435_vm1, %v876_v60 }
 0x2dc   :  { %2932 = vmatmul.msk.f32.vlgmr.msra.gmra.mxu2 %vm435_vm1, %v876_v60  ;;  %2933 = vmatmul.msk.f32.vlgmr.msra.gmra.mxu3 %vm435_vm1, %v876_v60  ;;  %v4770_v60 = vld [vmem:[#allocation54_spill] sm:$0xff] }
 0x2dd   :  { %1119 = vmatpush.msra.mxu0 %v3475_v16  ;;  %1139 = vmatpush.msra.mxu1 %v3477_v17  ;;  %v4764_v16 = vld [vmem:[#allocation42_spill] sm:$0xff] }
 0x2de   :  { %1159 = vmatpush.msra.mxu2 %v3479_v18  ;;  %1179 = vmatpush.msra.mxu3 %v3573_v39  ;;  %v230_v17 = vadd.f32 %v4764_v16, %v3762_v29  ;;  %v4771_v16 = vld [vmem:[#allocation46_spill] sm:$0xff] }
 0x2df   :  { %1120 = vmatpush.msra.mxu0 %v3483_v19  ;;  %1140 = vmatpush.msra.mxu1 %v3485_v20 }
 0x2e0   :  { %1160 = vmatpush.msra.mxu2 %v3487_v21  ;;  %1180 = vmatpush.msra.mxu3 %v3577_v40  ;;  %v4765_v21 = vld [vmem:[#allocation50_spill] sm:$0xff] }
 0x2e1   :  { %1121 = vmatpush.msra.mxu0 %v3490_v22  ;;  %1141 = vmatpush.msra.mxu1 %v3517_v26 }
 0x2e2   :  { %1161 = vmatpush.msra.mxu2 %v3519_v27  ;;  %1181 = vmatpush.msra.mxu3 %v3581_v41 }
 0x2e3   :  { %1122 = vmatpush.msra.mxu0 %v3521_v28  ;;  %1142 = vmatpush.msra.mxu1 %v3545_v31 }
 0x2e4   :  { %1162 = vmatpush.msra.mxu2 %v3547_v32  ;;  %1182 = vmatpush.msra.mxu3 %v3588_v42  ;;  %v4766_v32 = vld [vmem:[#allocation51_spill] sm:$0xff] }
 0x2e5   :  { %1123 = vmatpush.msra.mxu0 %v3549_v33  ;;  %1143 = vmatpush.msra.mxu1 %v3569_v37 }
 0x2e6   :  { %1163 = vmatpush.msra.mxu2 %v3571_v38  ;;  %1183 = vmatpush.msra.mxu3 %v3598_v45 }
 0x2e7   :  { %1124 = vmatpush.msra.mxu0 %v3553_v34  ;;  %1144 = vmatpush.msra.mxu1 %v3594_v43  ;;  %v4767_v34 = vld [vmem:[#allocation45_spill] sm:$0xff] }
 0x2e8   :  { %1164 = vmatpush.msra.mxu2 %v3596_v44  ;;  %1184 = vmatpush.msra.mxu3 %v3603_v46 }
 0x2e9   :  { %1125 = vmatpush.msra.mxu0 %v3557_v35  ;;  %1145 = vmatpush.msra.mxu1 %v3619_v49 }
 0x2ea   :  { %1165 = vmatpush.msra.mxu2 %v3621_v50  ;;  %1185 = vmatpush.msra.mxu3 %v3607_v47 }
 0x2eb   :  { %1126 = vmatpush.msra.mxu0 %v3564_v36  ;;  %1146 = vmatpush.msra.mxu1 %v3635_v51 }
 0x2ec   :  { %1166 = vmatpush.msra.mxu2 %v3637_v52  ;;  %1186 = vmatpush.msra.mxu3 %v3613_v48 }
 0x358   :  { %v904_v18 = vpop.f32.mrf.mxu0  ;;  %v924_v19 = vpop.f32.mrf.mxu1 }
 0x359   :  { %v967_v20 = vadd.f32 %v904_v18, %v230_v17  ;;  %v968_v22 = vadd.f32 %v924_v19, %v4765_v21 }
 0x35b   :  { %v971_v26 = vmul.f32 0.5, %v967_v20  ;;  %v975_v27 = vmul.f32 0.5, %v968_v22 }
 0x35d   :  { %3066 = vtanh.f32 %v971_v26 }
 0x35e   :  { %3068 = vtanh.f32 %v975_v27 }
 0x35f   :  { %v944_v28 = vpop.f32.mrf.mxu2  ;;  %v964_v31 = vpop.f32.mrf.mxu3 }
 0x360   :  { %v969_v33 = vadd.f32 %v944_v28, %v4766_v32  ;;  %v970_v35 = vadd.f32 %v964_v31, %v4767_v34 }
 0x362   :  { %3070 = vtanh.f32 %v969_v33  ;;  %v980_v36 = vmul.f32 0.5, %v970_v35 }
 0x363   :  { %v3067_v57 = vpop.eup %3066 }
 0x364   :  { %v3069_v13 = vpop.eup %3068  ;;  %v973_v56 = vmul.f32 0.5, %v3067_v57  ;;  %3072 = vtanh.f32 %v980_v36  ;;  %v4772_v57 = vld [vmem:[#allocation41_spill] sm:$0xff] }
 0x365   :  { %v977_v25 = vmul.f32 0.5, %v3069_v13  ;;  %v236_v13 = vadd.f32 %v4772_v57, %v3762_v29 }
 0x366   :  { %v974_v14 = vadd.f32 0.5, %v973_v56 }
 0x367   :  { %v978_v58 = vadd.f32 0.5, %v977_v25 }
 0x368   :  { %v3071_v23 = vpop.eup %3070 }
 0x369   :  { %v984_v61 = vmul.f32 %v978_v58, %v3906_v11  ;;  %v985_v8 = vmul.f32 %v3071_v23, %v974_v14  ;;  %v3116_v11 = vld [vmem:[#allocation13 + $0x88] sm:$0xff]  ;;  %v4773_v58 = vld [vmem:[#allocation55_spill] sm:$0xff] }
 0x36a   :  { %v3073_v53 = vpop.eup %3072 }
 0x36b   :  { %v3951_v0 = vadd.f32 %v985_v8, %v984_v61  ;;  %v982_v10 = vmul.f32 0.5, %v3073_v53 }
 0x36d   :  { %3074 = vtanh.f32 %v3951_v0  ;;  %v983_v12 = vadd.f32 0.5, %v982_v10  ;;  %v4774_v10 = vld [vmem:[#allocation56_spill] sm:$0xff] }
 0x373   :  { %v3075_v9 = vpop.eup %3074 }
 0x374   :  { %v988_v55 = vmul.f32 %v3075_v9, %v983_v12  ;;  %v4775_v9 = vld [vmem:[#allocation49_spill] sm:$0xff] }
 0x376   :  { %2934 = vmatmul.msk.f32.vlgmr.msrb.gmra.mxu0 %vm435_vm1, %v988_v55  ;;  %2935 = vmatmul.msk.f32.vlgmr.msrb.gmra.mxu1 %vm435_vm1, %v988_v55 }
 0x377   :  { %2936 = vmatmul.msk.f32.vlgmr.msrb.gmra.mxu2 %vm435_vm1, %v988_v55  ;;  %2937 = vmatmul.msk.f32.vlgmr.msrb.gmra.mxu3 %vm435_vm1, %v988_v55 }
 0x378   :  { %1231 = vmatpush.msrb.mxu0 %v3106_v3  ;;  %1251 = vmatpush.msrb.mxu1 %v3107_v54 }
 0x379   :  { %1271 = vmatpush.msrb.mxu2 %v3108_v4  ;;  %1291 = vmatpush.msrb.mxu3 %v3573_v39  ;;  %v3117_v39 = vld [vmem:[#allocation13 + $0x90] sm:$0xff] }
 0x37a   :  { %1232 = vmatpush.msrb.mxu0 %v3109_v15  ;;  %1252 = vmatpush.msrb.mxu1 %v3110_v1 }
 0x37b   :  { %1272 = vmatpush.msrb.mxu2 %v3111_v6  ;;  %1292 = vmatpush.msrb.mxu3 %v3577_v40  ;;  %v3119_v40 = vld [vmem:[#allocation13 + $0x40] sm:$0xff] }
 0x37c   :  { %1233 = vmatpush.msrb.mxu0 %v3112_v24  ;;  %1253 = vmatpush.msrb.mxu1 %v3113_v59 }
 0x37d   :  { %1273 = vmatpush.msrb.mxu2 %v3114_v62  ;;  %1293 = vmatpush.msrb.mxu3 %v3581_v41  ;;  %v3120_v41 = vld [vmem:[#allocation13 + $0x20] sm:$0xff] }
 0x37e   :  { %1234 = vmatpush.msrb.mxu0 %v3115_v5  ;;  %1254 = vmatpush.msrb.mxu1 %v3116_v11 }
 0x37f   :  { %1274 = vmatpush.msrb.mxu2 %v3117_v39  ;;  %1294 = vmatpush.msrb.mxu3 %v3588_v42 }
 0x380   :  { %1235 = vmatpush.msrb.mxu0 %v3118_v30  ;;  %1255 = vmatpush.msrb.mxu1 %v3569_v37  ;;  %v3121_v37 = vld [vmem:[#allocation13] sm:$0xff] }
 0x381   :  { %1275 = vmatpush.msrb.mxu2 %v3571_v38  ;;  %1295 = vmatpush.msrb.mxu3 %v3598_v45  ;;  %v4768_v38 = vld [vmem:[#allocation39_spill] sm:$0xff] }
 0x382   :  { %1236 = vmatpush.msrb.mxu0 %v3119_v40  ;;  %1256 = vmatpush.msrb.mxu1 %v3594_v43  ;;  %v233_v42 = vadd.f32 %v4768_v38, %v3762_v29  ;;  %v4776_v38 = vld [vmem:[#allocation43_spill] sm:$0xff] }
 0x383   :  { %1276 = vmatpush.msrb.mxu2 %v3596_v44  ;;  %1296 = vmatpush.msrb.mxu3 %v3603_v46  ;;  %v4769_v46 = vld [vmem:[#allocation53_spill] sm:$0xff] }
 0x384   :  { %1237 = vmatpush.msrb.mxu0 %v3120_v41  ;;  %1257 = vmatpush.msrb.mxu1 %v3619_v49 }
 0x385   :  { %1277 = vmatpush.msrb.mxu2 %v3621_v50  ;;  %1297 = vmatpush.msrb.mxu3 %v3607_v47 }
 0x386   :  { %1238 = vmatpush.msrb.mxu0 %v3121_v37  ;;  %1258 = vmatpush.msrb.mxu1 %v3635_v51 }
 0x387   :  { %1278 = vmatpush.msrb.mxu2 %v3637_v52  ;;  %1298 = vmatpush.msrb.mxu3 %v3613_v48 }
 0x3f3   :  { %v1016_v43 = vpop.f32.mrf.mxu0  ;;  %v1036_v44 = vpop.f32.mrf.mxu1 }
 0x3f4   :  { %v1079_v45 = vadd.f32 %v1016_v43, %v233_v42  ;;  %v1080_v49 = vadd.f32 %v1036_v44, %v4769_v46  ;;  %v239_v42 = vadd.f32 %v4776_v38, %v3762_v29 }
 0x3f6   :  { %v1083_v63 = vmul.f32 0.5, %v1079_v45  ;;  %v1087_v50 = vmul.f32 0.5, %v1080_v49 }
 0x3f8   :  { %3076 = vtanh.f32 %v1083_v63 }
 0x3f9   :  { %3078 = vtanh.f32 %v1087_v50 }
 0x3fa   :  { %v1056_v47 = vpop.f32.mrf.mxu2  ;;  %v1076_v2 = vpop.f32.mrf.mxu3 }
 0x3fb   :  { %v1081_v51 = vadd.f32 %v1056_v47, %v4770_v60  ;;  %v1082_v52 = vadd.f32 %v1076_v2, %v4771_v16  ;;  %v4777_v2 = vld [vmem:[#allocation57_spill] sm:$0xff] }
 0x3fd   :  { %3080 = vtanh.f32 %v1081_v51  ;;  %v1092_v48 = vmul.f32 0.5, %v1082_v52  ;;  %v4778_v51 = vld [vmem:[#allocation52_spill] sm:$0xff] }
 0x3fe   :  { %v3077_v17 = vpop.eup %3076 }
 0x3ff   :  { %v3079_v18 = vpop.eup %3078  ;;  %v1085_v19 = vmul.f32 0.5, %v3077_v17  ;;  %3082 = vtanh.f32 %v1092_v48 }
 0x400   :  { %v1089_v20 = vmul.f32 0.5, %v3079_v18 }
 0x401   :  { %v1086_v21 = vadd.f32 0.5, %v1085_v19 }
 0x402   :  { %v1090_v22 = vadd.f32 0.5, %v1089_v20 }
 0x403   :  { %v3081_v26 = vpop.eup %3080 }
 0x404   :  { %v1096_v27 = vmul.f32 %v1090_v22, %v3951_v0  ;;  %v1097_v28 = vmul.f32 %v3081_v26, %v1086_v21 }
 0x405   :  { %v3083_v31 = vpop.eup %3082 }
 0x406   :  { %v1098_v32 = vadd.f32 %v1097_v28, %v1096_v27  ;;  %v1094_v33 = vmul.f32 0.5, %v3083_v31 }
 0x408   :  { %3084 = vtanh.f32 %v1098_v32  ;;  %v1095_v34 = vadd.f32 0.5, %v1094_v33 }
 0x40e   :  { %v3085_v35 = vpop.eup %3084 }
 0x40f   :  { %v1100_v36 = vmul.f32 %v3085_v35, %v1095_v34 }
 0x411   :  { %2938 = vmatmul.msk.f32.vlgmr.msra.gmra.mxu0 %vm435_vm1, %v1100_v36  ;;  %2939 = vmatmul.msk.f32.vlgmr.msra.gmra.mxu1 %vm435_vm1, %v1100_v36 }
 0x412   :  { %2940 = vmatmul.msk.f32.vlgmr.msra.gmra.mxu2 %vm435_vm1, %v1100_v36  ;;  %2941 = vmatmul.msk.f32.vlgmr.msra.gmra.mxu3 %vm435_vm1, %v1100_v36 }
 0x48e   :  { %v1128_v56 = vpop.f32.mrf.mxu0  ;;  %v1148_v25 = vpop.f32.mrf.mxu1 }
 0x48f   :  { %v1191_v14 = vadd.f32 %v1128_v56, %v236_v13  ;;  %v1192_v23 = vadd.f32 %v1148_v25, %v4773_v58 }
 0x491   :  { %v1195_v61 = vmul.f32 0.5, %v1191_v14  ;;  %v1199_v8 = vmul.f32 0.5, %v1192_v23 }
 0x493   :  { %3086 = vtanh.f32 %v1195_v61 }
 0x494   :  { %3088 = vtanh.f32 %v1199_v8 }
 0x495   :  { %v1168_v53 = vpop.f32.mrf.mxu2  ;;  %v1188_v0 = vpop.f32.mrf.mxu3 }
 0x496   :  { %v1193_v12 = vadd.f32 %v1168_v53, %v4774_v10  ;;  %v1194_v55 = vadd.f32 %v1188_v0, %v4775_v9 }
 0x498   :  { %3090 = vtanh.f32 %v1193_v12  ;;  %v1204_v3 = vmul.f32 0.5, %v1194_v55 }
 0x499   :  { %v3087_v54 = vpop.eup %3086 }
 0x49a   :  { %v3089_v4 = vpop.eup %3088  ;;  %v1197_v15 = vmul.f32 0.5, %v3087_v54  ;;  %3092 = vtanh.f32 %v1204_v3 }
 0x49b   :  { %v1201_v1 = vmul.f32 0.5, %v3089_v4 }
 0x49c   :  { %v1198_v6 = vadd.f32 0.5, %v1197_v15 }
 0x49d   :  { %v1202_v24 = vadd.f32 0.5, %v1201_v1 }
 0x49e   :  { %v3091_v59 = vpop.eup %3090 }
 0x49f   :  { %v1208_v62 = vmul.f32 %v1202_v24, %v1098_v32  ;;  %v1209_v5 = vmul.f32 %v3091_v59, %v1198_v6 }
 0x4a0   :  { %v3093_v11 = vpop.eup %3092 }
 0x4a1   :  { %v1210_v39 = vadd.f32 %v1209_v5, %v1208_v62  ;;  %v1206_v30 = vmul.f32 0.5, %v3093_v11 }
 0x4a3   :  { %3094 = vtanh.f32 %v1210_v39  ;;  %v1207_v40 = vadd.f32 0.5, %v1206_v30 }
 0x4a9   :  { %v3095_v41 = vpop.eup %3094 }
 0x4aa   :  { %v1212_v37 = vmul.f32 %v3095_v41, %v1207_v40 }
 0x4ac   :  { %2942 = vmatmul.msk.f32.vlgmr.msrb.gmra.mxu0 %vm435_vm1, %v1212_v37  ;;  %2943 = vmatmul.msk.f32.vlgmr.msrb.gmra.mxu1 %vm435_vm1, %v1212_v37 }
 0x4ad   :  { %2944 = vmatmul.msk.f32.vlgmr.msrb.gmra.mxu2 %vm435_vm1, %v1212_v37  ;;  %2945 = vmatmul.msk.f32.vlgmr.msrb.gmra.mxu3 %vm435_vm1, %v1212_v37 }
 0x529   :  { %v1240_v43 = vpop.f32.mrf.mxu0  ;;  %v1260_v44 = vpop.f32.mrf.mxu1 }
 0x52a   :  { %v1303_v45 = vadd.f32 %v1240_v43, %v239_v42  ;;  %v1304_v46 = vadd.f32 %v1260_v44, %v3767_v7 }
 0x52c   :  { %v1307_v49 = vmul.f32 0.5, %v1303_v45  ;;  %v1311_v63 = vmul.f32 0.5, %v1304_v46 }
 0x52e   :  { %3096 = vtanh.f32 %v1307_v49 }
 0x52f   :  { %3098 = vtanh.f32 %v1311_v63 }
 0x530   :  { %v1280_v50 = vpop.f32.mrf.mxu2  ;;  %v1300_v47 = vpop.f32.mrf.mxu3 }
 0x531   :  { %v1305_v60 = vadd.f32 %v1280_v50, %v4777_v2  ;;  %v1306_v16 = vadd.f32 %v1300_v47, %v4778_v51 }
 0x533   :  { %3100 = vtanh.f32 %v1305_v60  ;;  %v1316_v52 = vmul.f32 0.5, %v1306_v16 }
 0x534   :  { %v3097_v48 = vpop.eup %3096 }
 0x535   :  { %v3099_v17 = vpop.eup %3098  ;;  %v1309_v29 = vmul.f32 0.5, %v3097_v48  ;;  %3102 = vtanh.f32 %v1316_v52 }
 0x536   :  { %v1313_v18 = vmul.f32 0.5, %v3099_v17 }
 0x537   :  { %v1310_v19 = vadd.f32 0.5, %v1309_v29 }
 0x538   :  { %v1314_v20 = vadd.f32 0.5, %v1313_v18 }
 0x539   :  { %v3101_v7 = vpop.eup %3100 }
 0x53a   :  { %v1320_v21 = vmul.f32 %v1314_v20, %v1210_v39  ;;  %v1321_v22 = vmul.f32 %v3101_v7, %v1310_v19 }
 0x53b   :  { %v3103_v26 = vpop.eup %3102 }
 0x53c   :  { %v3998_v27 = vadd.f32 %v1321_v22, %v1320_v21  ;;  %v1318_v28 = vmul.f32 0.5, %v3103_v26 }
 0x53e   :  { %3104 = vtanh.f32 %v3998_v27  ;;  %v1319_v31 = vadd.f32 0.5, %v1318_v28 }
 0x544   :  { %v3105_v32 = vpop.eup %3104 }
 0x545   :  { %v4001_v33 = vmul.f32 %v3105_v32, %v1319_v31 }
 0x546   :  { %3327 = dma.done.wait [#allocation9], 1024 }
 0x547   :  { %3328 = vsyncadd [#allocation9], 4294966272 }
 0x548   :  { %3329 = dma.done.wait [#allocation9 + $0x1], 512 }
 0x549   :  { %3330 = vsyncadd [#allocation9 + $0x1], 4294966784 }
 0x54a   :  { %3331 = dma.done.wait [#allocation9 + $0x2], 4096 }
 0x54b   :  { %3332 = vsyncadd [#allocation9 + $0x2], 4294963200 }
 0x54c   :  { %3333 = dma.done.wait [#allocation9 + $0x3], 64 }
 0x54d   :  { %3334 = vsyncadd [#allocation9 + $0x3], 4294967232  ;;  %v1347_v34 = vld [vmem:[#allocation6] sm:$0xff]  ;;  %v1348_v35 = vld [vmem:[#allocation6 + $0x8] sm:$0xff]  ;;  %s2823_s1 = sshll.u32 %s4724_s10, 4  ;;  %s3345_s3 = smov 128   ;;  %s2824_s1 = int_to_ptr.hbm [resolvable:$true] %s2823_s1 }
 0x54e   :  { %v1349_v36 = vld [vmem:[#allocation6 + $0x10] sm:$0xff]  ;;  %1400 = vmatpush.msra.mxu0 %v1347_v34  ;;  %1441 = vmatpush.msra.mxu1 %v1348_v35  ;;  %v1350_v57 = vld [vmem:[#allocation6 + $0x18] sm:$0xff]  ;;  %v4003_v13 = vld [vmem:[#allocation7 + $0xe0] sm:$0xff]  ;;  %s3346_s5 = smov 8  }
 0x54f   :  { %1482 = vmatpush.msra.mxu2 %v1349_v36  ;;  %1523 = vmatpush.msra.mxu3 %v1350_v57  ;;  %v4005_v56 = vld [vmem:[#allocation7 + $0xe8] sm:$0xff]  ;;  %v4011_v14 = vld [vmem:[#allocation7 + $0xf0] sm:$0xff]  ;;  %v4013_v58 = vld [vmem:[#allocation7 + $0xf8] sm:$0xff] }
 0x550   :  { %v4779_v25 = vld [vmem:[#allocation31_spill] sm:$0xff]  ;;  %1630 = vmatpush.msrb.mxu0 %v4003_v13  ;;  %1650 = vmatpush.msrb.mxu1 %v4005_v56  ;;  %v4025_v8 = vld [vmem:[#allocation7 + $0xd0] sm:$0xff]  ;;  %v4027_v53 = vld [vmem:[#allocation7 + $0xd8] sm:$0xff] }
 0x551   :  { %2946 = vmatmul.msk.f32.vlgmr.msra.gmra.mxu0 %vm175_vm0, %v4779_v25  ;;  %2954 = vmatmul.msk.f32.vlgmr.msra.gmra.mxu1 %vm175_vm0, %v4779_v25  ;;  %v4019_v23 = vld [vmem:[#allocation7 + $0xc0] sm:$0xff]  ;;  %v4021_v61 = vld [vmem:[#allocation7 + $0xc8] sm:$0xff]  ;;  %v4037_v12 = vld [vmem:[#allocation7 + $0xb0] sm:$0xff] }
 0x552   :  { %2962 = vmatmul.msk.f32.vlgmr.msra.gmra.mxu2 %vm175_vm0, %v4779_v25  ;;  %2970 = vmatmul.msk.f32.vlgmr.msra.gmra.mxu3 %vm175_vm0, %v4779_v25  ;;  %v4031_v0 = vld [vmem:[#allocation7 + $0xa0] sm:$0xff]  ;;  %v4033_v10 = vld [vmem:[#allocation7 + $0xa8] sm:$0xff]  ;;  %v4039_v9 = vld [vmem:[#allocation7 + $0xb8] sm:$0xff] }
 0x553   :  { %1670 = vmatpush.msrb.mxu2 %v4011_v14  ;;  %1690 = vmatpush.msrb.mxu3 %v4013_v58  ;;  %v4047_v55 = vld [vmem:[#allocation7 + $0x80] sm:$0xff]  ;;  %v4049_v3 = vld [vmem:[#allocation7 + $0x88] sm:$0xff]  ;;  %v4055_v4 = vld [vmem:[#allocation7 + $0x90] sm:$0xff] }
 0x554   :  { %1631 = vmatpush.msrb.mxu0 %v4019_v23  ;;  %1651 = vmatpush.msrb.mxu1 %v4021_v61  ;;  %v4780_v54 = vld [vmem:[#allocation32_spill] sm:$0xff]  ;;  %v4057_v15 = vld [vmem:[#allocation7 + $0x98] sm:$0xff]  ;;  %v4063_v1 = vld [vmem:[#allocation7 + $0x60] sm:$0xff] }
 0x555   :  { %1671 = vmatpush.msrb.mxu2 %v4025_v8  ;;  %1691 = vmatpush.msrb.mxu3 %v4027_v53  ;;  %v4065_v6 = vld [vmem:[#allocation7 + $0x68] sm:$0xff]  ;;  %v4069_v24 = vld [vmem:[#allocation7 + $0x70] sm:$0xff]  ;;  %v4071_v59 = vld [vmem:[#allocation7 + $0x78] sm:$0xff] }
 0x556   :  { %1632 = vmatpush.msrb.mxu0 %v4031_v0  ;;  %1652 = vmatpush.msrb.mxu1 %v4033_v10  ;;  %v4075_v62 = vld [vmem:[#allocation7 + $0x40] sm:$0xff]  ;;  %v4077_v5 = vld [vmem:[#allocation7 + $0x48] sm:$0xff]  ;;  %v4081_v11 = vld [vmem:[#allocation7 + $0x50] sm:$0xff] }
 0x557   :  { %1672 = vmatpush.msrb.mxu2 %v4037_v12  ;;  %1692 = vmatpush.msrb.mxu3 %v4039_v9  ;;  %v4083_v39 = vld [vmem:[#allocation7 + $0x58] sm:$0xff]  ;;  %v4099_v40 = vld [vmem:[#allocation7 + $0x20] sm:$0xff]  ;;  %v4101_v41 = vld [vmem:[#allocation7 + $0x28] sm:$0xff] }
 0x558   :  { %1633 = vmatpush.msrb.mxu0 %v4047_v55  ;;  %1653 = vmatpush.msrb.mxu1 %v4049_v3  ;;  %v4781_v30 = vld [vmem:[#allocation33_spill] sm:$0xff]  ;;  %v4782_v42 = vld [vmem:[#allocation34_spill] sm:$0xff]  ;;  %v4121_v44 = vld [vmem:[#allocation7 + $0x8] sm:$0xff] }
 0x559   :  { %2947 = vmatmul.msk.f32.gmra.mxu0 %vm175_vm0, %v4780_v54  ;;  %2955 = vmatmul.msk.f32.gmra.mxu1 %vm175_vm0, %v4780_v54  ;;  %v4103_v37 = vld [vmem:[#allocation7 + $0x30] sm:$0xff]  ;;  %v4107_v38 = vld [vmem:[#allocation7 + $0x38] sm:$0xff]  ;;  %v4119_v43 = vld [vmem:[#allocation7] sm:$0xff] }
 0x55a   :  { %2963 = vmatmul.msk.f32.gmra.mxu2 %vm175_vm0, %v4780_v54  ;;  %2971 = vmatmul.msk.f32.gmra.mxu3 %vm175_vm0, %v4780_v54  ;;  %v4123_v45 = vld [vmem:[#allocation7 + $0x10] sm:$0xff]  ;;  %v4127_v46 = vld [vmem:[#allocation7 + $0x18] sm:$0xff]  ;;  %v4783_v49 = vld [vmem:[#allocation35_spill] sm:$0xff] }
 0x55b   :  { %1673 = vmatpush.msrb.mxu2 %v4055_v4  ;;  %1693 = vmatpush.msrb.mxu3 %v4057_v15  ;;  %v4784_v63 = vld [vmem:[#allocation36_spill] sm:$0xff]  ;;  %v4785_v50 = vld [vmem:[#allocation37_spill] sm:$0xff]  ;;  %v4786_v47 = vld [vmem:[#allocation38_spill] sm:$0xff] }
 0x55c   :  { %1634 = vmatpush.msrb.mxu0 %v4063_v1  ;;  %1654 = vmatpush.msrb.mxu1 %v4065_v6  ;;  %v1351_v51 = vld [vmem:[#allocation8] sm:$0xf] }
 0x55d   :  { %1674 = vmatpush.msrb.mxu2 %v4069_v24  ;;  %1694 = vmatpush.msrb.mxu3 %v4071_v59  ;;  %v1353_v16 = vperm.slane %v1351_v51, 0  ;;  %v1354_v52 = vperm.slane %v1351_v51, 1  ;;  %v4243_v7 = vperm.slane %v1351_v51, 2  ;;  %v4245_v21 = vperm.slane %v1351_v51, 3 }
 0x55e   :  { %1635 = vmatpush.msrb.mxu0 %v4075_v62  ;;  %1655 = vmatpush.msrb.mxu1 %v4077_v5 }
 0x55f   :  { %1675 = vmatpush.msrb.mxu2 %v4081_v11  ;;  %1695 = vmatpush.msrb.mxu3 %v4083_v39 }
 0x560   :  { %1636 = vmatpush.msrb.mxu0 %v4099_v40  ;;  %1656 = vmatpush.msrb.mxu1 %v4101_v41 }
 0x561   :  { %2948 = vmatmul.msk.f32.gmra.mxu0 %vm175_vm0, %v4781_v30  ;;  %2956 = vmatmul.msk.f32.gmra.mxu1 %vm175_vm0, %v4781_v30 }
 0x562   :  { %2964 = vmatmul.msk.f32.gmra.mxu2 %vm175_vm0, %v4781_v30  ;;  %2972 = vmatmul.msk.f32.gmra.mxu3 %vm175_vm0, %v4781_v30 }
 0x563   :  { %1676 = vmatpush.msrb.mxu2 %v4103_v37  ;;  %1696 = vmatpush.msrb.mxu3 %v4107_v38 }
 0x564   :  { %1637 = vmatpush.msrb.mxu0 %v4119_v43  ;;  %1657 = vmatpush.msrb.mxu1 %v4121_v44 }
 0x565   :  { %1677 = vmatpush.msrb.mxu2 %v4123_v45  ;;  %1697 = vmatpush.msrb.mxu3 %v4127_v46 }
 0x566   :  { %1774 = vmatpush.msra.mxu0 %v4003_v13  ;;  %1794 = vmatpush.msra.mxu1 %v4005_v56 }
 0x567   :  { %1814 = vmatpush.msra.mxu2 %v4011_v14  ;;  %1834 = vmatpush.msra.mxu3 %v4013_v58 }
 0x568   :  { %1775 = vmatpush.msra.mxu0 %v4019_v23  ;;  %1795 = vmatpush.msra.mxu1 %v4021_v61 }
 0x569   :  { %2949 = vmatmul.msk.f32.gmra.mxu0 %vm175_vm0, %v4782_v42  ;;  %2957 = vmatmul.msk.f32.gmra.mxu1 %vm175_vm0, %v4782_v42 }
 0x56a   :  { %2965 = vmatmul.msk.f32.gmra.mxu2 %vm175_vm0, %v4782_v42  ;;  %2973 = vmatmul.msk.f32.gmra.mxu3 %vm175_vm0, %v4782_v42 }
 0x56b   :  { %1815 = vmatpush.msra.mxu2 %v4025_v8  ;;  %1835 = vmatpush.msra.mxu3 %v4027_v53 }
 0x56c   :  { %1776 = vmatpush.msra.mxu0 %v4031_v0  ;;  %1796 = vmatpush.msra.mxu1 %v4033_v10 }
 0x56d   :  { %1816 = vmatpush.msra.mxu2 %v4037_v12  ;;  %1836 = vmatpush.msra.mxu3 %v4039_v9 }
 0x56e   :  { %1777 = vmatpush.msra.mxu0 %v4047_v55  ;;  %1797 = vmatpush.msra.mxu1 %v4049_v3 }
 0x56f   :  { %1817 = vmatpush.msra.mxu2 %v4055_v4  ;;  %1837 = vmatpush.msra.mxu3 %v4057_v15 }
 0x570   :  { %1778 = vmatpush.msra.mxu0 %v4063_v1  ;;  %1798 = vmatpush.msra.mxu1 %v4065_v6 }
 0x571   :  { %2950 = vmatmul.msk.f32.gmra.mxu0 %vm175_vm0, %v4783_v49  ;;  %2958 = vmatmul.msk.f32.gmra.mxu1 %vm175_vm0, %v4783_v49 }
 0x572   :  { %2966 = vmatmul.msk.f32.gmra.mxu2 %vm175_vm0, %v4783_v49  ;;  %2974 = vmatmul.msk.f32.gmra.mxu3 %vm175_vm0, %v4783_v49 }
 0x573   :  { %1818 = vmatpush.msra.mxu2 %v4069_v24  ;;  %1838 = vmatpush.msra.mxu3 %v4071_v59 }
 0x574   :  { %1779 = vmatpush.msra.mxu0 %v4075_v62  ;;  %1799 = vmatpush.msra.mxu1 %v4077_v5 }
 0x575   :  { %1819 = vmatpush.msra.mxu2 %v4081_v11  ;;  %1839 = vmatpush.msra.mxu3 %v4083_v39 }
 0x576   :  { %1780 = vmatpush.msra.mxu0 %v4099_v40  ;;  %1800 = vmatpush.msra.mxu1 %v4101_v41 }
 0x577   :  { %1820 = vmatpush.msra.mxu2 %v4103_v37  ;;  %1840 = vmatpush.msra.mxu3 %v4107_v38 }
 0x578   :  { %1781 = vmatpush.msra.mxu0 %v4119_v43  ;;  %1801 = vmatpush.msra.mxu1 %v4121_v44 }
 0x579   :  { %2951 = vmatmul.msk.f32.gmra.mxu0 %vm175_vm0, %v4784_v63  ;;  %2959 = vmatmul.msk.f32.gmra.mxu1 %vm175_vm0, %v4784_v63 }
 0x57a   :  { %2967 = vmatmul.msk.f32.gmra.mxu2 %vm175_vm0, %v4784_v63  ;;  %2975 = vmatmul.msk.f32.gmra.mxu3 %vm175_vm0, %v4784_v63 }
 0x57b   :  { %1821 = vmatpush.msra.mxu2 %v4123_v45  ;;  %1841 = vmatpush.msra.mxu3 %v4127_v46 }
 0x581   :  { %2952 = vmatmul.msk.f32.gmra.mxu0 %vm175_vm0, %v4785_v50  ;;  %2960 = vmatmul.msk.f32.gmra.mxu1 %vm175_vm0, %v4785_v50 }
 0x582   :  { %2968 = vmatmul.msk.f32.gmra.mxu2 %vm175_vm0, %v4785_v50  ;;  %2976 = vmatmul.msk.f32.gmra.mxu3 %vm175_vm0, %v4785_v50 }
 0x589   :  { %2953 = vmatmul.msk.f32.gmra.mxu0 %vm175_vm0, %v4786_v47  ;;  %2961 = vmatmul.msk.f32.gmra.mxu1 %vm175_vm0, %v4786_v47 }
 0x58a   :  { %2969 = vmatmul.msk.f32.gmra.mxu2 %vm175_vm0, %v4786_v47  ;;  %2977 = vmatmul.msk.f32.gmra.mxu3 %vm175_vm0, %v4786_v47 }
 0x591   :  { %2978 = vmatmul.msk.f32.vlgmr.msrb.gmra.mxu0 %vm435_vm1, %v4001_v33  ;;  %2979 = vmatmul.msk.f32.vlgmr.msrb.gmra.mxu1 %vm435_vm1, %v4001_v33 }
 0x592   :  { %2980 = vmatmul.msk.f32.vlgmr.msrb.gmra.mxu2 %vm435_vm1, %v4001_v33  ;;  %2981 = vmatmul.msk.f32.vlgmr.msrb.gmra.mxu3 %vm435_vm1, %v4001_v33 }
 0x593   :  { %1919 = vmatpush.msrb.mxu0 %v4003_v13  ;;  %1939 = vmatpush.msrb.mxu1 %v4005_v56 }
 0x594   :  { %1959 = vmatpush.msrb.mxu2 %v4011_v14  ;;  %1979 = vmatpush.msrb.mxu3 %v4013_v58 }
 0x595   :  { %1920 = vmatpush.msrb.mxu0 %v4019_v23  ;;  %1940 = vmatpush.msrb.mxu1 %v4021_v61 }
 0x596   :  { %1960 = vmatpush.msrb.mxu2 %v4025_v8  ;;  %1980 = vmatpush.msrb.mxu3 %v4027_v53 }
 0x597   :  { %1921 = vmatpush.msrb.mxu0 %v4031_v0  ;;  %1941 = vmatpush.msrb.mxu1 %v4033_v10 }
 0x598   :  { %1961 = vmatpush.msrb.mxu2 %v4037_v12  ;;  %1981 = vmatpush.msrb.mxu3 %v4039_v9 }
 0x599   :  { %1922 = vmatpush.msrb.mxu0 %v4047_v55  ;;  %1942 = vmatpush.msrb.mxu1 %v4049_v3 }
 0x59a   :  { %1962 = vmatpush.msrb.mxu2 %v4055_v4  ;;  %1982 = vmatpush.msrb.mxu3 %v4057_v15 }
 0x59b   :  { %1923 = vmatpush.msrb.mxu0 %v4063_v1  ;;  %1943 = vmatpush.msrb.mxu1 %v4065_v6 }
 0x59c   :  { %1963 = vmatpush.msrb.mxu2 %v4069_v24  ;;  %1983 = vmatpush.msrb.mxu3 %v4071_v59 }
 0x59d   :  { %1924 = vmatpush.msrb.mxu0 %v4075_v62  ;;  %1944 = vmatpush.msrb.mxu1 %v4077_v5 }
 0x59e   :  { %1964 = vmatpush.msrb.mxu2 %v4081_v11  ;;  %1984 = vmatpush.msrb.mxu3 %v4083_v39 }
 0x59f   :  { %1925 = vmatpush.msrb.mxu0 %v4099_v40  ;;  %1945 = vmatpush.msrb.mxu1 %v4101_v41 }
 0x5a0   :  { %1965 = vmatpush.msrb.mxu2 %v4103_v37  ;;  %1985 = vmatpush.msrb.mxu3 %v4107_v38 }
 0x5a1   :  { %1926 = vmatpush.msrb.mxu0 %v4119_v43  ;;  %1946 = vmatpush.msrb.mxu1 %v4121_v44 }
 0x5a2   :  { %1966 = vmatpush.msrb.mxu2 %v4123_v45  ;;  %1986 = vmatpush.msrb.mxu3 %v4127_v46 }
 0x5ce   :  { %v1402_v2 = vpop.f32.mrf.mxu0  ;;  %v1443_v60 = vpop.f32.mrf.mxu1 }
 0x5d5   :  { %v4235_v48 = vpop.f32.mrf.mxu2  ;;  %v4237_v17 = vpop.f32.mrf.mxu3 }
 0x5d6   :  { %v1405_v29 = vpop.f32.mrf.mxu0  ;;  %v1446_v18 = vpop.f32.mrf.mxu1 }
 0x5d7   :  { %v4239_v19 = vadd.f32 %v1405_v29, %v1353_v16  ;;  %v4241_v20 = vadd.f32 %v1446_v18, %v1354_v52 }
 0x5dd   :  { %v1487_v22 = vpop.f32.mrf.mxu2  ;;  %v1528_v26 = vpop.f32.mrf.mxu3 }
 0x5de   :  { %v4248_v28 = vadd.f32 %v1487_v22, %v4243_v7  ;;  %v4251_v31 = vadd.f32 %v1528_v26, %v4245_v21  ;;  %v1408_v32 = vpop.f32.mrf.mxu0  ;;  %v1449_v33 = vpop.f32.mrf.mxu1 }
 0x5df   :  { %v4253_v34 = vadd.f32 %v1408_v32, %v1353_v16  ;;  %v4255_v35 = vadd.f32 %v1449_v33, %v1354_v52 }
 0x5e5   :  { %v1490_v36 = vpop.f32.mrf.mxu2  ;;  %v1531_v57 = vpop.f32.mrf.mxu3 }
 0x5e6   :  { %v4258_v25 = vadd.f32 %v1490_v36, %v4243_v7  ;;  %v4261_v54 = vadd.f32 %v1531_v57, %v4245_v21  ;;  %v1411_v30 = vpop.f32.mrf.mxu0  ;;  %v1452_v42 = vpop.f32.mrf.mxu1 }
 0x5e7   :  { %v4263_v49 = vadd.f32 %v1411_v30, %v1353_v16  ;;  %v4265_v63 = vadd.f32 %v1452_v42, %v1354_v52 }
 0x5e8   :  { %4787 = vst [vmem:[#allocation40_spill] sm:$0xff] %v4261_v54 }
 0x5e9   :  { %4788 = vst [vmem:[#allocation47_spill] sm:$0xff] %v4263_v49 }
 0x5ea   :  { %4789 = vst [vmem:[#allocation48_spill] sm:$0xff] %v4265_v63 }
 0x5ed   :  { %v1493_v50 = vpop.f32.mrf.mxu2  ;;  %v1534_v47 = vpop.f32.mrf.mxu3 }
 0x5ee   :  { %v4268_v51 = vadd.f32 %v1493_v50, %v4243_v7  ;;  %v4271_v29 = vadd.f32 %v1534_v47, %v4245_v21  ;;  %v1414_v18 = vpop.f32.mrf.mxu0  ;;  %v1455_v22 = vpop.f32.mrf.mxu1 }
 0x5ef   :  { %v4273_v26 = vadd.f32 %v1414_v18, %v1353_v16  ;;  %v4275_v32 = vadd.f32 %v1455_v22, %v1354_v52 }
 0x5f0   :  { %4790 = vst [vmem:[#allocation44_spill] sm:$0xff] %v4268_v51 }
 0x5f1   :  { %4791 = vst [vmem:[#allocation42_spill] sm:$0xff] %v4271_v29 }
 0x5f2   :  { %4792 = vst [vmem:[#allocation50_spill] sm:$0xff] %v4273_v26 }
 0x5f3   :  { %4793 = vst [vmem:[#allocation51_spill] sm:$0xff] %v4275_v32 }
 0x5f5   :  { %v1496_v33 = vpop.f32.mrf.mxu2  ;;  %v1537_v36 = vpop.f32.mrf.mxu3 }
 0x5f6   :  { %v4278_v57 = vadd.f32 %v1496_v33, %v4243_v7  ;;  %v4281_v30 = vadd.f32 %v1537_v36, %v4245_v21  ;;  %v1417_v42 = vpop.f32.mrf.mxu0  ;;  %v1458_v50 = vpop.f32.mrf.mxu1 }
 0x5f7   :  { %v4283_v51 = vadd.f32 %v1417_v42, %v1353_v16  ;;  %v4285_v47 = vadd.f32 %v1458_v50, %v1354_v52 }
 0x5f8   :  { %4794 = vst [vmem:[#allocation45_spill] sm:$0xff] %v4278_v57 }
 0x5f9   :  { %4795 = vst [vmem:[#allocation39_spill] sm:$0xff] %v4281_v30 }
 0x5fa   :  { %4796 = vst [vmem:[#allocation53_spill] sm:$0xff] %v4283_v51  ;;  %v1444_v51 = vadd.f32 %v1443_v60, %v1354_v52 }
 0x5fb   :  { %4797 = vst [vmem:[#allocation54_spill] sm:$0xff] %v4285_v47 }
 0x5fd   :  { %v1499_v29 = vpop.f32.mrf.mxu2  ;;  %v1540_v63 = vpop.f32.mrf.mxu3 }
 0x5fe   :  { %v4288_v18 = vadd.f32 %v1499_v29, %v4243_v7  ;;  %v4291_v22 = vadd.f32 %v1540_v63, %v4245_v21  ;;  %v1420_v32 = vpop.f32.mrf.mxu0  ;;  %v1461_v33 = vpop.f32.mrf.mxu1 }
 0x5ff   :  { %v4293_v57 = vadd.f32 %v1420_v32, %v1353_v16  ;;  %v4295_v36 = vadd.f32 %v1461_v33, %v1354_v52 }
 0x600   :  { %4798 = vst [vmem:[#allocation46_spill] sm:$0xff] %v4288_v18 }
 0x601   :  { %4799 = vst [vmem:[#allocation41_spill] sm:$0xff] %v4291_v22  ;;  %v1403_v22 = vadd.f32 %v1402_v2, %v1353_v16  ;;  %v1526_v2 = vadd.f32 %v4237_v17, %v4245_v21 }
 0x602   :  { %4800 = vst [vmem:[#allocation55_spill] sm:$0xff] %v4293_v57 }
 0x603   :  { %4801 = vst [vmem:[#allocation56_spill] sm:$0xff] %v4295_v36 }
 0x605   :  { %v1502_v30 = vpop.f32.mrf.mxu2  ;;  %v1543_v26 = vpop.f32.mrf.mxu3 }
 0x606   :  { %v4298_v42 = vadd.f32 %v1502_v30, %v4243_v7  ;;  %v4301_v50 = vadd.f32 %v1543_v26, %v4245_v21  ;;  %v1423_v47 = vpop.f32.mrf.mxu0  ;;  %v1464_v29 = vpop.f32.mrf.mxu1 }
 0x607   :  { %v4303_v18 = vadd.f32 %v1423_v47, %v1353_v16  ;;  %v4305_v63 = vadd.f32 %v1464_v29, %v1354_v52  ;;  %v1485_v47 = vadd.f32 %v4235_v48, %v4243_v7 }
 0x608   :  { %4802 = vst [vmem:[#allocation49_spill] sm:$0xff] %v4298_v42 }
 0x609   :  { %4803 = vst [vmem:[#allocation43_spill] sm:$0xff] %v4301_v50 }
 0x60d   :  { %v1505_v32 = vpop.f32.mrf.mxu2  ;;  %v1546_v57 = vpop.f32.mrf.mxu3 }
 0x60e   :  { %v4308_v33 = vadd.f32 %v1505_v32, %v4243_v7  ;;  %v4311_v36 = vadd.f32 %v1546_v57, %v4245_v21  ;;  %v1639_v30 = vpop.f32.mrf.mxu0  ;;  %v1659_v42 = vpop.f32.mrf.mxu1 }
 0x60f   :  { %v1702_v26 = vadd.f32 %v1639_v30, %v1403_v22  ;;  %v1703_v50 = vadd.f32 %v1659_v42, %v1444_v51 }
 0x610   :  { %4804 = vst [vmem:[#allocation57_spill] sm:$0xff] %v4311_v36 }
 0x611   :  { %v1706_v49 = vmul.f32 0.5, %v1702_v26  ;;  %v1710_v54 = vmul.f32 0.5, %v1703_v50 }
 0x613   :  { %3123 = vtanh.f32 %v1706_v49 }
 0x614   :  { %3125 = vtanh.f32 %v1710_v54 }
 0x615   :  { %v1679_v60 = vpop.f32.mrf.mxu2  ;;  %v1699_v16 = vpop.f32.mrf.mxu3 }
 0x616   :  { %v1704_v52 = vadd.f32 %v1679_v60, %v1485_v47  ;;  %v1705_v29 = vadd.f32 %v1699_v16, %v1526_v2 }
 0x618   :  { %3127 = vtanh.f32 %v1704_v52  ;;  %v1715_v57 = vmul.f32 0.5, %v1705_v29 }
 0x619   :  { %v3124_v32 = vpop.eup %3123 }
 0x61a   :  { %v3126_v36 = vpop.eup %3125  ;;  %v1708_v22 = vmul.f32 0.5, %v3124_v32  ;;  %3129 = vtanh.f32 %v1715_v57 }
 0x61b   :  { %v1712_v51 = vmul.f32 0.5, %v3126_v36 }
 0x61c   :  { %v1709_v42 = vadd.f32 0.5, %v1708_v22 }
 0x61d   :  { %v1713_v49 = vadd.f32 0.5, %v1712_v51 }
 0x61e   :  { %v3128_v50 = vpop.eup %3127 }
 0x61f   :  { %v1719_v48 = vmul.f32 %v1713_v49, %v3998_v27  ;;  %v1720_v7 = vmul.f32 %v3128_v50, %v1709_v42 }
 0x620   :  { %v3130_v30 = vpop.eup %3129 }
 0x621   :  { %v4318_v17 = vadd.f32 %v1720_v7, %v1719_v48  ;;  %v1717_v21 = vmul.f32 0.5, %v3130_v30 }
 0x623   :  { %3131 = vtanh.f32 %v4318_v17  ;;  %v1718_v54 = vadd.f32 0.5, %v1717_v21 }
 0x629   :  { %v3132_v26 = vpop.eup %3131 }
 0x62a   :  { %v4321_v47 = vmul.f32 %v3132_v26, %v1718_v54 }
 0x62c   :  { %2982 = vmatmul.msk.f32.vlgmr.msra.gmra.mxu0 %vm435_vm1, %v4321_v47  ;;  %2983 = vmatmul.msk.f32.vlgmr.msra.gmra.mxu1 %vm435_vm1, %v4321_v47 }
 0x62d   :  { %2984 = vmatmul.msk.f32.vlgmr.msra.gmra.mxu2 %vm435_vm1, %v4321_v47  ;;  %2985 = vmatmul.msk.f32.vlgmr.msra.gmra.mxu3 %vm435_vm1, %v4321_v47 }
 0x62e   :  { %2064 = vmatpush.msra.mxu0 %v4003_v13  ;;  %2084 = vmatpush.msra.mxu1 %v4005_v56 }
 0x62f   :  { %2104 = vmatpush.msra.mxu2 %v4011_v14  ;;  %2124 = vmatpush.msra.mxu3 %v4013_v58 }
 0x630   :  { %2065 = vmatpush.msra.mxu0 %v4019_v23  ;;  %2085 = vmatpush.msra.mxu1 %v4021_v61 }
 0x631   :  { %2105 = vmatpush.msra.mxu2 %v4025_v8  ;;  %2125 = vmatpush.msra.mxu3 %v4027_v53 }
 0x632   :  { %2066 = vmatpush.msra.mxu0 %v4031_v0  ;;  %2086 = vmatpush.msra.mxu1 %v4033_v10 }
 0x633   :  { %2106 = vmatpush.msra.mxu2 %v4037_v12  ;;  %2126 = vmatpush.msra.mxu3 %v4039_v9 }
 0x634   :  { %2067 = vmatpush.msra.mxu0 %v4047_v55  ;;  %2087 = vmatpush.msra.mxu1 %v4049_v3 }
 0x635   :  { %2107 = vmatpush.msra.mxu2 %v4055_v4  ;;  %2127 = vmatpush.msra.mxu3 %v4057_v15 }
 0x636   :  { %2068 = vmatpush.msra.mxu0 %v4063_v1  ;;  %2088 = vmatpush.msra.mxu1 %v4065_v6 }
 0x637   :  { %2108 = vmatpush.msra.mxu2 %v4069_v24  ;;  %2128 = vmatpush.msra.mxu3 %v4071_v59 }
 0x638   :  { %2069 = vmatpush.msra.mxu0 %v4075_v62  ;;  %2089 = vmatpush.msra.mxu1 %v4077_v5 }
 0x639   :  { %2109 = vmatpush.msra.mxu2 %v4081_v11  ;;  %2129 = vmatpush.msra.mxu3 %v4083_v39 }
 0x63a   :  { %2070 = vmatpush.msra.mxu0 %v4099_v40  ;;  %2090 = vmatpush.msra.mxu1 %v4101_v41 }
 0x63b   :  { %2110 = vmatpush.msra.mxu2 %v4103_v37  ;;  %2130 = vmatpush.msra.mxu3 %v4107_v38 }
 0x63c   :  { %2071 = vmatpush.msra.mxu0 %v4119_v43  ;;  %2091 = vmatpush.msra.mxu1 %v4121_v44 }
 0x63d   :  { %2111 = vmatpush.msra.mxu2 %v4123_v45  ;;  %2131 = vmatpush.msra.mxu3 %v4127_v46 }
 0x6a9   :  { %v1783_v27 = vpop.f32.mrf.mxu0  ;;  %v1803_v36 = vpop.f32.mrf.mxu1 }
 0x6aa   :  { %v1846_v2 = vadd.f32 %v1783_v27, %v4239_v19  ;;  %v1847_v60 = vadd.f32 %v1803_v36, %v4241_v20 }
 0x6ac   :  { %v1850_v16 = vmul.f32 0.5, %v1846_v2  ;;  %v1854_v52 = vmul.f32 0.5, %v1847_v60  ;;  %v4808_v60 = vld [vmem:[#allocation44_spill] sm:$0xff] }
 0x6ae   :  { %3133 = vtanh.f32 %v1850_v16 }
 0x6af   :  { %3135 = vtanh.f32 %v1854_v52  ;;  %v4809_v52 = vld [vmem:[#allocation42_spill] sm:$0xff] }
 0x6b0   :  { %v1823_v29 = vpop.f32.mrf.mxu2  ;;  %v1843_v57 = vpop.f32.mrf.mxu3 }
 0x6b1   :  { %v1848_v32 = vadd.f32 %v1823_v29, %v4248_v28  ;;  %v1849_v22 = vadd.f32 %v1843_v57, %v4251_v31 }
 0x6b3   :  { %3137 = vtanh.f32 %v1848_v32  ;;  %v1859_v51 = vmul.f32 0.5, %v1849_v22 }
 0x6b4   :  { %v3134_v42 = vpop.eup %3133 }
 0x6b5   :  { %v3136_v49 = vpop.eup %3135  ;;  %v1852_v50 = vmul.f32 0.5, %v3134_v42  ;;  %3139 = vtanh.f32 %v1859_v51 }
 0x6b6   :  { %v1856_v48 = vmul.f32 0.5, %v3136_v49 }
 0x6b7   :  { %v1853_v19 = vadd.f32 0.5, %v1852_v50 }
 0x6b8   :  { %v1857_v7 = vadd.f32 0.5, %v1856_v48 }
 0x6b9   :  { %v3138_v20 = vpop.eup %3137 }
 0x6ba   :  { %v1863_v30 = vmul.f32 %v1857_v7, %v4318_v17  ;;  %v1864_v21 = vmul.f32 %v3138_v20, %v1853_v19 }
 0x6bb   :  { %v3140_v54 = vpop.eup %3139 }
 0x6bc   :  { %v4368_v26 = vadd.f32 %v1864_v21, %v1863_v30  ;;  %v1861_v28 = vmul.f32 0.5, %v3140_v54 }
 0x6be   :  { %3141 = vtanh.f32 %v4368_v26  ;;  %v1862_v31 = vadd.f32 0.5, %v1861_v28 }
 0x6c4   :  { %v3142_v27 = vpop.eup %3141 }
 0x6c5   :  { %v4371_v36 = vmul.f32 %v3142_v27, %v1862_v31  ;;  %v4445_v31 = vld [vmem:[#allocation7 + $0xe0] sm:$0xff]  ;;  %v4447_v27 = vld [vmem:[#allocation7 + $0xe8] sm:$0xff] }
 0x6c7   :  { %2986 = vmatmul.msk.f32.vlgmr.msrb.gmra.mxu0 %vm435_vm1, %v4371_v36  ;;  %2987 = vmatmul.msk.f32.vlgmr.msrb.gmra.mxu1 %vm435_vm1, %v4371_v36 }
 0x6c8   :  { %2988 = vmatmul.msk.f32.vlgmr.msrb.gmra.mxu2 %vm435_vm1, %v4371_v36  ;;  %2989 = vmatmul.msk.f32.vlgmr.msrb.gmra.mxu3 %vm435_vm1, %v4371_v36 }
 0x6c9   :  { %2209 = vmatpush.msrb.mxu0 %v4003_v13  ;;  %2229 = vmatpush.msrb.mxu1 %v4005_v56 }
 0x6ca   :  { %2249 = vmatpush.msrb.mxu2 %v4011_v14  ;;  %2269 = vmatpush.msrb.mxu3 %v4013_v58 }
 0x6cb   :  { %2210 = vmatpush.msrb.mxu0 %v4019_v23  ;;  %2230 = vmatpush.msrb.mxu1 %v4021_v61 }
 0x6cc   :  { %2250 = vmatpush.msrb.mxu2 %v4025_v8  ;;  %2270 = vmatpush.msrb.mxu3 %v4027_v53 }
 0x6cd   :  { %2211 = vmatpush.msrb.mxu0 %v4031_v0  ;;  %2231 = vmatpush.msrb.mxu1 %v4033_v10  ;;  %v4805_v10 = vld [vmem:[#allocation40_spill] sm:$0xff] }
 0x6ce   :  { %2251 = vmatpush.msrb.mxu2 %v4037_v12  ;;  %2271 = vmatpush.msrb.mxu3 %v4039_v9 }
 0x6cf   :  { %2212 = vmatpush.msrb.mxu0 %v4047_v55  ;;  %2232 = vmatpush.msrb.mxu1 %v4049_v3 }
 0x6d0   :  { %2252 = vmatpush.msrb.mxu2 %v4055_v4  ;;  %2272 = vmatpush.msrb.mxu3 %v4057_v15 }
 0x6d1   :  { %2213 = vmatpush.msrb.mxu0 %v4063_v1  ;;  %2233 = vmatpush.msrb.mxu1 %v4065_v6 }
 0x6d2   :  { %2253 = vmatpush.msrb.mxu2 %v4069_v24  ;;  %2273 = vmatpush.msrb.mxu3 %v4071_v59 }
 0x6d3   :  { %2214 = vmatpush.msrb.mxu0 %v4075_v62  ;;  %2234 = vmatpush.msrb.mxu1 %v4077_v5 }
 0x6d4   :  { %2254 = vmatpush.msrb.mxu2 %v4081_v11  ;;  %2274 = vmatpush.msrb.mxu3 %v4083_v39 }
 0x6d5   :  { %2215 = vmatpush.msrb.mxu0 %v4099_v40  ;;  %2235 = vmatpush.msrb.mxu1 %v4101_v41 }
 0x6d6   :  { %2255 = vmatpush.msrb.mxu2 %v4103_v37  ;;  %2275 = vmatpush.msrb.mxu3 %v4107_v38 }
 0x6d7   :  { %2216 = vmatpush.msrb.mxu0 %v4119_v43  ;;  %2236 = vmatpush.msrb.mxu1 %v4121_v44  ;;  %v4806_v44 = vld [vmem:[#allocation47_spill] sm:$0xff] }
 0x6d8   :  { %2256 = vmatpush.msrb.mxu2 %v4123_v45  ;;  %2276 = vmatpush.msrb.mxu3 %v4127_v46  ;;  %v4807_v46 = vld [vmem:[#allocation48_spill] sm:$0xff] }
 0x744   :  { %v1928_v13 = vpop.f32.mrf.mxu0  ;;  %v1948_v56 = vpop.f32.mrf.mxu1 }
 0x745   :  { %v1991_v14 = vadd.f32 %v1928_v13, %v4253_v34  ;;  %v1992_v58 = vadd.f32 %v1948_v56, %v4255_v35  ;;  %v4449_v13 = vld [vmem:[#allocation7 + $0xf0] sm:$0xff]  ;;  %v4453_v56 = vld [vmem:[#allocation7 + $0xf8] sm:$0xff] }
 0x747   :  { %v1995_v23 = vmul.f32 0.5, %v1991_v14  ;;  %v1999_v61 = vmul.f32 0.5, %v1992_v58  ;;  %v4457_v14 = vld [vmem:[#allocation7 + $0xc0] sm:$0xff]  ;;  %v4459_v58 = vld [vmem:[#allocation7 + $0xc8] sm:$0xff] }
 0x749   :  { %3143 = vtanh.f32 %v1995_v23  ;;  %v4461_v23 = vld [vmem:[#allocation7 + $0xd0] sm:$0xff] }
 0x74a   :  { %3145 = vtanh.f32 %v1999_v61  ;;  %v4465_v61 = vld [vmem:[#allocation7 + $0xd8] sm:$0xff] }
 0x74b   :  { %v1968_v8 = vpop.f32.mrf.mxu2  ;;  %v1988_v53 = vpop.f32.mrf.mxu3 }
 0x74c   :  { %v1993_v0 = vadd.f32 %v1968_v8, %v4258_v25  ;;  %v1994_v12 = vadd.f32 %v1988_v53, %v4805_v10  ;;  %v4469_v8 = vld [vmem:[#allocation7 + $0xa0] sm:$0xff]  ;;  %v4471_v53 = vld [vmem:[#allocation7 + $0xa8] sm:$0xff]  ;;  %v4477_v10 = vld [vmem:[#allocation7 + $0xb8] sm:$0xff] }
 0x74e   :  { %3147 = vtanh.f32 %v1993_v0  ;;  %v2004_v9 = vmul.f32 0.5, %v1994_v12  ;;  %v4473_v0 = vld [vmem:[#allocation7 + $0xb0] sm:$0xff]  ;;  %v4481_v12 = vld [vmem:[#allocation7 + $0x80] sm:$0xff] }
 0x74f   :  { %v3144_v55 = vpop.eup %3143 }
 0x750   :  { %v3146_v3 = vpop.eup %3145  ;;  %v1997_v4 = vmul.f32 0.5, %v3144_v55  ;;  %3149 = vtanh.f32 %v2004_v9  ;;  %v4483_v9 = vld [vmem:[#allocation7 + $0x88] sm:$0xff]  ;;  %v4485_v55 = vld [vmem:[#allocation7 + $0x90] sm:$0xff] }
 0x751   :  { %v2001_v15 = vmul.f32 0.5, %v3146_v3  ;;  %v4489_v3 = vld [vmem:[#allocation7 + $0x98] sm:$0xff] }
 0x752   :  { %v1998_v1 = vadd.f32 0.5, %v1997_v4  ;;  %v4493_v4 = vld [vmem:[#allocation7 + $0x60] sm:$0xff] }
 0x753   :  { %v2002_v6 = vadd.f32 0.5, %v2001_v15  ;;  %v4495_v15 = vld [vmem:[#allocation7 + $0x68] sm:$0xff] }
 0x754   :  { %v3148_v24 = vpop.eup %3147 }
 0x755   :  { %v2008_v59 = vmul.f32 %v2002_v6, %v4368_v26  ;;  %v2009_v62 = vmul.f32 %v3148_v24, %v1998_v1  ;;  %v4497_v1 = vld [vmem:[#allocation7 + $0x70] sm:$0xff]  ;;  %v4501_v6 = vld [vmem:[#allocation7 + $0x78] sm:$0xff]  ;;  %v4505_v24 = vld [vmem:[#allocation7 + $0x40] sm:$0xff] }
 0x756   :  { %v3150_v5 = vpop.eup %3149 }
 0x757   :  { %v2010_v11 = vadd.f32 %v2009_v62, %v2008_v59  ;;  %v2006_v39 = vmul.f32 0.5, %v3150_v5  ;;  %v4507_v59 = vld [vmem:[#allocation7 + $0x48] sm:$0xff]  ;;  %v4509_v62 = vld [vmem:[#allocation7 + $0x50] sm:$0xff]  ;;  %v4513_v5 = vld [vmem:[#allocation7 + $0x58] sm:$0xff] }
 0x759   :  { %3151 = vtanh.f32 %v2010_v11  ;;  %v2007_v40 = vadd.f32 0.5, %v2006_v39  ;;  %v4519_v39 = vld [vmem:[#allocation7 + $0x28] sm:$0xff] }
 0x75f   :  { %v3152_v41 = vpop.eup %3151 }
 0x760   :  { %v4418_v37 = vmul.f32 %v3152_v41, %v2007_v40  ;;  %v4521_v40 = vld [vmem:[#allocation7 + $0x30] sm:$0xff]  ;;  %v4525_v41 = vld [vmem:[#allocation7 + $0x38] sm:$0xff] }
 0x762   :  { %2990 = vmatmul.msk.f32.vlgmr.msra.gmra.mxu0 %vm435_vm1, %v4418_v37  ;;  %2991 = vmatmul.msk.f32.vlgmr.msra.gmra.mxu1 %vm435_vm1, %v4418_v37 }
 0x763   :  { %2992 = vmatmul.msk.f32.vlgmr.msra.gmra.mxu2 %vm435_vm1, %v4418_v37  ;;  %2993 = vmatmul.msk.f32.vlgmr.msra.gmra.mxu3 %vm435_vm1, %v4418_v37 }
 0x764   :  { %2354 = vmatpush.msra.mxu0 %v4445_v31  ;;  %2374 = vmatpush.msra.mxu1 %v4447_v27 }
 0x765   :  { %2394 = vmatpush.msra.mxu2 %v4449_v13  ;;  %2414 = vmatpush.msra.mxu3 %v4453_v56 }
 0x766   :  { %2355 = vmatpush.msra.mxu0 %v4457_v14  ;;  %2375 = vmatpush.msra.mxu1 %v4459_v58 }
 0x767   :  { %2395 = vmatpush.msra.mxu2 %v4461_v23  ;;  %2415 = vmatpush.msra.mxu3 %v4465_v61 }
 0x768   :  { %2356 = vmatpush.msra.mxu0 %v4469_v8  ;;  %2376 = vmatpush.msra.mxu1 %v4471_v53 }
 0x769   :  { %2396 = vmatpush.msra.mxu2 %v4473_v0  ;;  %2416 = vmatpush.msra.mxu3 %v4477_v10 }
 0x76a   :  { %2357 = vmatpush.msra.mxu0 %v4481_v12  ;;  %2377 = vmatpush.msra.mxu1 %v4483_v9 }
 0x76b   :  { %2397 = vmatpush.msra.mxu2 %v4485_v55  ;;  %2417 = vmatpush.msra.mxu3 %v4489_v3 }
 0x76c   :  { %2358 = vmatpush.msra.mxu0 %v4493_v4  ;;  %2378 = vmatpush.msra.mxu1 %v4495_v15 }
 0x76d   :  { %2398 = vmatpush.msra.mxu2 %v4497_v1  ;;  %2418 = vmatpush.msra.mxu3 %v4501_v6 }
 0x76e   :  { %2359 = vmatpush.msra.mxu0 %v4505_v24  ;;  %2379 = vmatpush.msra.mxu1 %v4507_v59 }
 0x76f   :  { %2399 = vmatpush.msra.mxu2 %v4509_v62  ;;  %2419 = vmatpush.msra.mxu3 %v4513_v5 }
 0x770   :  { %2380 = vmatpush.msra.mxu1 %v4519_v39 }
 0x771   :  { %2400 = vmatpush.msra.mxu2 %v4521_v40  ;;  %2420 = vmatpush.msra.mxu3 %v4525_v41 }
 0x7df   :  { %v2073_v38 = vpop.f32.mrf.mxu0  ;;  %v2093_v43 = vpop.f32.mrf.mxu1 }
 0x7e0   :  { %v2136_v45 = vadd.f32 %v2073_v38, %v4806_v44  ;;  %v2137_v34 = vadd.f32 %v2093_v43, %v4807_v46  ;;  %v4529_v38 = vld [vmem:[#allocation7] sm:$0xff]  ;;  %v4531_v43 = vld [vmem:[#allocation7 + $0x8] sm:$0xff]  ;;  %v4533_v44 = vld [vmem:[#allocation7 + $0x10] sm:$0xff] }
 0x7e1   :  { %2381 = vmatpush.msra.mxu1 %v4531_v43  ;;  %2401 = vmatpush.msra.mxu2 %v4533_v44 }
 0x7e2   :  { %v2140_v35 = vmul.f32 0.5, %v2136_v45  ;;  %v2144_v25 = vmul.f32 0.5, %v2137_v34  ;;  %v4537_v45 = vld [vmem:[#allocation7 + $0x18] sm:$0xff] }
 0x7e3   :  { %2421 = vmatpush.msra.mxu3 %v4537_v45 }
 0x7e4   :  { %3153 = vtanh.f32 %v2140_v35  ;;  %v4810_v35 = vld [vmem:[#allocation50_spill] sm:$0xff] }
 0x7e5   :  { %3155 = vtanh.f32 %v2144_v25 }
 0x7e6   :  { %v2113_v17 = vpop.f32.mrf.mxu2  ;;  %v2133_v2 = vpop.f32.mrf.mxu3 }
 0x7e7   :  { %v2138_v16 = vadd.f32 %v2113_v17, %v4808_v60  ;;  %v2139_v29 = vadd.f32 %v2133_v2, %v4809_v52  ;;  %v4811_v17 = vld [vmem:[#allocation51_spill] sm:$0xff] }
 0x7e9   :  { %3157 = vtanh.f32 %v2138_v16  ;;  %v2149_v57 = vmul.f32 0.5, %v2139_v29 }
 0x7ea   :  { %v3154_v32 = vpop.eup %3153 }
 0x7eb   :  { %v3156_v22 = vpop.eup %3155  ;;  %v2142_v51 = vmul.f32 0.5, %v3154_v32  ;;  %3159 = vtanh.f32 %v2149_v57  ;;  %v4812_v57 = vld [vmem:[#allocation45_spill] sm:$0xff] }
 0x7ec   :  { %v2146_v42 = vmul.f32 0.5, %v3156_v22  ;;  %v4813_v22 = vld [vmem:[#allocation39_spill] sm:$0xff] }
 0x7ed   :  { %v2143_v49 = vadd.f32 0.5, %v2142_v51 }
 0x7ee   :  { %v2147_v50 = vadd.f32 0.5, %v2146_v42 }
 0x7ef   :  { %v3158_v48 = vpop.eup %3157 }
 0x7f0   :  { %v2153_v19 = vmul.f32 %v2147_v50, %v2010_v11  ;;  %v2154_v7 = vmul.f32 %v3158_v48, %v2143_v49  ;;  %v4517_v11 = vld [vmem:[#allocation7 + $0x20] sm:$0xff] }
 0x7f1   :  { %v3160_v20 = vpop.eup %3159  ;;  %2360 = vmatpush.msra.mxu0 %v4517_v11 }
 0x7f2   :  { %v4432_v30 = vadd.f32 %v2154_v7, %v2153_v19  ;;  %v2151_v21 = vmul.f32 0.5, %v3160_v20 }
 0x7f3   :  { %2361 = vmatpush.msra.mxu0 %v4529_v38 }
 0x7f4   :  { %3161 = vtanh.f32 %v4432_v30  ;;  %v2152_v54 = vadd.f32 0.5, %v2151_v21 }
 0x7fa   :  { %v3162_v26 = vpop.eup %3161 }
 0x7fb   :  { %v4435_v28 = vmul.f32 %v3162_v26, %v2152_v54 }
 0x7fd   :  { %2994 = vmatmul.msk.f32.vlgmr.msrb.gmra.mxu0 %vm435_vm1, %v4435_v28  ;;  %2995 = vmatmul.msk.f32.vlgmr.msrb.gmra.mxu1 %vm435_vm1, %v4435_v28 }
 0x7fe   :  { %2996 = vmatmul.msk.f32.vlgmr.msrb.gmra.mxu2 %vm435_vm1, %v4435_v28  ;;  %2997 = vmatmul.msk.f32.vlgmr.msrb.gmra.mxu3 %vm435_vm1, %v4435_v28 }
 0x7ff   :  { %2499 = vmatpush.msrb.mxu0 %v4445_v31  ;;  %2519 = vmatpush.msrb.mxu1 %v4447_v27 }
 0x800   :  { %2539 = vmatpush.msrb.mxu2 %v4449_v13  ;;  %2559 = vmatpush.msrb.mxu3 %v4453_v56 }
 0x801   :  { %2500 = vmatpush.msrb.mxu0 %v4457_v14  ;;  %2520 = vmatpush.msrb.mxu1 %v4459_v58 }
 0x802   :  { %2540 = vmatpush.msrb.mxu2 %v4461_v23  ;;  %2560 = vmatpush.msrb.mxu3 %v4465_v61 }
 0x803   :  { %2501 = vmatpush.msrb.mxu0 %v4469_v8  ;;  %2521 = vmatpush.msrb.mxu1 %v4471_v53 }
 0x804   :  { %2541 = vmatpush.msrb.mxu2 %v4473_v0  ;;  %2561 = vmatpush.msrb.mxu3 %v4477_v10 }
 0x805   :  { %2502 = vmatpush.msrb.mxu0 %v4481_v12  ;;  %2522 = vmatpush.msrb.mxu1 %v4483_v9 }
 0x806   :  { %2542 = vmatpush.msrb.mxu2 %v4485_v55  ;;  %2562 = vmatpush.msrb.mxu3 %v4489_v3 }
 0x807   :  { %2503 = vmatpush.msrb.mxu0 %v4493_v4  ;;  %2523 = vmatpush.msrb.mxu1 %v4495_v15 }
 0x808   :  { %2543 = vmatpush.msrb.mxu2 %v4497_v1  ;;  %2563 = vmatpush.msrb.mxu3 %v4501_v6 }
 0x809   :  { %2504 = vmatpush.msrb.mxu0 %v4505_v24  ;;  %2524 = vmatpush.msrb.mxu1 %v4507_v59 }
 0x80a   :  { %2544 = vmatpush.msrb.mxu2 %v4509_v62  ;;  %2564 = vmatpush.msrb.mxu3 %v4513_v5 }
 0x80b   :  { %2505 = vmatpush.msrb.mxu0 %v4517_v11  ;;  %2525 = vmatpush.msrb.mxu1 %v4519_v39 }
 0x80c   :  { %2545 = vmatpush.msrb.mxu2 %v4521_v40  ;;  %2565 = vmatpush.msrb.mxu3 %v4525_v41 }
 0x80d   :  { %2506 = vmatpush.msrb.mxu0 %v4529_v38  ;;  %2526 = vmatpush.msrb.mxu1 %v4531_v43 }
 0x80e   :  { %2546 = vmatpush.msrb.mxu2 %v4533_v44  ;;  %2566 = vmatpush.msrb.mxu3 %v4537_v45 }
 0x87a   :  { %v2218_v46 = vpop.f32.mrf.mxu0  ;;  %v2238_v34 = vpop.f32.mrf.mxu1 }
 0x87b   :  { %v2281_v25 = vadd.f32 %v2218_v46, %v4810_v35  ;;  %v2282_v2 = vadd.f32 %v2238_v34, %v4811_v17 }
 0x87d   :  { %v2285_v60 = vmul.f32 0.5, %v2281_v25  ;;  %v2289_v16 = vmul.f32 0.5, %v2282_v2 }
 0x87f   :  { %3163 = vtanh.f32 %v2285_v60  ;;  %v2760_v60 = vld [vmem:[%s4722_s8 + $0x60] sm:$0xff] }
 0x880   :  { %3165 = vtanh.f32 %v2289_v16  ;;  %v2759_v16 = vld [vmem:[%s4722_s8 + $0x58] sm:$0xff] }
 0x881   :  { %v2258_v52 = vpop.f32.mrf.mxu2  ;;  %v2278_v29 = vpop.f32.mrf.mxu3 }
 0x882   :  { %v2283_v32 = vadd.f32 %v2258_v52, %v4812_v57  ;;  %v2284_v51 = vadd.f32 %v2278_v29, %v4813_v22  ;;  %v2758_v52 = vld [vmem:[%s4722_s8 + $0x50] sm:$0xff]  ;;  %v2757_v29 = vld [vmem:[%s4722_s8 + $0x48] sm:$0xff]  ;;  %v2756_v57 = vld [vmem:[%s4722_s8 + $0x40] sm:$0xff] }
 0x883   :  { %v2754_v22 = vld [vmem:[%s4722_s8 + $0x30] sm:$0xff] }
 0x884   :  { %3167 = vtanh.f32 %v2283_v32  ;;  %v2294_v42 = vmul.f32 0.5, %v2284_v51  ;;  %v2755_v32 = vld [vmem:[%s4722_s8 + $0x38] sm:$0xff]  ;;  %v2753_v51 = vld [vmem:[%s4722_s8 + $0x28] sm:$0xff] }
 0x885   :  { %v3164_v49 = vpop.eup %3163 }
 0x886   :  { %v3166_v50 = vpop.eup %3165  ;;  %v2287_v48 = vmul.f32 0.5, %v3164_v49  ;;  %3169 = vtanh.f32 %v2294_v42  ;;  %v2752_v42 = vld [vmem:[%s4722_s8 + $0x20] sm:$0xff]  ;;  %v2751_v49 = vld [vmem:[%s4722_s8 + $0x18] sm:$0xff] }
 0x887   :  { %v2291_v19 = vmul.f32 0.5, %v3166_v50  ;;  %v2750_v50 = vld [vmem:[%s4722_s8 + $0x10] sm:$0xff] }
 0x888   :  { %v2288_v7 = vadd.f32 0.5, %v2287_v48 }
 0x889   :  { %v2292_v20 = vadd.f32 0.5, %v2291_v19 }
 0x88a   :  { %v3168_v21 = vpop.eup %3167 }
 0x88b   :  { %v2298_v54 = vmul.f32 %v2292_v20, %v4432_v30  ;;  %v2299_v26 = vmul.f32 %v3168_v21, %v2288_v7  ;;  %v4818_v7 = vld [vmem:[#allocation55_spill] sm:$0xff]  ;;  %v4819_v21 = vld [vmem:[#allocation56_spill] sm:$0xff] }
 0x88c   :  { %v3170_v46 = vpop.eup %3169 }
 0x88d   :  { %v4578_v34 = vadd.f32 %v2299_v26, %v2298_v54  ;;  %v2296_v35 = vmul.f32 0.5, %v3170_v46  ;;  %v2749_v26 = vld [vmem:[%s4722_s8 + $0x8] sm:$0xff] }
 0x88f   :  { %3171 = vtanh.f32 %v4578_v34  ;;  %v2297_v25 = vadd.f32 0.5, %v2296_v35  ;;  %v2748_v35 = vld [vmem:[%s4722_s8] sm:$0xff] }
 0x895   :  { %v3172_v17 = vpop.eup %3171 }
 0x896   :  { %v4581_v2 = vmul.f32 %v3172_v17, %v2297_v25 }
 0x898   :  { %2998 = vmatmul.msk.f32.vlgmr.msra.gmra.mxu0 %vm435_vm1, %v4581_v2  ;;  %2999 = vmatmul.msk.f32.vlgmr.msra.gmra.mxu1 %vm435_vm1, %v4581_v2 }
 0x899   :  { %3000 = vmatmul.msk.f32.vlgmr.msra.gmra.mxu2 %vm435_vm1, %v4581_v2  ;;  %3001 = vmatmul.msk.f32.vlgmr.msra.gmra.mxu3 %vm435_vm1, %v4581_v2 }
 0x89a   :  { %2644 = vmatpush.msra.mxu0 %v4445_v31  ;;  %2664 = vmatpush.msra.mxu1 %v4447_v27  ;;  %v4814_v27 = vld [vmem:[#allocation53_spill] sm:$0xff] }
 0x89b   :  { %2684 = vmatpush.msra.mxu2 %v4449_v13  ;;  %2704 = vmatpush.msra.mxu3 %v4453_v56  ;;  %v4815_v56 = vld [vmem:[#allocation54_spill] sm:$0xff] }
 0x89c   :  { %2645 = vmatpush.msra.mxu0 %v4457_v14  ;;  %2665 = vmatpush.msra.mxu1 %v4459_v58 }
 0x89d   :  { %2685 = vmatpush.msra.mxu2 %v4461_v23  ;;  %2705 = vmatpush.msra.mxu3 %v4465_v61 }
 0x89e   :  { %2646 = vmatpush.msra.mxu0 %v4469_v8  ;;  %2666 = vmatpush.msra.mxu1 %v4471_v53  ;;  %v4816_v53 = vld [vmem:[#allocation46_spill] sm:$0xff] }
 0x89f   :  { %2686 = vmatpush.msra.mxu2 %v4473_v0  ;;  %2706 = vmatpush.msra.mxu3 %v4477_v10  ;;  %v4817_v10 = vld [vmem:[#allocation41_spill] sm:$0xff] }
 0x8a0   :  { %2647 = vmatpush.msra.mxu0 %v4481_v12  ;;  %2667 = vmatpush.msra.mxu1 %v4483_v9 }
 0x8a1   :  { %2687 = vmatpush.msra.mxu2 %v4485_v55  ;;  %2707 = vmatpush.msra.mxu3 %v4489_v3 }
 0x8a2   :  { %2648 = vmatpush.msra.mxu0 %v4493_v4  ;;  %2668 = vmatpush.msra.mxu1 %v4495_v15 }
 0x8a3   :  { %2688 = vmatpush.msra.mxu2 %v4497_v1  ;;  %2708 = vmatpush.msra.mxu3 %v4501_v6 }
 0x8a4   :  { %2649 = vmatpush.msra.mxu0 %v4505_v24  ;;  %2669 = vmatpush.msra.mxu1 %v4507_v59 }
 0x8a5   :  { %2689 = vmatpush.msra.mxu2 %v4509_v62  ;;  %2709 = vmatpush.msra.mxu3 %v4513_v5 }
 0x8a6   :  { %2650 = vmatpush.msra.mxu0 %v4517_v11  ;;  %2670 = vmatpush.msra.mxu1 %v4519_v39 }
 0x8a7   :  { %2690 = vmatpush.msra.mxu2 %v4521_v40  ;;  %2710 = vmatpush.msra.mxu3 %v4525_v41 }
 0x8a8   :  { %2651 = vmatpush.msra.mxu0 %v4529_v38  ;;  %2671 = vmatpush.msra.mxu1 %v4531_v43  ;;  %v2763_v43 = vld [vmem:[%s4722_s8 + $0x78] sm:$0xff] }
 0x8a9   :  { %2691 = vmatpush.msra.mxu2 %v4533_v44  ;;  %2711 = vmatpush.msra.mxu3 %v4537_v45  ;;  %v2762_v44 = vld [vmem:[%s4722_s8 + $0x70] sm:$0xff]  ;;  %v2761_v45 = vld [vmem:[%s4722_s8 + $0x68] sm:$0xff] }
 0x915   :  { %v2363_v30 = vpop.f32.mrf.mxu0  ;;  %v2383_v31 = vpop.f32.mrf.mxu1 }
 0x916   :  { %v2426_v13 = vadd.f32 %v2363_v30, %v4814_v27  ;;  %v2427_v14 = vadd.f32 %v2383_v31, %v4815_v56  ;;  %v4820_v30 = vld [vmem:[#allocation49_spill] sm:$0xff]  ;;  %v4821_v27 = vld [vmem:[#allocation43_spill] sm:$0xff] }
 0x918   :  { %v2430_v58 = vmul.f32 0.5, %v2426_v13  ;;  %v2434_v23 = vmul.f32 0.5, %v2427_v14 }
 0x91a   :  { %3173 = vtanh.f32 %v2430_v58 }
 0x91b   :  { %3175 = vtanh.f32 %v2434_v23 }
 0x91c   :  { %v2403_v61 = vpop.f32.mrf.mxu2  ;;  %v2423_v8 = vpop.f32.mrf.mxu3 }
 0x91d   :  { %v2428_v0 = vadd.f32 %v2403_v61, %v4816_v53  ;;  %v2429_v12 = vadd.f32 %v2423_v8, %v4817_v10 }
 0x91f   :  { %3177 = vtanh.f32 %v2428_v0  ;;  %v2439_v9 = vmul.f32 0.5, %v2429_v12 }
 0x920   :  { %v3174_v55 = vpop.eup %3173 }
 0x921   :  { %v3176_v3 = vpop.eup %3175  ;;  %v2432_v4 = vmul.f32 0.5, %v3174_v55  ;;  %3179 = vtanh.f32 %v2439_v9 }
 0x922   :  { %v2436_v15 = vmul.f32 0.5, %v3176_v3 }
 0x923   :  { %v2433_v1 = vadd.f32 0.5, %v2432_v4 }
 0x924   :  { %v2437_v6 = vadd.f32 0.5, %v2436_v15 }
 0x925   :  { %v3178_v24 = vpop.eup %3177 }
 0x926   :  { %v2443_v59 = vmul.f32 %v2437_v6, %v4578_v34  ;;  %v2444_v62 = vmul.f32 %v3178_v24, %v2433_v1 }
 0x927   :  { %v3180_v5 = vpop.eup %3179 }
 0x928   :  { %v4628_v11 = vadd.f32 %v2444_v62, %v2443_v59  ;;  %v2441_v39 = vmul.f32 0.5, %v3180_v5 }
 0x92a   :  { %3181 = vtanh.f32 %v4628_v11  ;;  %v2442_v40 = vadd.f32 0.5, %v2441_v39 }
 0x930   :  { %v3182_v41 = vpop.eup %3181 }
 0x931   :  { %v4631_v38 = vmul.f32 %v3182_v41, %v2442_v40 }
 0x933   :  { %3002 = vmatmul.msk.f32.vlgmr.msrb.gmra.mxu0 %vm435_vm1, %v4631_v38  ;;  %3003 = vmatmul.msk.f32.vlgmr.msrb.gmra.mxu1 %vm435_vm1, %v4631_v38 }
 0x934   :  { %3004 = vmatmul.msk.f32.vlgmr.msrb.gmra.mxu2 %vm435_vm1, %v4631_v38  ;;  %3005 = vmatmul.msk.f32.vlgmr.msrb.gmra.mxu3 %vm435_vm1, %v4631_v38 }
 0x935   :  { %2768 = vmatpush.msrb.mxu0 %v2763_v43 }
 0x937   :  { %2769 = vmatpush.msrb.mxu0 %v2762_v44 }
 0x939   :  { %2770 = vmatpush.msrb.mxu0 %v2761_v45 }
 0x93b   :  { %2771 = vmatpush.msrb.mxu0 %v2760_v60 }
 0x93d   :  { %2772 = vmatpush.msrb.mxu0 %v2759_v16 }
 0x93f   :  { %2773 = vmatpush.msrb.mxu0 %v2758_v52 }
 0x941   :  { %2774 = vmatpush.msrb.mxu0 %v2757_v29 }
 0x943   :  { %2775 = vmatpush.msrb.mxu0 %v2756_v57 }
 0x945   :  { %2776 = vmatpush.msrb.mxu0 %v2755_v32 }
 0x947   :  { %2777 = vmatpush.msrb.mxu0 %v2754_v22 }
 0x949   :  { %2778 = vmatpush.msrb.mxu0 %v2753_v51 }
 0x94b   :  { %2779 = vmatpush.msrb.mxu0 %v2752_v42 }
 0x94d   :  { %2780 = vmatpush.msrb.mxu0 %v2751_v49 }
 0x94f   :  { %2781 = vmatpush.msrb.mxu0 %v2750_v50 }
 0x951   :  { %2782 = vmatpush.msrb.mxu0 %v2749_v26 }
 0x953   :  { %2783 = vmatpush.msrb.mxu0 %v2748_v35 }
 0x9b0   :  { %v2508_v48 = vpop.f32.mrf.mxu0  ;;  %v2528_v19 = vpop.f32.mrf.mxu1 }
 0x9b1   :  { %v2571_v20 = vadd.f32 %v2508_v48, %v4818_v7  ;;  %v2572_v54 = vadd.f32 %v2528_v19, %v4819_v21 }
 0x9b3   :  { %v2575_v46 = vmul.f32 0.5, %v2571_v20  ;;  %v2579_v34 = vmul.f32 0.5, %v2572_v54 }
 0x9b5   :  { %3183 = vtanh.f32 %v2575_v46 }
 0x9b6   :  { %3185 = vtanh.f32 %v2579_v34 }
 0x9b7   :  { %v2548_v25 = vpop.f32.mrf.mxu2  ;;  %v2568_v17 = vpop.f32.mrf.mxu3 }
 0x9b8   :  { %v2573_v31 = vadd.f32 %v2548_v25, %v4820_v30  ;;  %v2574_v13 = vadd.f32 %v2568_v17, %v4821_v27 }
 0x9ba   :  { %3187 = vtanh.f32 %v2573_v31  ;;  %v2584_v56 = vmul.f32 0.5, %v2574_v13 }
 0x9bb   :  { %v3184_v14 = vpop.eup %3183 }
 0x9bc   :  { %v3186_v58 = vpop.eup %3185  ;;  %v2577_v23 = vmul.f32 0.5, %v3184_v14  ;;  %3189 = vtanh.f32 %v2584_v56 }
 0x9bd   :  { %v2581_v61 = vmul.f32 0.5, %v3186_v58 }
 0x9be   :  { %v2578_v8 = vadd.f32 0.5, %v2577_v23 }
 0x9bf   :  { %v2582_v53 = vadd.f32 0.5, %v2581_v61 }
 0x9c0   :  { %v3188_v0 = vpop.eup %3187 }
 0x9c1   :  { %v2588_v10 = vmul.f32 %v2582_v53, %v4628_v11  ;;  %v2589_v12 = vmul.f32 %v3188_v0, %v2578_v8 }
 0x9c2   :  { %v3190_v9 = vpop.eup %3189 }
 0x9c3   :  { %v2590_v55 = vadd.f32 %v2589_v12, %v2588_v10  ;;  %v2586_v3 = vmul.f32 0.5, %v3190_v9 }
 0x9c5   :  { %3191 = vtanh.f32 %v2590_v55  ;;  %v2587_v4 = vadd.f32 0.5, %v2586_v3 }
 0x9cb   :  { %v3192_v15 = vpop.eup %3191 }
 0x9cc   :  { %v2592_v1 = vmul.f32 %v3192_v15, %v2587_v4 }
 0x9ce   :  { %3006 = vmatmul.msk.f32.vlgmr.msra.gmra.mxu0 %vm435_vm1, %v2592_v1  ;;  %3007 = vmatmul.msk.f32.vlgmr.msra.gmra.mxu1 %vm435_vm1, %v2592_v1 }
 0x9cf   :  { %3008 = vmatmul.msk.f32.vlgmr.msra.gmra.mxu2 %vm435_vm1, %v2592_v1  ;;  %3009 = vmatmul.msk.f32.vlgmr.msra.gmra.mxu3 %vm435_vm1, %v2592_v1 }
 0x9d6   :  { %2784 = vmatmul.f32.vlgmr.msrb.gmra.mxu0 %v4321_v47  ;;  %v3122_v47 = vld [vmem:[%s4723_s9] ss:$0 sm:$0xff]  ;;  %s3344_s9 = smov [#allocation15]  }
 0x9d7   :  { %s2821_s25 = sshll.u32 %s3344_s9, 4  ;;  %s2822_s25 = int_to_ptr.vmem [resolvable:$true] %s2821_s25 }
 0x9de   :  { %2787 = vmatmul.f32.gmra.mxu0 %v4371_v36 }
 0x9e6   :  { %2790 = vmatmul.f32.gmra.mxu0 %v4418_v37 }
 0x9ee   :  { %2793 = vmatmul.f32.gmra.mxu0 %v4435_v28 }
 0x9f6   :  { %2796 = vmatmul.f32.gmra.mxu0 %v4581_v2  ;;  %v4822_v2 = vld [vmem:[#allocation57_spill] sm:$0xff] }
 0x9fe   :  { %2799 = vmatmul.f32.gmra.mxu0 %v4631_v38 }
 0xa06   :  { %2802 = vmatmul.f32.gmra.mxu0 %v2592_v1 }
 0xa4b   :  { %v2653_v6 = vpop.f32.mrf.mxu0  ;;  %v2673_v24 = vpop.f32.mrf.mxu1 }
 0xa4c   :  { %v2716_v59 = vadd.f32 %v2653_v6, %v4303_v18  ;;  %v2717_v62 = vadd.f32 %v2673_v24, %v4305_v63 }
 0xa4e   :  { %v2720_v5 = vmul.f32 0.5, %v2716_v59  ;;  %v2724_v11 = vmul.f32 0.5, %v2717_v62 }
 0xa50   :  { %3193 = vtanh.f32 %v2720_v5 }
 0xa51   :  { %3195 = vtanh.f32 %v2724_v11 }
 0xa52   :  { %v2693_v36 = vpop.f32.mrf.mxu2  ;;  %v2713_v37 = vpop.f32.mrf.mxu3 }
 0xa53   :  { %v2718_v28 = vadd.f32 %v2693_v36, %v4308_v33  ;;  %v2719_v39 = vadd.f32 %v2713_v37, %v4822_v2  ;;  %v2785_v40 = vpop.f32.mrf.mxu0 }
 0xa54   :  { %v2786_v41 = vadd.f32 %v3122_v47, %v2785_v40 }
 0xa55   :  { %3197 = vtanh.f32 %v2718_v28  ;;  %v2729_v18 = vmul.f32 0.5, %v2719_v39 }
 0xa56   :  { %v3194_v38 = vpop.eup %3193  ;;  %2809 = vst [vmem:[#allocation15] sm:$0xff] %v2786_v41 }
 0xa57   :  { %v3196_v63 = vpop.eup %3195  ;;  %v2722_v43 = vmul.f32 0.5, %v3194_v38  ;;  %3199 = vtanh.f32 %v2729_v18 }
 0xa58   :  { %v2726_v44 = vmul.f32 0.5, %v3196_v63 }
 0xa59   :  { %v2723_v45 = vadd.f32 0.5, %v2722_v43 }
 0xa5a   :  { %v2727_v60 = vadd.f32 0.5, %v2726_v44 }
 0xa5b   :  { %v3198_v16 = vpop.eup %3197  ;;  %v2788_v52 = vpop.f32.mrf.mxu0 }
 0xa5c   :  { %v2733_v29 = vmul.f32 %v2727_v60, %v2590_v55  ;;  %v2734_v57 = vmul.f32 %v3198_v16, %v2723_v45  ;;  %v2789_v32 = vadd.f32 %v3122_v47, %v2788_v52 }
 0xa5d   :  { %v3200_v33 = vpop.eup %3199 }
 0xa5e   :  { %2810 = vst [vmem:[#allocation15 + $0x8] sm:$0xff] %v2789_v32  ;;  %v2735_v22 = vadd.f32 %v2734_v57, %v2733_v29  ;;  %v2731_v51 = vmul.f32 0.5, %v3200_v33 }
 0xa60   :  { %3201 = vtanh.f32 %v2735_v22  ;;  %v2732_v50 = vadd.f32 0.5, %v2731_v51 }
 0xa63   :  { %v2791_v42 = vpop.f32.mrf.mxu0 }
 0xa64   :  { %v2792_v49 = vadd.f32 %v3122_v47, %v2791_v42 }
 0xa66   :  { %v3202_v48 = vpop.eup %3201  ;;  %2811 = vst [vmem:[#allocation15 + $0x10] sm:$0xff] %v2792_v49 }
 0xa67   :  { %v2737_v19 = vmul.f32 %v3202_v48, %v2732_v50 }
 0xa69   :  { %2805 = vmatmul.f32.gmra.mxu0 %v2737_v19 }
 0xa6b   :  { %v2794_v7 = vpop.f32.mrf.mxu0 }
 0xa6c   :  { %v2795_v20 = vadd.f32 %v3122_v47, %v2794_v7 }
 0xa6e   :  { %2812 = vst [vmem:[#allocation15 + $0x18] sm:$0xff] %v2795_v20 }
 0xa73   :  { %v2797_v21 = vpop.f32.mrf.mxu0 }
 0xa74   :  { %v2798_v54 = vadd.f32 %v3122_v47, %v2797_v21 }
 0xa76   :  { %2813 = vst [vmem:[#allocation15 + $0x20] sm:$0xff] %v2798_v54 }
 0xa7b   :  { %v2800_v26 = vpop.f32.mrf.mxu0 }
 0xa7c   :  { %v2801_v46 = vadd.f32 %v3122_v47, %v2800_v26 }
 0xa7e   :  { %2814 = vst [vmem:[#allocation15 + $0x28] sm:$0xff] %v2801_v46 }
 0xa83   :  { %v2803_v34 = vpop.f32.mrf.mxu0 }
 0xa84   :  { %v2804_v35 = vadd.f32 %v3122_v47, %v2803_v34 }
 0xa86   :  { %2815 = vst [vmem:[#allocation15 + $0x30] sm:$0xff] %v2804_v35 }
 0xae6   :  { %v2806_v25 = vpop.f32.mrf.mxu0 }
 0xae7   :  { %v2807_v17 = vadd.f32 %v3122_v47, %v2806_v25 }
 0xae9   :  { %2816 = vst [vmem:[#allocation15 + $0x38] sm:$0xff] %v2807_v17 }
 0xaea   :  { %2829 = dma.vmem_to_hbm [thread:$0]  %s2822_s25, 1024, %s2824_s1, [#allocation12], %s3345_s3, %s3345_s3, %s3346_s5  }
 0xaeb   :  { %3335 = dma.done.wait [#allocation12], 1024  }
 0xaec   :  { %3336 = vsyncadd [#allocation12], 4294966272 }
 0xaed   :  { %2834 = vsyncpa [#allocation11], 1 }
 0xaee   :  { %2835 = vsyncpa [#allocation14], 1 }
 0xaef   :  { %2836 = vsyncpa [#allocation12], 1 }
 0xaf0   :  { %2837 = vsyncmov [#allocation9] }
 0xaf3   :  { %s2838_s28 = vpop.sfrf %2837 }
 0xaf4   :  { %p3010_p0 = scmp.ne.s32.totalorder %s2838_s28, 0 }
 0xaf6   :  { %2842 = shalt.err (%p3010_p0)  }
 0xaf7   :  { %2844 = vsyncmov [#allocation9 + $0x1] }
 0xafa   :  { %s2845_s7 = vpop.sfrf %2844 }
 0xafb   :  { %p3011_p1 = scmp.ne.s32.totalorder %s2845_s7, 0 }
 0xafd   :  { %2849 = shalt.err (%p3011_p1)  }
 0xafe   :  { %2851 = vsyncmov [#allocation9 + $0x2] }
 0xb01   :  { %s2852_s10 = vpop.sfrf %2851 }
 0xb02   :  { %p3012_p2 = scmp.ne.s32.totalorder %s2852_s10, 0 }
 0xb04   :  { %2856 = shalt.err (%p3012_p2)  }
 0xb05   :  { %2858 = vsyncmov [#allocation9 + $0x3] }
 0xb08   :  { %s2859_s29 = vpop.sfrf %2858 }
 0xb09   :  { %p3013_p3 = scmp.ne.s32.totalorder %s2859_s29, 0 }
 0xb0b   :  { %2863 = shalt.err (%p3013_p3)  }

</bundles_post_ra>
